<compile_context>
chip_gen: v7x
topology: tpu7x:2x2x1
jax: 0.10.0
libtpu: 0.0.40
codegen_flags: <defaults>
</compile_context>

<pallas_src>
import functools
import math

import jax
import jax.numpy as jnp
import numpy as np
from jax import lax
from jax.experimental import pallas as pl
from jax.experimental.pallas import tpu as pltpu

# ---- static ArcMargin constants (CONFIG: s=30.0, m=0.5, ls_eps=0.0,
# easy_margin=CONFIG['ls_eps']=0.0 -> falsy -> hard-margin branch) ----
GEM_EPS = 1e-6
NORM_EPS = 1e-12          # F.normalize default eps
ARC_S = 30.0
ARC_M = 0.5
COS_M = math.cos(ARC_M)
SIN_M = math.sin(ARC_M)
TH = math.cos(math.pi - ARC_M)
MM = math.sin(math.pi - ARC_M) * ARC_M


def _round_up(a, b):
    return (a + b - 1) // b * b


def _vmem_cap_bytes():
    """Per-chip scoped-VMEM cap: ~half of physical VMEM, conservative fallback."""
    try:
        info = pltpu.get_tpu_info()
        cap = getattr(info, "vmem_capacity_bytes", None)
        if cap:
            return max(16 << 20, int(cap) // 2)   # v5e/v6e -> 64 MiB, v7x -> 32 MiB
    except Exception:
        pass
    return 32 << 20


# --------------------------------------------------------------------------
# Stage 1: GeM pooling -> embedding Linear -> L2 normalize   (single call)
# --------------------------------------------------------------------------
def gem_embed_kernel(p_ref, x_ref, w_emb_t_ref, b_emb_ref, emb_n_ref, *, pow_dtype):
    """p_ref:       (1, 1)     f32 SMEM       GeM exponent p
       x_ref:       (B, HW, C) any VMEM       backbone features, C lane-dense
       w_emb_t_ref: (C, E)     f32 VMEM       embedding weight, pre-transposed
       b_emb_ref:   (1, E)     f32 VMEM       embedding bias
       emb_n_ref:   (B, E)     matmul_dtype   L2-normalized embedding
    """
    p = p_ref[0, 0]

    # GeM: clamp + pow (EUP-heavy) optionally in bf16, mean accumulated in f32,
    # reduction runs along the sublane (HW) axis — plain VPU adds.
    x = jnp.maximum(x_ref[...].astype(pow_dtype), jnp.asarray(GEM_EPS, pow_dtype))
    xp = jnp.power(x, p.astype(pow_dtype)).astype(jnp.float32)      # (B, HW, C)
    pooled = jnp.power(jnp.mean(xp, axis=1), 1.0 / p)               # (B, C) f32

    emb = jnp.dot(pooled, w_emb_t_ref[...],
                  preferred_element_type=jnp.float32) + b_emb_ref[...]   # (B, E)

    # F.normalize: x / max(||x||, eps) == x * rsqrt(max(||x||^2, eps^2))
    inv = lax.rsqrt(jnp.maximum(jnp.sum(emb * emb, axis=-1, keepdims=True),
                                NORM_EPS * NORM_EPS))
    emb_n_ref[...] = (emb * inv).astype(emb_n_ref.dtype)


# --------------------------------------------------------------------------
# Stage 2: ArcMarginProduct head, tiled over the (padded) class axis
# --------------------------------------------------------------------------
def arc_margin_kernel(labels_ref, emb_n_ref, w_arc_t_ref, inv_wn_ref, out_ref):
    """labels_ref:  (B, 1)   i32           VMEM
       emb_n_ref:   (B, E)   matmul_dtype  VMEM   L2-normalized embeddings
       w_arc_t_ref: (E, TN)  matmul_dtype  VMEM   class tile of transposed arc weight
       inv_wn_ref:  (1, TN)  f32           VMEM   precomputed 1/||w_c|| per class
       out_ref:     (B, TN)  f32           VMEM   scaled logits for this class tile
    """
    j = pl.program_id(0)
    tn = out_ref.shape[-1]

    # Per-class 1/||w|| precomputed in the wrapper and applied AFTER the matmul:
    # B*TN multiplies, no (E, TN) f32 upcast / reduce inside the grid loop.
    cosine = jnp.dot(emb_n_ref[...], w_arc_t_ref[...],
                     preferred_element_type=jnp.float32) * inv_wn_ref[...]  # (B, TN)

    # Clamp: |cosine| can drift slightly past 1 from fp / bf16 rounding.
    sine = jnp.sqrt(jnp.maximum(1.0 - cosine * cosine, 0.0))
    phi = cosine * COS_M - sine * SIN_M
    phi = jnp.where(cosine > TH, phi, cosine - MM)   # easy_margin == False path

    col = j * tn + lax.broadcasted_iota(jnp.int32, cosine.shape, 1)
    # ls_eps == 0.0  ->  one_hot*phi + (1-one_hot)*cosine == where(match, phi, cosine)
    out_ref[...] = jnp.where(col == labels_ref[...], phi, cosine) * ARC_S


# --------------------------------------------------------------------------
# One-time ArcFace weight prep (do this at param-load time, NOT per forward)
# --------------------------------------------------------------------------
def prepare_arc_weights(w_arc, *, class_tile=8192, matmul_dtype=jnp.bfloat16):
    """Transpose, pad the class axis to a tile multiple, cast to matmul_dtype,
    and precompute the per-class inverse weight norm."""
    NC, E = w_arc.shape

    tn = _round_up(min(class_tile, _round_up(NC, 128)), 128)
    # Prefer >=2 class tiles so the "parallel" grid axis can shard across
    # v7x's 2 TensorCores.
    if NC > 128 and _round_up(NC, tn) // tn < 2:
        tn = max(128, _round_up((NC + 1) // 2, 128))
    nc_pad = _round_up(NC, tn)

    w_t = w_arc.T.astype(jnp.float32)                       # (E, NC)
    if nc_pad != NC:
        w_t = jnp.pad(w_t, ((0, 0), (0, nc_pad - NC)))      # zero-padded classes
    w_lp = w_t.astype(matmul_dtype)                          # (E, nc_pad)

    w32 = w_lp.astype(jnp.float32)
    inv_wn = lax.rsqrt(jnp.maximum(jnp.sum(w32 * w32, axis=0, keepdims=True),
                                   NORM_EPS * NORM_EPS))     # (1, nc_pad) f32

    return {"w_arc_t": w_lp, "inv_wn": inv_wn,
            "tn": int(tn), "nc": int(NC), "nc_pad": int(nc_pad)}


# --------------------------------------------------------------------------
# Wrapper
# --------------------------------------------------------------------------
def happywhale_forward(features, labels, params, *, arc_prepped=None,
                       class_tile=8192, matmul_dtype=jnp.bfloat16,
                       pow_dtype=jnp.float32, channels_last=False):
    """features: backbone feature maps, (B, C, H, W) if channels_last=False,
                 else (B, H, W, C)  (pass channels-last to skip the transpose).
       labels:   (B,) int class labels.
       arc_prepped: output of prepare_arc_weights() — pass it to avoid
                 re-materializing the big ArcFace weight every call."""
    if channels_last:
        B, H, W, C = features.shape
        x = features.reshape(B, H * W, C)                     # free reshape
    else:
        B, C, H, W = features.shape
        # TODO(synk): for production, have the backbone emit channels-last
        # features — this transpose is a full extra HBM pass in XLA.
        x = features.reshape(B, C, H * W).transpose(0, 2, 1)  # (B, HW, C)
    E = params["w_emb"].shape[0]

    if arc_prepped is None:
        # Convenience path only; prefer preparing once outside the step fn.
        arc_prepped = prepare_arc_weights(params["w_arc"], class_tile=class_tile,
                                          matmul_dtype=matmul_dtype)
    matmul_dtype = arc_prepped["w_arc_t"].dtype
    tn, NC, nc_pad = arc_prepped["tn"], arc_prepped["nc"], arc_prepped["nc_pad"]

    p = params["p"].reshape(1, 1).astype(jnp.float32)
    w_emb_t = params["w_emb"].T.astype(jnp.float32)           # (C, E), small
    b_emb = params["b_emb"].reshape(1, E).astype(jnp.float32)

    # ---- Stage 1: GeM + embedding + normalize (small, un-gridded) ----
    emb_n = pl.pallas_call(
        functools.partial(gem_embed_kernel, pow_dtype=pow_dtype),
        out_shape=jax.ShapeDtypeStruct((B, E), matmul_dtype),
        in_specs=[
            pl.BlockSpec(memory_space=pltpu.MemorySpace.SMEM),   # p
            pl.BlockSpec(memory_space=pltpu.MemorySpace.VMEM),   # x
            pl.BlockSpec(memory_space=pltpu.MemorySpace.VMEM),   # w_emb_t
            pl.BlockSpec(memory_space=pltpu.MemorySpace.VMEM),   # b_emb
        ],
        out_specs=pl.BlockSpec(memory_space=pltpu.MemorySpace.VMEM),
    )(p, x, w_emb_t, b_emb)

    # ---- Stage 2: arc head, tiled over (padded) classes ----
    labels2d = labels.astype(jnp.int32).reshape(B, 1)
    w_itemsize = jnp.dtype(matmul_dtype).itemsize

    w_tile_bytes = E * tn * w_itemsize
    out_tile_bytes = B * tn * 4
    inv_tile_bytes = tn * 4
    resident_bytes = B * E * w_itemsize + B * 4
    vmem_need = (2 * (w_tile_bytes + out_tile_bytes + inv_tile_bytes)
                 + 2 * resident_bytes + (4 << 20))
    vmem_bytes = int(min(max(vmem_need, 16 << 20), _vmem_cap_bytes()))

    cost = pl.CostEstimate(
        flops=2 * B * E * nc_pad + 8 * B * nc_pad,
        transcendentals=B * nc_pad,
        bytes_accessed=(E * nc_pad * w_itemsize + nc_pad * 4
                        + B * nc_pad * 4 + B * E * w_itemsize + B * 4),
    )

    out_pad = pl.pallas_call(
        arc_margin_kernel,
        out_shape=jax.ShapeDtypeStruct((B, nc_pad), jnp.float32),
        grid=(nc_pad // tn,),
        in_specs=[
            pl.BlockSpec((B, 1), lambda j: (0, 0)),              # labels (resident)
            pl.BlockSpec((B, E), lambda j: (0, 0)),              # emb_n (resident)
            pl.BlockSpec((E, tn), lambda j: (0, j)),             # w_arc tile (dominant DMA)
            pl.BlockSpec((1, tn), lambda j: (0, j)),             # inv_wn tile (~tiny)
        ],
        out_specs=pl.BlockSpec((B, tn), lambda j: (0, j)),
        compiler_params=pltpu.CompilerParams(
            dimension_semantics=("parallel",),
            vmem_limit_bytes=vmem_bytes,
        ),
        cost_estimate=cost,
    )(labels2d, emb_n, arc_prepped["w_arc_t"], arc_prepped["inv_wn"])

    # Drop padded (zero-weight, hence harmless) class columns.
    return out_pad[:, :NC]


# --------------------------------------------------------------------------
# Pure-JAX reference mirroring the PyTorch forward
# --------------------------------------------------------------------------
def happywhale_reference(features_nchw, labels, params, matmul_dtype=None,
                         pow_dtype=jnp.float32):
    B, C, H, W = features_nchw.shape
    p = params["p"][0]
    x = jnp.maximum(features_nchw.astype(pow_dtype), jnp.asarray(GEM_EPS, pow_dtype))
    xp = jnp.power(x, p.astype(pow_dtype)).astype(jnp.float32)
    pooled = jnp.mean(xp.reshape(B, C, H * W), axis=-1) ** (1.0 / p)        # GeM
    emb = pooled @ params["w_emb"].T + params["b_emb"]                      # Linear
    emb_n = emb / jnp.maximum(jnp.linalg.norm(emb, axis=-1, keepdims=True), NORM_EPS)

    w = params["w_arc"]
    if matmul_dtype is not None:
        w_lp = w.astype(matmul_dtype)
        w32 = w_lp.astype(jnp.float32)
        w_norm = jnp.maximum(jnp.linalg.norm(w32, axis=-1, keepdims=True), NORM_EPS)
        cosine = jnp.dot(emb_n.astype(matmul_dtype), w_lp.T,
                         preferred_element_type=jnp.float32) / w_norm.T
    else:
        w_norm = jnp.maximum(jnp.linalg.norm(w, axis=-1, keepdims=True), NORM_EPS)
        cosine = (emb_n @ w.T) / w_norm.T

    sine = jnp.sqrt(jnp.maximum(1.0 - cosine * cosine, 0.0))
    phi = cosine * COS_M - sine * SIN_M
    phi = jnp.where(cosine > TH, phi, cosine - MM)
    one_hot = jax.nn.one_hot(labels, w.shape[0], dtype=jnp.float32)
    return (one_hot * phi + (1.0 - one_hot) * cosine) * ARC_S


if __name__ == "__main__":
    # Small shapes consistent with the module's forward:
    #   backbone feature maps (B, C, H, W) -> GeM -> (B, C)
    #   -> Linear(C, E) -> ArcMargin(E, NC)
    # NC deliberately NOT a multiple of 128 to exercise the padding path,
    # class_tile=128 so the class grid has several steps.
    B, C, H, W = 4, 256, 7, 7
    E, NC = 192, 333

    key = jax.random.PRNGKey(0)
    k_feat, k_lab, k_we, k_be, k_wa = jax.random.split(key, 5)

    features = jax.random.normal(k_feat, (B, C, H, W), dtype=jnp.float32)
    labels = jax.random.randint(k_lab, (B,), 0, NC, dtype=jnp.int32)

    xavier_emb = math.sqrt(6.0 / (C + E))
    xavier_arc = math.sqrt(6.0 / (E + NC))
    params = {
        "p": jnp.ones((1,), jnp.float32) * 3.0,                              # GeM p
        "w_emb": jax.random.uniform(k_we, (E, C), jnp.float32,
                                    -xavier_emb, xavier_emb),                # Linear weight
        "b_emb": 0.01 * jax.random.normal(k_be, (E,), jnp.float32),          # Linear bias
        "w_arc": jax.random.uniform(k_wa, (NC, E), jnp.float32,
                                    -xavier_arc, xavier_arc),                # ArcMargin weight
    }

    # f32 weight path: faithful to the PyTorch module, tight tolerance.
    arc_f32 = prepare_arc_weights(params["w_arc"], class_tile=128,
                                  matmul_dtype=jnp.float32)
    out_f32 = jax.block_until_ready(
        happywhale_forward(features, labels, params, arc_prepped=arc_f32))
    ref_f32 = jax.block_until_ready(happywhale_reference(features, labels, params))
    np.testing.assert_allclose(np.asarray(out_f32), np.asarray(ref_f32),
                               rtol=1e-3, atol=1e-3)

    # bf16 weight path (default) + bf16 GeM pow + channels-last features,
    # checked against a reference that applies the same low-precision casts.
    arc_bf16 = prepare_arc_weights(params["w_arc"], class_tile=128,
                                   matmul_dtype=jnp.bfloat16)
    features_nhwc = jnp.transpose(features, (0, 2, 3, 1))
    out_bf16 = jax.block_until_ready(
        happywhale_forward(features_nhwc, labels, params, arc_prepped=arc_bf16,
                           pow_dtype=jnp.bfloat16, channels_last=True))
    ref_bf16 = jax.block_until_ready(
        happywhale_reference(features, labels, params,
                             matmul_dtype=jnp.bfloat16, pow_dtype=jnp.bfloat16))
    np.testing.assert_allclose(np.asarray(out_bf16), np.asarray(ref_bf16),
                               rtol=1e-2, atol=2e-2)

    assert out_f32.shape == (B, NC) and out_f32.dtype == jnp.float32
    assert out_bf16.shape == (B, NC) and out_bf16.dtype == jnp.float32
    print("KERNEL_OK")
</pallas_src>

<mosaic_0001>
module attributes {stable_mosaic.version = 11 : i64} {
  func.func @gem_embed_kernel(%arg0: memref<1x1xf32, #tpu.memory_space<smem>>, %arg1: memref<4x49x256xf32, #tpu.memory_space<vmem>>, %arg2: memref<256x192xf32, #tpu.memory_space<vmem>>, %arg3: memref<1x192xf32, #tpu.memory_space<vmem>>, %arg4: memref<4x192xf32, #tpu.memory_space<vmem>>) attributes {dimension_semantics = [], scalar_prefetch = 0 : i64, scratch_operands = 0 : i64, tpu.core_type = #tpu.core_type<tc>} {
    %c0 = arith.constant 0 : index
    %c0_0 = arith.constant 0 : index
    %0 = memref.load %arg0[%c0, %c0_0] : memref<1x1xf32, #tpu.memory_space<smem>>
    %c0_1 = arith.constant 0 : index
    %c0_2 = arith.constant 0 : index
    %c0_3 = arith.constant 0 : index
    %1 = vector.load %arg1[%c0_1, %c0_2, %c0_3] : memref<4x49x256xf32, #tpu.memory_space<vmem>>, vector<4x49x256xf32>
    %cst = arith.constant 9.99999997E-7 : f32
    %2 = vector.broadcast %cst : f32 to vector<4x49x256xf32>
    %3 = arith.maximumf %1, %2 : vector<4x49x256xf32>
    %4 = vector.broadcast %0 : f32 to vector<4x49x256xf32>
    %5 = math.powf %3, %4 : vector<4x49x256xf32>
    %cst_4 = arith.constant dense<0.000000e+00> : vector<4x256xf32>
    %6 = vector.multi_reduction <add>, %5, %cst_4 [1] : vector<4x49x256xf32> to vector<4x256xf32>
    %cst_5 = arith.constant 4.900000e+01 : f32
    %7 = vector.broadcast %cst_5 : f32 to vector<4x256xf32>
    %8 = arith.divf %6, %7 : vector<4x256xf32>
    %cst_6 = arith.constant 1.000000e+00 : f32
    %9 = arith.divf %cst_6, %0 : f32
    %10 = vector.broadcast %9 : f32 to vector<4x256xf32>
    %11 = math.powf %8, %10 : vector<4x256xf32>
    %c0_7 = arith.constant 0 : index
    %c0_8 = arith.constant 0 : index
    %12 = vector.load %arg2[%c0_7, %c0_8] : memref<256x192xf32, #tpu.memory_space<vmem>>, vector<256x192xf32>
    %cst_9 = arith.constant dense<0.000000e+00> : vector<4x192xf32>
    %13 = tpu.matmul %11, %12, %cst_9 {dimension_numbers = #tpu.dot_dimension_numbers<[1], [0], [0], [1], [0, 0, 1, 1], [], []>} : vector<4x256xf32>, vector<256x192xf32>, vector<4x192xf32> -> vector<4x192xf32>
    %c0_10 = arith.constant 0 : index
    %c0_11 = arith.constant 0 : index
    %14 = vector.load %arg3[%c0_10, %c0_11] : memref<1x192xf32, #tpu.memory_space<vmem>>, vector<1x192xf32>
    %15 = vector.broadcast %14 : vector<1x192xf32> to vector<4x192xf32>
    %16 = arith.addf %13, %15 : vector<4x192xf32>
    %17 = arith.mulf %16, %16 : vector<4x192xf32>
    %cst_12 = arith.constant dense<0.000000e+00> : vector<4xf32>
    %18 = vector.multi_reduction <add>, %17, %cst_12 [1] : vector<4x192xf32> to vector<4xf32>
    %19 = vector.shape_cast %18 : vector<4xf32> to vector<4x1xf32>
    %cst_13 = arith.constant 1.000000e-24 : f32
    %20 = vector.broadcast %cst_13 : f32 to vector<4x1xf32>
    %21 = arith.maximumf %19, %20 : vector<4x1xf32>
    %22 = math.rsqrt %21 : vector<4x1xf32>
    %23 = vector.broadcast %22 : vector<4x1xf32> to vector<4x192xf32>
    %24 = arith.mulf %16, %23 : vector<4x192xf32>
    %c0_14 = arith.constant 0 : index
    %c0_15 = arith.constant 0 : index
    %25 = vector.load %arg4[%c0_14, %c0_15] : memref<4x192xf32, #tpu.memory_space<vmem>>, vector<4x192xf32>
    tpu.vector_store %arg4[%c0_14, %c0_15], %24 {strides = array<i32>} : memref<4x192xf32, #tpu.memory_space<vmem>>, vector<4x192xf32>,
    return
  }
}

</mosaic_0001>

<bundles_post_ra>
// kernel: tpu_custom_call.1
= control target key start
LH: loop header
LB: loop body
LE: loop exit
PB: predicated region body
PF: predicated region fallthrough
CT: control target
= control target key end

     0   :  { %s10628_s0 = inlined_call_operand.<no memory space> [shape: f32[1,1], index: 0, kind: input, shape index: {}]   ;;  %s10629_s1 = inlined_call_operand.vmem [shape: f32[4,49,256], index: 1, kind: input, shape index: {}]   ;;  %s10630_s2 = inlined_call_operand.vmem [shape: f32[256,192], index: 2, kind: input, shape index: {}]   ;;  %s10631_s3 = inlined_call_operand.vmem [shape: f32[1,192], index: 3, kind: input, shape index: {}]   ;;  %s10632_s4 = inlined_call_operand.hbm [shape: f32[4,192], index: 4, kind: output, shape index: {}]  }
   0x1   :  { %v4227_v0 = vstv %s10628_s0  ;;  %v316_v1 = vld [vmem:[%s10630_s2 + $0x8] sm:$0xff]  ;;  %v318_v2 = vld [vmem:[%s10630_s2 + $0x18] sm:$0xff]  ;;  %v315_v3 = vld [vmem:[%s10630_s2] sm:$0xff] }
   0x2   :  { %3912 = vrcp.f32 %v4227_v0  ;;  %v515_v4 = vpack.c.bf16 %v318_v2, %v316_v1  ;;  %v317_v5 = vld [vmem:[%s10630_s2 + $0x10] sm:$0xff]  ;;  %v320_v6 = vld [vmem:[%s10630_s2 + $0x28] sm:$0xff]  ;;  %v322_v7 = vld [vmem:[%s10630_s2 + $0x38] sm:$0xff]  ;;  %vm10638_vm1 = vcmp.lt.f32.partialorder %v4227_v0, 0 }
   0x3   :  { %v517_v8 = vpack.c.bf16 %v317_v5, %v315_v3  ;;  %v519_v9 = vpack.c.bf16 %v322_v7, %v320_v6  ;;  %v319_v10 = vld [vmem:[%s10630_s2 + $0x20] sm:$0xff]  ;;  %v321_v11 = vld [vmem:[%s10630_s2 + $0x30] sm:$0xff]  ;;  %v324_v12 = vld [vmem:[%s10630_s2 + $0x48] sm:$0xff] }
   0x4   :  { %516 = vmatprep.subr.bf16.mxu0 %v515_v4  ;;  %v326_v13 = vld [vmem:[%s10630_s2 + $0x58] sm:$0xff]  ;;  %v521_v14 = vpack.c.bf16 %v321_v11, %v319_v10  ;;  %v323_v16 = vld [vmem:[%s10630_s2 + $0x40] sm:$0xff]  ;;  %v325_v17 = vld [vmem:[%s10630_s2 + $0x50] sm:$0xff] }
   0x5   :  { %518 = vmatpush1.bf16.msra.mxu0 %v517_v8  ;;  %v523_v15 = vpack.c.bf16 %v326_v13, %v324_v12  ;;  %v328_v18 = vld [vmem:[%s10630_s2 + $0x68] sm:$0xff]  ;;  %v330_v19 = vld [vmem:[%s10630_s2 + $0x78] sm:$0xff]  ;;  %v525_v20 = vpack.c.bf16 %v325_v17, %v323_v16  ;;  %v327_v22 = vld [vmem:[%s10630_s2 + $0x60] sm:$0xff] }
   0x6   :  { %520 = vmatprep.subr.bf16.mxu0 %v519_v9  ;;  %v527_v21 = vpack.c.bf16 %v330_v19, %v328_v18  ;;  %v329_v23 = vld [vmem:[%s10630_s2 + $0x70] sm:$0xff]  ;;  %v332_v24 = vld [vmem:[%s10630_s2 + $0x88] sm:$0xff]  ;;  %v334_v25 = vld [vmem:[%s10630_s2 + $0x98] sm:$0xff] }
   0x7   :  { %v529_v27 = vpack.c.bf16 %v329_v23, %v327_v22  ;;  %v531_v28 = vpack.c.bf16 %v334_v25, %v332_v24  ;;  %v331_v29 = vld [vmem:[%s10630_s2 + $0x80] sm:$0xff]  ;;  %v333_v30 = vld [vmem:[%s10630_s2 + $0x90] sm:$0xff]  ;;  %v336_v31 = vld [vmem:[%s10630_s2 + $0xa8] sm:$0xff] }
   0x8   :  { %v338_v32 = vld [vmem:[%s10630_s2 + $0xb8] sm:$0xff]  ;;  %v533_v33 = vpack.c.bf16 %v333_v30, %v331_v29  ;;  %v335_v35 = vld [vmem:[%s10630_s2 + $0xa0] sm:$0xff]  ;;  %v337_v36 = vld [vmem:[%s10630_s2 + $0xb0] sm:$0xff] }
   0x9   :  { %522 = vmatpush1.bf16.msra.mxu0 %v521_v14  ;;  %v535_v34 = vpack.c.bf16 %v338_v32, %v336_v31  ;;  %v340_v37 = vld [vmem:[%s10630_s2 + $0xc8] sm:$0xff]  ;;  %v342_v38 = vld [vmem:[%s10630_s2 + $0xd8] sm:$0xff]  ;;  %v537_v39 = vpack.c.bf16 %v337_v36, %v335_v35  ;;  %v339_v41 = vld [vmem:[%s10630_s2 + $0xc0] sm:$0xff]  ;;  %v4427_v32 = vand.u32 2147483647, %v4227_v0 }
   0xa   :  { %524 = vmatprep.subr.bf16.mxu0 %v523_v15  ;;  %v539_v40 = vpack.c.bf16 %v342_v38, %v340_v37  ;;  %v341_v42 = vld [vmem:[%s10630_s2 + $0xd0] sm:$0xff]  ;;  %v344_v43 = vld [vmem:[%s10630_s2 + $0xe8] sm:$0xff]  ;;  %v346_v44 = vld [vmem:[%s10630_s2 + $0xf8] sm:$0xff] }
   0xb   :  { %v541_v45 = vpack.c.bf16 %v341_v42, %v339_v41  ;;  %v543_v46 = vpack.c.bf16 %v346_v44, %v344_v43  ;;  %v343_v47 = vld [vmem:[%s10630_s2 + $0xe0] sm:$0xff]  ;;  %v345_v48 = vld [vmem:[%s10630_s2 + $0xf0] sm:$0xff]  ;;  %v348_v49 = vld [vmem:[%s10630_s2 + $0x108] sm:$0xff]  ;;  %vm10633_vm0 = vcmp.eq.f32.partialorder %v4427_v32, 2139095040  ;;  %vm591_vm4 = vcmp.lt.f32.partialorder %v4427_v32, 1266679808 }
   0xc   :  { %v3913_v26 = vpop.eup %3912  ;;  %v350_v50 = vld [vmem:[%s10630_s2 + $0x118] sm:$0xff]  ;;  %v545_v51 = vpack.c.bf16 %v345_v48, %v343_v47  ;;  %v347_v53 = vld [vmem:[%s10630_s2 + $0x100] sm:$0xff]  ;;  %v349_v54 = vld [vmem:[%s10630_s2 + $0x110] sm:$0xff] }
   0xd   :  { %3491 = vpush %v3913_v26  ;;  %526 = vmatpush1.bf16.msra.mxu0 %v525_v20  ;;  %v547_v52 = vpack.c.bf16 %v350_v50, %v348_v49  ;;  %v352_v55 = vld [vmem:[%s10630_s2 + $0x128] sm:$0xff]  ;;  %v354_v56 = vld [vmem:[%s10630_s2 + $0x138] sm:$0xff]  ;;  %v549_v57 = vpack.c.bf16 %v349_v54, %v347_v53  ;;  %v351_v59 = vld [vmem:[%s10630_s2 + $0x120] sm:$0xff] }
   0xe   :  { %528 = vmatprep.subr.bf16.mxu0 %v527_v21  ;;  %v551_v58 = vpack.c.bf16 %v354_v56, %v352_v55  ;;  %v353_v60 = vld [vmem:[%s10630_s2 + $0x130] sm:$0xff]  ;;  %v356_v61 = vld [vmem:[%s10630_s2 + $0x148] sm:$0xff]  ;;  %v358_v62 = vld [vmem:[%s10630_s2 + $0x158] sm:$0xff] }
   0xf   :  { %v553_v63 = vpack.c.bf16 %v353_v60, %v351_v59  ;;  %v555_v1 = vpack.c.bf16 %v358_v62, %v356_v61  ;;  %v355_v2 = vld [vmem:[%s10630_s2 + $0x140] sm:$0xff]  ;;  %v357_v3 = vld [vmem:[%s10630_s2 + $0x150] sm:$0xff]  ;;  %v360_v4 = vld [vmem:[%s10630_s2 + $0x168] sm:$0xff] }
  0x10   :  { %v362_v5 = vld [vmem:[%s10630_s2 + $0x178] sm:$0xff]  ;;  %v557_v6 = vpack.c.bf16 %v357_v3, %v355_v2  ;;  %v21_v7 = vld [vmem:[%s10629_s1 + $0x8] sm:$0xff]  ;;  %v359_v9 = vld [vmem:[%s10630_s2 + $0x160] sm:$0xff] }
  0x11   :  { %530 = vmatpush1.bf16.msra.mxu0 %v529_v27  ;;  %v559_v8 = vpack.c.bf16 %v362_v5, %v360_v4  ;;  %v361_v10 = vld [vmem:[%s10630_s2 + $0x170] sm:$0xff]  ;;  %v364_v11 = vld [vmem:[%s10630_s2 + $0x188] sm:$0xff]  ;;  %v366_v12 = vld [vmem:[%s10630_s2 + $0x198] sm:$0xff]  ;;  %v4383_v13 = vmax.f32 %v21_v7, 1e-06 }
  0x12   :  { %532 = vmatprep.subr.bf16.mxu0 %v531_v28  ;;  %v561_v14 = vpack.c.bf16 %v361_v10, %v359_v9  ;;  %v563_v15 = vpack.c.bf16 %v366_v12, %v364_v11  ;;  %v363_v16 = vld [vmem:[%s10630_s2 + $0x180] sm:$0xff]  ;;  %v365_v17 = vld [vmem:[%s10630_s2 + $0x190] sm:$0xff]  ;;  %v23_v18 = vld [vmem:[%s10629_s1 + $0x18] sm:$0xff]  ;;  %v10642_v10 = vmov 0  }
  0x13   :  { %10755 = vst [vmem:[#allocation6_spill] sm:$0xff] %v4383_v13  ;;  %v368_v19 = vld [vmem:[%s10630_s2 + $0x1a8] sm:$0xff]  ;;  %v370_v20 = vld [vmem:[%s10630_s2 + $0x1b8] sm:$0xff]  ;;  %v4401_v21 = vand.u32 2147483647, %v4383_v13  ;;  %v565_v22 = vpack.c.bf16 %v365_v17, %v363_v16  ;;  %v367_v26 = vld [vmem:[%s10630_s2 + $0x1a0] sm:$0xff] }
  0x14   :  { %v25_v23 = vld [vmem:[%s10629_s1 + $0x28] sm:$0xff]  ;;  %v4406_v24 = vmax.f32 %v23_v18, 1e-06  ;;  %v567_v25 = vpack.c.bf16 %v370_v20, %v368_v19  ;;  %v369_v27 = vld [vmem:[%s10630_s2 + $0x1b0] sm:$0xff]  ;;  %v27_v28 = vld [vmem:[%s10629_s1 + $0x38] sm:$0xff]  ;;  %v4529_v11 = vsel %vm10638_vm1, 2139095040, %v10642_v10 }
  0x15   :  { %534 = vmatpush1.bf16.msra.mxu0 %v533_v33  ;;  %v372_v29 = vld [vmem:[%s10630_s2 + $0x1c8] sm:$0xff]  ;;  %v374_v30 = vld [vmem:[%s10630_s2 + $0x1d8] sm:$0xff]  ;;  %v4429_v33 = vmax.f32 %v25_v23, 1e-06  ;;  %3914 = vlog2.f32 %v4401_v21  ;;  %v4432_v35 = vmax.f32 %v27_v28, 1e-06 }
  0x16   :  { %536 = vmatprep.subr.bf16.mxu0 %v535_v34  ;;  %10756 = vst [vmem:[#allocation7_spill] sm:$0xff] %v4406_v24  ;;  %v29_v31 = vld [vmem:[%s10629_s1 + $0x48] sm:$0xff]  ;;  %v569_v34 = vpack.c.bf16 %v369_v27, %v367_v26  ;;  %v4435_v36 = vand.u32 2147483647, %v4406_v24  ;;  %v571_v37 = vpack.c.bf16 %v374_v30, %v372_v29  ;;  %v371_v38 = vld [vmem:[%s10630_s2 + $0x1c0] sm:$0xff]  ;;  %v378_v43 = vld [vmem:[%s10630_s2 + $0x1f8] sm:$0xff] }
  0x17   :  { %v4446_v41 = vmax.f32 %v29_v31, 1e-06  ;;  %v376_v42 = vld [vmem:[%s10630_s2 + $0x1e8] sm:$0xff]  ;;  %v4460_v47 = vand.u32 2147483647, %v4429_v33  ;;  %v377_v53 = vld [vmem:[%s10630_s2 + $0x1f0] sm:$0xff] }
  0x18   :  { %v33_v44 = vld [vmem:[%s10629_s1 + $0x68] sm:$0x1]  ;;  %3916 = vlog2.f32 %v4435_v36  ;;  %v4466_v50 = vand.u32 2147483647, %v4432_v35  ;;  %v35_v60 = vld [vmem:[%s10629_s1 + $0x78] sm:$0xff]  ;;  %vm651_vm7 = vcmp.lt.f32.partialorder %v4383_v13, 0 }
  0x19   :  { %538 = vmatpush1.bf16.msra.mxu0 %v537_v39  ;;  %v373_v39 = vld [vmem:[%s10630_s2 + $0x1d0] sm:$0xff]  ;;  %v4474_v54 = vmax.f32 %v33_v44, 1e-06  ;;  %v4477_v55 = vand.u32 2147483647, %v4446_v41  ;;  %3918 = vlog2.f32 %v4460_v47  ;;  %v37_v5 = vld [vmem:[%s10629_s1 + $0x88] sm:$0xff] }
  0x1a   :  { %540 = vmatprep.subr.bf16.mxu0 %v539_v40  ;;  %v31_v40 = vld [vmem:[%s10629_s1 + $0x58] sm:$0xff]  ;;  %v573_v48 = vpack.c.bf16 %v373_v39, %v371_v38  ;;  %3920 = vlog2.f32 %v4466_v50  ;;  %v4505_v3 = vmax.f32 %v35_v60, 1e-06  ;;  %vm10634_vm8 = vcmp.eq.f32.partialorder %v4383_v13, 0  ;;  %v49_v17 = vld [vmem:[%s10629_s1 + $0xe8] sm:$0xff] }
  0x1b   :  { %v4462_v49 = vmax.f32 %v31_v40, 1e-06  ;;  %3922 = vlog2.f32 %v4477_v55  ;;  %v4492_v61 = vand.u32 2147483647, %v4474_v54  ;;  %v39_v7 = vld [vmem:[%s10629_s1 + $0x98] sm:$0xff]  ;;  %v53_v19 = vld [vmem:[%s10629_s1 + $0x108] sm:$0xff]  ;;  %vm4590_vm12 = vmand %vm10638_vm1, %vm10634_vm8 }
  0x1c   :  { %v47_v16 = vld [vmem:[%s10629_s1 + $0xd8] sm:$0x1]  ;;  %vm655_vm9 = vcmp.gt.f32.partialorder %v4401_v21, 1065353216  ;;  %v4554_v20 = vand.u32 2147483647, %v4505_v3  ;;  %vm654_vm11 = vcmp.lt.s32.totalorder %v4383_v13, 0 }
  0x1d   :  { %542 = vmatpush1.bf16.msra.mxu0 %v541_v45  ;;  %v592_v45 = vtrunc.f32 %v4427_v32  ;;  %v51_v18 = vld [vmem:[%s10629_s1 + $0xf8] sm:$0xff]  ;;  %v4562_v26 = vmax.f32 %v37_v5, 1e-06  ;;  %v4564_v27 = vmax.f32 %v39_v7, 1e-06  ;;  %vm4607_vm13 = vmxor %vm10638_vm1, %vm655_vm9  ;;  %vm10635_vm15 = vcmp.lt.f32.partialorder %v4406_v24, 0 }
  0x1e   :  { %544 = vmatprep.subr.bf16.mxu0 %v543_v46  ;;  %v588_v46 = vtrunc.f32 %v4227_v0  ;;  %v55_v23 = vld [vmem:[%s10629_s1 + $0x118] sm:$0xff]  ;;  %v4599_v44 = vmax.f32 %v49_v17, 1e-06  ;;  %v10780_v17 = vmov 0  ;;  %vm863_vm8 = vcmp.gt.f32.partialorder %v4460_v47, 1065353216 }
  0x1f   :  { %v593_v56 = vcvt.f32.s32 %v592_v45  ;;  %v3915_v59 = vpop.eup %3914  ;;  %v59_v31 = vld [vmem:[%s10629_s1 + $0x138] sm:$0xff]  ;;  %v4601_v45 = vmax.f32 %v51_v18, 1e-06  ;;  %v4807_v60 = vand.u32 2147483647, %v4564_v27 }
  0x20   :  { %vm589_vm2 = vcmp.ne.f32.partialorder %v4227_v0, %v588_v46  ;;  %v633_v4 = vmul.f32 %v3915_v59, %v4227_v0  ;;  %10768 = vst [vmem:[#allocation11_spill] sm:$0xff] %v4599_v44  ;;  %v4635_v59 = vmax.f32 %v53_v19, 1e-06  ;;  %v71_v5 = vld [vmem:[%s10629_s1 + $0x198] sm:$0xff]  ;;  %v10808_v46 = vmov 0 }
  0x21   :  { %546 = vmatpush1.bf16.msra.mxu0 %v545_v51  ;;  %v575_v51 = vpack.c.bf16 %v378_v43, %v376_v42  ;;  %v594_v62 = vand.u32 1, %v593_v56  ;;  %vm4496_vm3 = vmor %vm589_vm2, %vm10633_vm0  ;;  %v61_v42 = vld [vmem:[%s10629_s1 + $0x148] sm:$0x1]  ;;  %v4597_v43 = vmax.f32 %v47_v16, 1e-06  ;;  %10769 = vst [vmem:[#allocation12_spill] sm:$0xff] %v4601_v45 }
  0x22   :  { %548 = vmatprep.subr.bf16.mxu0 %v547_v52  ;;  %v375_v52 = vld [vmem:[%s10630_s2 + $0x1e0] sm:$0xff]  ;;  %vm596_vm6 = vmneg %vm4496_vm3  ;;  %vm10636_vm2 = vcmp.eq.f32.partialorder %v4406_v24, 0  ;;  %v67_v56 = vld [vmem:[%s10629_s1 + $0x178] sm:$0xff]  ;;  %10774 = vst [vmem:[#allocation13_spill] sm:$0xff] %v4635_v59  ;;  %v4691_v19 = vmax.f32 %v61_v42, 1e-06 }
  0x23   :  { %vm4520_vm5 = vcmp.eq.s32.totalorder %v594_v62, 1  ;;  %vm4675_vm0 = vmand %vm10635_vm15, %vm4496_vm3  ;;  %v75_v28 = vld [vmem:[%s10629_s1 + $0x1b8] sm:$0x1]  ;;  %10810 = vst [vmem:[#allocation25_spill] sm:$0xff] %v4807_v60  ;;  %v10850_v59 = vmov 0  ;;  %v10853_v45 = vmov 0 }
  0x24   :  { %vm4571_vm10 = vmand %vm4520_vm5, %vm596_vm6  ;;  %vm759_vm6 = vcmp.gt.f32.partialorder %v4435_v36, 1065353216  ;;  %v10781_v17 = vsel %vm4675_vm0, 4294967295, %v10780_v17  ;;  %10784 = vst [vmem:[#allocation17_spill] sm:$0xff] %v4691_v19  ;;  %vm10641_vm0 = vcmp.eq.f32.partialorder %v4432_v35, 0 }
  0x25   :  { %550 = vmatpush1.bf16.msra.mxu0 %v549_v57  ;;  %v577_v57 = vpack.c.bf16 %v377_v53, %v375_v52  ;;  %vm4621_vm14 = vmand %vm591_vm4, %vm4571_vm10  ;;  %v10772_v52 = vmov 0  ;;  %vm10637_vm10 = vcmp.eq.f32.partialorder %v4429_v33, 0 }
  0x26   :  { %552 = vmatprep.subr.bf16.mxu0 %v551_v58  ;;  %v4485_v58 = vand.u32 2147483647, %v4462_v49  ;;  %v10773_v52 = vsel %vm4621_vm14, 4294967295, %v10772_v52  ;;  %vm4641_vm4 = vmand %vm651_vm7, %vm4496_vm3 }
  0x27   :  { %vm4683_vm5 = vmand %vm10638_vm1, %vm10636_vm2 }
  0x28   :  { %3924 = vlog2.f32 %v4485_v58  ;;  %vm4701_vm15 = vmxor %vm10638_vm1, %vm759_vm6  ;;  %vm4724_vm6 = vcmp.ne.f32.partialorder %v4227_v0, %v4227_v0 }
  0x29   :  { %554 = vmatpush1.bf16.msra.mxu0 %v553_v63  ;;  %v10757_v63 = vmov 0  ;;  %3926 = vlog2.f32 %v4492_v61  ;;  %vm4715_vm9 = vmand %vm10638_vm1, %vm10637_vm10  ;;  %vm10802_vm10 = vcmp.lt.f32.partialorder %v4429_v33, 0 }
  0x2a   :  { %556 = vmatprep.subr.bf16.mxu0 %v555_v1  ;;  %v10758_v63 = vsel %vm4496_vm3, 4294967295, %v10757_v63  ;;  %v10640_v1 = vmov 2139095040   ;;  %3928 = vpow2.f32 %v633_v4  ;;  %vm4740_vm2 = vmxor %vm10638_vm1, %vm863_vm8 }
  0x2b   :  { %v4503_v2 = vsel %vm10638_vm1, 0, %v10640_v1  ;;  %3930 = vlog2.f32 %v4554_v20  ;;  %vm4761_vm8 = vmand %vm654_vm11, %vm4621_vm14  ;;  %vm967_vm1 = vcmp.gt.f32.partialorder %v4466_v50, 1065353216 }
  0x2c   :  { %v620_v12 = vxor.u32 2147483648, %v4503_v2  ;;  %vm10805_vm11 = vmor %vm4590_vm12, %vm4607_vm13  ;;  %vm10807_vm13 = vcmp.lt.f32.partialorder %v4432_v35, 0 }
  0x2d   :  { %558 = vmatpush1.bf16.msra.mxu0 %v557_v6  ;;  %v3917_v6 = vpop.eup %3916  ;;  %vm10806_vm12 = vmor %vm4683_vm5, %vm4701_vm15  ;;  %vm10811_vm15 = vcmp.lt.f32.partialorder %v4406_v24, 0  ;;  %vm10818_vm5 = vcmp.lt.f32.partialorder %v4227_v0, 0 }
  0x2e   :  { %560 = vmatprep.subr.bf16.mxu0 %v559_v8  ;;  %v41_v8 = vld [vmem:[%s10629_s1 + $0xa8] sm:$0xff]  ;;  %v737_v29 = vmul.f32 %v3917_v6, %v4227_v0  ;;  %v4651_v6 = vmax.f32 %v55_v23, 1e-06  ;;  %v4669_v16 = vsel %vm4621_vm14, %v620_v12, %v4503_v2  ;;  %v4689_v12 = vand.u32 2147483647, %v4562_v26 }
  0x2f   :  { %v771_v39 = vsel %vm10806_vm12, 2139095040, %v10642_v10  ;;  %v4813_v18 = vsel %vm10811_vm15, %v4669_v16, %v4503_v2  ;;  %vm10816_vm15 = vcmp.eq.f32.partialorder %v4383_v13, 3212836864  ;;  %vm10822_vm12 = vcmp.lt.f32.partialorder %v4432_v35, 0 }
  0x30   :  { %3932 = vpow2.f32 %v737_v29  ;;  %10777 = vst [vmem:[#allocation14_spill] sm:$0xff] %v4651_v6  ;;  %v4708_v29 = vmax.f32 %v67_v56, 1e-06 }
  0x31   :  { %562 = vmatpush1.bf16.msra.mxu0 %v561_v14  ;;  %v43_v14 = vld [vmem:[%s10629_s1 + $0xb8] sm:$0xff] }
  0x32   :  { %564 = vmatprep.subr.bf16.mxu0 %v563_v15  ;;  %v45_v15 = vld [vmem:[%s10629_s1 + $0xc8] sm:$0xff]  ;;  %10789 = vst [vmem:[#allocation20_spill] sm:$0xff] %v4708_v29 }
  0x33   :  { %v4584_v38 = vmax.f32 %v45_v15, 1e-06  ;;  %v4664_v15 = vmax.f32 %v59_v31, 1e-06 }
  0x35   :  { %566 = vmatpush1.bf16.msra.mxu0 %v565_v22  ;;  %v3919_v22 = vpop.eup %3918  ;;  %10765 = vst [vmem:[#allocation10_spill] sm:$0xff] %v4584_v38  ;;  %10779 = vst [vmem:[#allocation16_spill] sm:$0xff] %v4664_v15 }
  0x36   :  { %568 = vmatprep.subr.bf16.mxu0 %v567_v25  ;;  %v57_v25 = vld [vmem:[%s10629_s1 + $0x128] sm:$0xff]  ;;  %v3921_v30 = vpop.eup %3920  ;;  %v841_v53 = vmul.f32 %v3919_v22, %v4227_v0 }
  0x37   :  { %v3923_v40 = vpop.eup %3922  ;;  %v945_v62 = vmul.f32 %v3921_v30, %v4227_v0  ;;  %v4653_v7 = vmax.f32 %v57_v25, 1e-06  ;;  %v10876_v30 = vmov 0 }
  0x38   :  { %v3925_v4 = vpop.eup %3924  ;;  %3934 = vpow2.f32 %v841_v53 }
  0x39   :  { %570 = vmatpush1.bf16.msra.mxu0 %v569_v34  ;;  %v4580_v34 = vmax.f32 %v41_v8, 1e-06  ;;  %10778 = vst [vmem:[#allocation15_spill] sm:$0xff] %v4653_v7  ;;  %v1049_v8 = vmul.f32 %v3923_v40, %v4227_v0  ;;  %v3927_v9 = vpop.eup %3926  ;;  %3936 = vpow2.f32 %v945_v62  ;;  %v1153_v31 = vmul.f32 %v3925_v4, %v4227_v0 }
  0x3a   :  { %572 = vmatprep.subr.bf16.mxu0 %v571_v37  ;;  %v4582_v37 = vmax.f32 %v43_v14, 1e-06  ;;  %v73_v14 = vld [vmem:[%s10629_s1 + $0x1a8] sm:$0xff]  ;;  %v3929_v40 = vpop.eup %3928  ;;  %v1257_v56 = vmul.f32 %v3927_v9, %v4227_v0  ;;  %v4755_v4 = vmax.f32 %v75_v28, 1e-06  ;;  %v10846_v7 = vmov 0 }
  0x3b   :  { %10763 = vst [vmem:[#allocation8_spill] sm:$0xff] %v4580_v34  ;;  %3938 = vpow2.f32 %v1049_v8  ;;  %v4747_v62 = vmax.f32 %v73_v14, 1e-06  ;;  %v658_v9 = vsel %vm4641_vm4, 2143289344, %v3929_v40  ;;  %v667_v14 = vsel %vm10805_vm11, 2139095040, %v10642_v10  ;;  %v3931_v28 = vpop.eup %3930  ;;  %vm4801_vm11 = vmand %vm10807_vm13, %vm4496_vm3 }
  0x3c   :  { %10764 = vst [vmem:[#allocation9_spill] sm:$0xff] %v4582_v37  ;;  %3940 = vlog2.f32 %v4689_v12  ;;  %10799 = vst [vmem:[#allocation24_spill] sm:$0xff] %v4755_v4  ;;  %v10809_v46 = vsel %vm4801_vm11, 4294967295, %v10808_v46  ;;  %vm10812_vm13 = vcmp.lt.f32.partialorder %v4227_v0, 0  ;;  %v4858_v10 = vsel %vm10822_vm12, %v4669_v16, %v4503_v2 }
  0x3d   :  { %574 = vmatpush1.bf16.msra.mxu0 %v573_v48  ;;  %v63_v48 = vld [vmem:[%s10629_s1 + $0x158] sm:$0xff]  ;;  %10798 = vst [vmem:[#allocation23_spill] sm:$0xff] %v4747_v62  ;;  %3942 = vpow2.f32 %v1153_v31  ;;  %v3933_v31 = vpop.eup %3932  ;;  %vm4821_vm4 = vmand %vm10812_vm13, %vm10641_vm0  ;;  %vm10817_vm13 = vcmp.lt.f32.partialorder %v4429_v33, 0  ;;  %vm10824_vm0 = vcmp.eq.f32.partialorder %v4446_v41, 0  ;;  %v1361_v62 = vmul.f32 %v3931_v28, %v4227_v0 }
  0x3e   :  { %576 = vmatprep.subr.bf16.mxu0 %v575_v51  ;;  %v65_v51 = vld [vmem:[%s10629_s1 + $0x168] sm:$0xff]  ;;  %v4693_v22 = vmax.f32 %v63_v48, 1e-06  ;;  %v10793_v48 = vmov 0  ;;  %3944 = vpow2.f32 %v1257_v56  ;;  %v4831_v56 = vsel %vm10816_vm15, 1065353216, %v667_v14  ;;  %10823 = vst [vmem:[#allocation26_spill] sm:$0xff] %v4858_v10  ;;  %s3492_s10 = spop %3491 }
  0x3f   :  { %v4695_v23 = vmax.f32 %v65_v51, 1e-06  ;;  %v10794_v48 = vsel %vm4724_vm6, 4294967295, %v10793_v48  ;;  %v4732_v51 = vsel %vm651_vm7, %v4669_v16, %v4503_v2  ;;  %vm4771_vm7 = vmand %vm10802_vm10, %vm4496_vm3  ;;  %vm10815_vm10 = vcmp.eq.f32.partialorder %v4383_v13, 0 }
  0x40   :  { %10785 = vst [vmem:[#allocation18_spill] sm:$0xff] %v4693_v22  ;;  %v660_v40 = vsel %vm10815_vm10, %v4529_v11, %v658_v9  ;;  %v4839_v1 = vsel %vm10817_vm13, %v4669_v16, %v4503_v2  ;;  %vm4846_vm10 = vmxor %vm10818_vm5, %vm967_vm1  ;;  %vm10821_vm15 = vcmp.eq.f32.partialorder %v4406_v24, 3212836864  ;;  %vm10829_vm12 = vcmp.lt.s32.totalorder %v4406_v24, 0 }
  0x41   :  { %578 = vmatpush1.bf16.msra.mxu0 %v577_v57  ;;  %v69_v57 = vld [vmem:[%s10629_s1 + $0x188] sm:$0xff]  ;;  %10786 = vst [vmem:[#allocation19_spill] sm:$0xff] %v4695_v23  ;;  %v4852_v14 = vsel %vm10821_vm15, 1065353216, %v771_v39  ;;  %vm10825_vm6 = vmmov %vm10818_vm5  ;;  %vm10828_vm15 = vnez %v10781_v17  ;;  %3946 = vlog2.f32 %v4807_v60  ;;  %v662_v29 = vxor.u32 2147483648, %v660_v40 }
  0x42   :  { %v4720_v42 = vmax.f32 %v69_v57, 1e-06  ;;  %v4745_v57 = vmax.f32 %v71_v5, 1e-06  ;;  %v10800_v5 = vmov 0  ;;  %vm4865_vm1 = vmand %vm10825_vm6, %vm10824_vm0  ;;  %v3935_v39 = vpop.eup %3934  ;;  %vm10832_vm6 = vcmp.gt.f32.partialorder %v4477_v55, 1065353216 }
  0x43   :  { %v10801_v5 = vsel %vm4761_vm8, 4294967295, %v10800_v5  ;;  %vm4877_vm13 = vmand %vm10829_vm12, %vm4621_vm14  ;;  %v10838_v23 = vmov 0   ;;  %3948 = vpow2.f32 %v1361_v62  ;;  %v866_v44 = vsel %vm4771_vm7, 2143289344, %v3935_v39 }
  0x44   :  { %10792 = vst [vmem:[#allocation21_spill] sm:$0xff] %v4720_v42  ;;  %10797 = vst [vmem:[#allocation22_spill] sm:$0xff] %v4745_v57  ;;  %v762_v57 = vsel %vm10828_vm15, 2143289344, %v3933_v31  ;;  %v10830_v42 = vmov 0  ;;  %vm10836_vm15 = vcmp.lt.f32.partialorder %v4446_v41, 0  ;;  %v3937_v31 = vpop.eup %3936  ;;  %v10954_v39 = vmov 0 }
  0x45   :  { %v10831_v42 = vsel %vm4877_vm13, 4294967295, %v10830_v42  ;;  %vm10833_vm8 = vmmov %vm10818_vm5  ;;  %v4894_v17 = vsel %vm10836_vm15, %v4669_v16, %v4503_v2  ;;  %vm10657_vm5 = vcmp.lt.f32.partialorder %v4462_v49, 0  ;;  %v3939_v19 = vpop.eup %3938  ;;  %vm10844_vm13 = vnez %v10794_v48 }
  0x46   :  { %vm4886_vm11 = vmxor %vm10833_vm8, %vm10832_vm6  ;;  %10837 = vst [vmem:[#allocation27_spill] sm:$0xff] %v4894_v17  ;;  %v4932_v53 = vsel %vm10657_vm5, %v4669_v16, %v4503_v2  ;;  %v3941_v15 = vpop.eup %3940  ;;  %vm10848_vm6 = vcmp.eq.f32.partialorder %v4406_v24, 0  ;;  %v10859_v17 = vmov 0  ;;  %vm10861_vm5 = vcmp.lt.f32.partialorder %v4462_v49, 0 }
  0x47   :  { %vm10839_vm8 = vmor %vm4715_vm9, %vm4740_vm2  ;;  %10843 = vst [vmem:[#allocation28_spill] sm:$0xff] %v4932_v53  ;;  %v4947_v6 = vsel %vm10848_vm6, %v4529_v11, %v762_v57  ;;  %v4971_v57 = vand.u32 2147483647, %v4580_v34  ;;  %vm10858_vm6 = vcmp.lt.s32.totalorder %v4446_v41, 0 }
  0x48   :  { %v875_v22 = vsel %vm10839_vm8, 2139095040, %v10838_v23  ;;  %vm10840_vm2 = vmmov %vm10836_vm15  ;;  %vm10845_vm8 = vcmp.ne.f32.partialorder %v4383_v13, %v4383_v13  ;;  %vm10849_vm15 = vcmp.lt.s32.totalorder %v4429_v33, 0 }
  0x49   :  { %vm4919_vm9 = vmand %vm10840_vm2, %vm4496_vm3  ;;  %10855 = vst [vmem:[#allocation29_spill] sm:$0xff] %v4971_v57  ;;  %3950 = vlog2.f32 %v4971_v57 }
  0x4a   :  { %vm4940_vm0 = vmor %vm10845_vm8, %vm10844_vm13  ;;  %vm10852_vm8 = vcmp.lt.s32.totalorder %v4432_v35, 0 }
  0x4b   :  { %v10847_v7 = vsel %vm4940_vm0, 4294967295, %v10846_v7  ;;  %vm4953_vm12 = vmand %vm10849_vm15, %vm4621_vm14  ;;  %vm10856_vm15 = vcmp.eq.f32.partialorder %v4429_v33, 3212836864  ;;  %vm10866_vm0 = vcmp.lt.f32.partialorder %v4227_v0, 0 }
  0x4c   :  { %v10851_v59 = vsel %vm4953_vm12, 4294967295, %v10850_v59  ;;  %vm4961_vm2 = vmand %vm10852_vm8, %vm4621_vm14  ;;  %v4977_v60 = vsel %vm10856_vm15, 1065353216, %v875_v22  ;;  %vm10857_vm8 = vnez %v10809_v46  ;;  %v3943_v22 = vpop.eup %3942  ;;  %v1074_v46 = vsel %vm4919_vm9, 2143289344, %v3939_v19 }
  0x4d   :  { %v10854_v45 = vsel %vm4961_vm2, 4294967295, %v10853_v45  ;;  %v970_v53 = vsel %vm10857_vm8, 2143289344, %v3937_v31  ;;  %vm4985_vm2 = vmand %vm10858_vm6, %vm4621_vm14  ;;  %vm10864_vm8 = vnez %v10801_v5  ;;  %v3945_v5 = vpop.eup %3944  ;;  %v766_v19 = vxor.u32 2147483648, %v4947_v6 }
  0x4e   :  { %v10860_v17 = vsel %vm4985_vm2, 4294967295, %v10859_v17  ;;  %vm4993_vm7 = vmand %vm10861_vm5, %vm4496_vm3  ;;  %v663_v8 = vsel %vm10864_vm8, %v662_v29, %v660_v40  ;;  %vm10865_vm5 = vcmp.eq.f32.partialorder %v4462_v49, 0  ;;  %vm10869_vm8 = vcmp.lt.f32.partialorder %v4474_v54, 0  ;;  %v3947_v9 = vpop.eup %3946 }
  0x4f   :  { %vm5009_vm14 = vmand %vm10866_vm0, %vm10865_vm5  ;;  %v5018_v29 = vsel %vm10869_vm8, %v4669_v16, %v4503_v2  ;;  %v1465_v31 = vmul.f32 %v3941_v15, %v4227_v0  ;;  %vm10874_vm2 = vcmp.eq.f32.partialorder %v4227_v0, 0  ;;  %vm10875_vm12 = vcmp.eq.f32.partialorder %v4383_v13, 1065353216 }
  0x50   :  { %10870 = vst [vmem:[#allocation30_spill] sm:$0xff] %v5018_v29  ;;  %vm10871_vm0 = vmmov %vm10869_vm8  ;;  %vm10879_vm9 = vcmp.eq.f32.partialorder %v4432_v35, 0  ;;  %vm10880_vm8 = vcmp.gt.f32.partialorder %v4485_v58, 1065353216  ;;  %vm10881_vm6 = vcmp.lt.f32.partialorder %v4227_v0, 0 }
  0x51   :  { %vm5028_vm5 = vmand %vm10871_vm0, %vm4496_vm3  ;;  %vm10878_vm0 = vcmp.eq.f32.partialorder %v4429_v33, 0  ;;  %v972_v29 = vsel %vm10879_vm9, %v4529_v11, %v970_v53  ;;  %vm10885_vm9 = vcmp.eq.f32.partialorder %v4427_v32, 2139095040  ;;  %3952 = vpow2.f32 %v1465_v31 }
  0x52   :  { %vm5039_vm15 = vmor %vm10875_vm12, %vm10874_vm2  ;;  %v868_v34 = vsel %vm10878_vm0, %v4529_v11, %v866_v44  ;;  %v5062_v44 = vand.u32 2147483647, %v4582_v37  ;;  %v670_v53 = vsel %vm10885_vm9, %v4831_v56, %v663_v8  ;;  %vm10888_vm0 = vcmp.lt.f32.partialorder %v4227_v0, 0 }
  0x53   :  { %v10877_v30 = vsel %vm5039_vm15, 4294967295, %v10876_v30  ;;  %vm5053_vm3 = vmxor %vm10881_vm6, %vm10880_vm8  ;;  %vm10886_vm6 = vcmp.eq.f32.partialorder %v4446_v41, 0  ;;  %vm10887_vm8 = vcmp.eq.f32.partialorder %v4474_v54, 0  ;;  %v5081_v37 = vand.u32 2147483647, %v4584_v38 }
  0x54   :  { %10884 = vst [vmem:[#allocation31_spill] sm:$0xff] %v5062_v44  ;;  %v1076_v13 = vsel %vm10886_vm6, %v4529_v11, %v1074_v46  ;;  %vm5074_vm12 = vmand %vm10888_vm0, %vm10887_vm8  ;;  %vm10892_vm9 = vcmp.ne.f32.partialorder %v4406_v24, %v4406_v24  ;;  %v10893_v56 = vmov 0  ;;  %v1178_v46 = vsel %vm4993_vm7, 2143289344, %v3943_v22 }
  0x55   :  { %10891 = vst [vmem:[#allocation32_spill] sm:$0xff] %v5081_v37  ;;  %vm5088_vm6 = vmor %vm10892_vm9, %vm10844_vm13  ;;  %v1282_v38 = vsel %vm5028_vm5, 2143289344, %v3945_v5  ;;  %vm10896_vm9 = vcmp.gt.f32.partialorder %v4492_v61, 1065353216  ;;  %vm10897_vm15 = vcmp.lt.f32.partialorder %v4227_v0, 0  ;;  %v870_v62 = vxor.u32 2147483648, %v868_v34 }
  0x56   :  { %v10894_v56 = vsel %vm5088_vm6, 4294967295, %v10893_v56  ;;  %vm10895_vm0 = vmor %vm4821_vm4, %vm4846_vm10  ;;  %vm10900_vm4 = vcmp.lt.f32.partialorder %v4505_v3, 0  ;;  %v974_v22 = vxor.u32 2147483648, %v972_v29  ;;  %vm10903_vm5 = vnez %v10773_v52 }
  0x57   :  { %v979_v8 = vsel %vm10895_vm0, 2139095040, %v10838_v23  ;;  %vm5108_vm8 = vmxor %vm10897_vm15, %vm10896_vm9  ;;  %v5116_v25 = vsel %vm10900_vm4, %v4669_v16, %v4503_v2  ;;  %vm10904_vm0 = vcmp.lt.s32.totalorder %v4462_v49, 0  ;;  %vm10907_vm10 = vcmp.eq.f32.partialorder %v4401_v21, 2139095040 }
  0x58   :  { %10901 = vst [vmem:[#allocation33_spill] sm:$0xff] %v5116_v25  ;;  %vm10902_vm15 = vmor %vm4865_vm1, %vm4886_vm11  ;;  %v675_v4 = vsel %vm10907_vm10, %v4732_v51, %v670_v53  ;;  %vm10908_vm11 = vnez %v10831_v42  ;;  %v1078_v25 = vxor.u32 2147483648, %v1076_v13  ;;  %3954 = vlog2.f32 %v5062_v44  ;;  %v3949_v51 = vpop.eup %3948 }
  0x59   :  { %v1083_v5 = vsel %vm10902_vm15, 2139095040, %v10838_v23  ;;  %vm5130_vm9 = vmand %vm10904_vm0, %vm10903_vm5  ;;  %v767_v28 = vsel %vm10908_vm11, %v766_v19, %v4947_v6  ;;  %vm10910_vm0 = vcmp.eq.f32.partialorder %v4406_v24, 1065353216  ;;  %v10911_v31 = vmov 0  ;;  %v3951_v57 = vpop.eup %3950 }
  0x5a   :  { %vm10909_vm15 = vmmov %vm10874_vm2  ;;  %vm10913_vm10 = vcmp.ne.f32.partialorder %v4429_v33, %v4429_v33  ;;  %v10914_v21 = vmov 0  ;;  %vm10916_vm4 = vcmp.eq.f32.partialorder %v4462_v49, 0  ;;  %vm10917_vm2 = vcmp.eq.f32.partialorder %v4474_v54, 0 }
  0x5b   :  { %vm5151_vm7 = vmor %vm10910_vm0, %vm10909_vm15  ;;  %v1180_v6 = vsel %vm10916_vm4, %v4529_v11, %v1178_v46  ;;  %v1284_v42 = vsel %vm10917_vm2, %v4529_v11, %v1282_v38  ;;  %3956 = vlog2.f32 %v5081_v37  ;;  %vm10918_vm1 = vcmp.eq.f32.partialorder %v4432_v35, 3212836864 }
  0x5c   :  { %v10912_v31 = vsel %vm5151_vm7, 4294967295, %v10911_v31  ;;  %vm5160_vm11 = vmor %vm10913_vm10, %vm10844_vm13  ;;  %v981_v19 = vsel %vm10918_vm1, 1065353216, %v979_v8  ;;  %vm10919_vm2 = vcmp.ne.f32.partialorder %v4432_v35, %v4432_v35  ;;  %v10920_v38 = vmov 0 }
  0x5d   :  { %v10915_v21 = vsel %vm5160_vm11, 4294967295, %v10914_v21  ;;  %vm5184_vm4 = vmor %vm10919_vm2, %vm10844_vm13  ;;  %vm10922_vm15 = vcmp.eq.f32.partialorder %v4446_v41, 3212836864  ;;  %vm10923_vm0 = vcmp.ne.f32.partialorder %v4446_v41, %v4446_v41  ;;  %v10924_v46 = vmov 0 }
  0x5e   :  { %v10921_v38 = vsel %vm5184_vm4, 4294967295, %v10920_v38  ;;  %v1085_v53 = vsel %vm10922_vm15, 1065353216, %v1083_v5  ;;  %vm5195_vm10 = vmor %vm10923_vm0, %vm10844_vm13  ;;  %vm10927_vm1 = vnez %v10758_v63  ;;  %vm10928_vm11 = vcmp.lt.f32.partialorder %v4505_v3, 0 }
  0x5f   :  { %v10925_v46 = vsel %vm5195_vm10, 4294967295, %v10924_v46  ;;  %vm5203_vm2 = vmand %vm10928_vm11, %vm10927_vm1  ;;  %v1569_v5 = vmul.f32 %v3947_v9, %v4227_v0  ;;  %vm10931_vm0 = vnez %v10847_v7  ;;  %vm10932_vm10 = vcmp.eq.f32.partialorder %v4427_v32, 2139095040 }
  0x60   :  { %10926 = vst [vmem:[#allocation34_spill] sm:$0xff] %v10925_v46  ;;  %v679_v37 = vsel %vm10931_vm0, 2143289344, %v675_v4  ;;  %v774_v44 = vsel %vm10932_vm10, %v4852_v14, %v767_v28  ;;  %vm10933_vm7 = vnez %v10851_v59  ;;  %vm10934_vm11 = vnez %v10854_v45 }
  0x61   :  { %v871_v24 = vsel %vm10933_vm7, %v870_v62, %v868_v34  ;;  %v975_v46 = vsel %vm10934_vm11, %v974_v22, %v972_v29  ;;  %vm10935_vm4 = vcmp.lt.s32.totalorder %v4474_v54, 0  ;;  %vm10938_vm10 = vnez %v10860_v17  ;;  %vm10939_vm7 = vmor %vm5009_vm14, %vm5053_vm3 }
  0x62   :  { %vm5226_vm6 = vmand %vm10935_vm4, %vm10903_vm5  ;;  %v1079_v14 = vsel %vm10938_vm10, %v1078_v25, %v1076_v13  ;;  %v1182_v59 = vxor.u32 2147483648, %v1180_v6  ;;  %v1187_v34 = vsel %vm10939_vm7, 2139095040, %v10838_v23  ;;  %v1286_v45 = vxor.u32 2147483648, %v1284_v42 }
  0x63   :  { %vm10940_vm0 = vcmp.eq.f32.partialorder %v4505_v3, 0  ;;  %vm10941_vm11 = vcmp.lt.f32.partialorder %v4227_v0, 0  ;;  %vm10944_vm10 = vcmp.eq.f32.partialorder %v4227_v0, 0  ;;  %vm10945_vm1 = vcmp.eq.f32.partialorder %v4429_v33, 1065353216 }
  0x64   :  { %vm5242_vm4 = vmand %vm10941_vm11, %vm10940_vm0  ;;  %vm10949_vm14 = vcmp.eq.f32.partialorder %v4432_v35, 1065353216  ;;  %v10950_v17 = vmov 0  ;;  %vm10953_vm11 = vcmp.eq.f32.partialorder %v4446_v41, 1065353216  ;;  %v1386_v25 = vsel %vm5203_vm2, 2143289344, %v3949_v51 }
  0x65   :  { %vm5251_vm5 = vmor %vm10945_vm1, %vm10944_vm10  ;;  %vm10964_vm2 = vcmp.ne.f32.partialorder %v4462_v49, %v4462_v49  ;;  %v10965_v4 = vmov 0  ;;  %3958 = vpow2.f32 %v1569_v5  ;;  %v5310_v28 = vand.u32 2147483647, %v4597_v43  ;;  %v10988_v5 = vld [vmem:[#allocation27_spill] sm:$0xff] }
  0x66   :  { %vm10948_vm3 = vmmov %vm10944_vm10  ;;  %vm10957_vm10 = vcmp.gt.f32.partialorder %v4554_v20, 1065353216  ;;  %v11016_v29 = vmov 0 }
  0x67   :  { %vm5259_vm7 = vmor %vm10949_vm14, %vm10948_vm3  ;;  %3960 = vlog2.f32 %v5310_v28 }
  0x68   :  { %v10951_v17 = vsel %vm5259_vm7, 4294967295, %v10950_v17  ;;  %vm10952_vm0 = vmmov %vm10948_vm3  ;;  %vm10958_vm3 = vcmp.lt.f32.partialorder %v4227_v0, 0 }
  0x69   :  { %vm5267_vm15 = vmor %vm10953_vm11, %vm10952_vm0  ;;  %vm10961_vm11 = vcmp.lt.f32.partialorder %v4562_v26, 0 }
  0x6a   :  { %v10955_v39 = vsel %vm5267_vm15, 4294967295, %v10954_v39  ;;  %vm10956_vm1 = vmor %vm5074_vm12, %vm5108_vm8  ;;  %v5292_v10 = vsel %vm10961_vm11, %v4669_v16, %v4503_v2  ;;  %vm10962_vm12 = vcmp.eq.f32.partialorder %v4435_v36, 2139095040  ;;  %vm10963_vm8 = vcmp.eq.f32.partialorder %v4427_v32, 2139095040 }
  0x6b   :  { %v1291_v15 = vsel %vm10956_vm1, 2139095040, %v10838_v23  ;;  %vm5283_vm14 = vmxor %vm10958_vm3, %vm10957_vm10  ;;  %v779_v62 = vsel %vm10962_vm12, %v4813_v18, %v774_v44  ;;  %v878_v22 = vsel %vm10963_vm8, %v4977_v60, %v871_v24  ;;  %vm10967_vm10 = vnez %v10877_v30 }
  0x6c   :  { %vm5305_vm1 = vmor %vm10964_vm2, %vm10844_vm13  ;;  %v681_v36 = vsel %vm10967_vm10, 1065353216, %v679_v37  ;;  %vm10970_vm12 = vcmp.eq.f32.partialorder %v4462_v49, 3212836864  ;;  %v10972_v44 = vmov 0  ;;  %v1183_v37 = vsel %vm5130_vm9, %v1182_v59, %v1180_v6  ;;  %v10997_v59 = vld [vmem:[#allocation6_spill] sm:$0xff] }
  0x6d   :  { %v10966_v4 = vsel %vm5305_vm1, 4294967295, %v10965_v4  ;;  %vm10968_vm3 = vmmov %vm10963_vm8  ;;  %v1189_v60 = vsel %vm10970_vm12, 1065353216, %v1187_v34  ;;  %vm10971_vm8 = vcmp.ne.f32.partialorder %v4474_v54, %v4474_v54  ;;  %v1287_v30 = vsel %vm5226_vm6, %v1286_v45, %v1284_v42 }
  0x6e   :  { %v982_v18 = vsel %vm10968_vm3, %v981_v19, %v975_v46  ;;  %vm10969_vm11 = vmmov %vm10968_vm3  ;;  %vm10974_vm3 = vcmp.eq.f32.partialorder %v4474_v54, 3212836864  ;;  %vm10976_vm9 = vnez %v10894_v56  ;;  %vm10977_vm6 = vcmp.eq.f32.partialorder %v4460_v47, 2139095040  ;;  %v10986_v56 = vld [vmem:[#allocation26_spill] sm:$0xff] }
  0x6f   :  { %v1086_v24 = vsel %vm10969_vm11, %v1085_v53, %v1079_v14  ;;  %vm5325_vm2 = vmor %vm10971_vm8, %vm10844_vm13  ;;  %v1293_v51 = vsel %vm10974_vm3, 1065353216, %v1291_v15  ;;  %vm10975_vm11 = vcmp.eq.f32.partialorder %v4505_v3, 0  ;;  %v3953_v53 = vpop.eup %3952  ;;  %v783_v40 = vsel %vm10976_vm9, 2143289344, %v779_v62 }
  0x70   :  { %v10973_v44 = vsel %vm5325_vm2, 4294967295, %v10972_v44  ;;  %v1388_v19 = vsel %vm10975_vm11, %v4529_v11, %v1386_v25  ;;  %v883_v6 = vsel %vm10977_vm6, %v4839_v1, %v878_v22  ;;  %vm10978_vm3 = vmmov %vm10952_vm0  ;;  %vm10979_vm10 = vcmp.eq.f32.partialorder %v4462_v49, 1065353216  ;;  %v3955_v1 = vpop.eup %3954 }
  0x71   :  { %vm5353_vm11 = vmor %vm10979_vm10, %vm10978_vm3  ;;  %v10980_v42 = vmov 0  ;;  %vm10982_vm12 = vnez %v10758_v63  ;;  %vm10983_vm8 = vcmp.lt.f32.partialorder %v4562_v26, 0  ;;  %v1673_v47 = vmul.f32 %v3951_v57, %v4227_v0  ;;  %v11056_v57 = vld [vmem:[#allocation29_spill] sm:$0xff] }
  0x72   :  { %v10981_v42 = vsel %vm5353_vm11, 4294967295, %v10980_v42  ;;  %vm5361_vm0 = vmand %vm10983_vm8, %vm10982_vm12  ;;  %vm10987_vm6 = vcmp.eq.f32.partialorder %v4466_v50, 2139095040  ;;  %vm10989_vm10 = vcmp.eq.f32.partialorder %v4477_v55, 2139095040  ;;  %vm10990_vm8 = vcmp.eq.f32.partialorder %v4474_v54, 1065353216  ;;  %v3957_v55 = vpop.eup %3956 }
  0x73   :  { %v987_v8 = vsel %vm10987_vm6, %v10986_v56, %v982_v18  ;;  %v1091_v7 = vsel %vm10989_vm10, %v10988_v5, %v1086_v24  ;;  %vm5377_vm11 = vmor %vm10990_vm8, %vm10978_vm3  ;;  %v10991_v14 = vmov 0  ;;  %vm10993_vm2 = vcmp.eq.f32.partialorder %v4562_v26, 0  ;;  %v11013_v24 = vld [vmem:[#allocation34_spill] sm:$0xff]  ;;  %v3959_v56 = vpop.eup %3958 }
  0x74   :  { %v10992_v14 = vsel %vm5377_vm11, 4294967295, %v10991_v14  ;;  %vm10994_vm1 = vcmp.lt.f32.partialorder %v4227_v0, 0  ;;  %vm10998_vm3 = vcmp.eq.f32.partialorder %v4227_v0, 1065353216  ;;  %vm10999_vm8 = vcmp.eq.f32.partialorder %v4427_v32, 2139095040 }
  0x75   :  { %vm5386_vm15 = vmand %vm10994_vm1, %vm10993_vm2  ;;  %v5397_v34 = vsel %vm10998_vm3, %v10997_v59, %v681_v36  ;;  %v1190_v45 = vsel %vm10999_vm8, %v1189_v60, %v1183_v37  ;;  %v1390_v25 = vxor.u32 2147483648, %v1388_v19  ;;  %vm11001_vm2 = vcmp.gt.f32.partialorder %v4689_v12, 1065353216  ;;  %v11018_v37 = vld [vmem:[#allocation28_spill] sm:$0xff] }
  0x76   :  { %vm11000_vm1 = vmmov %vm10999_vm8  ;;  %vm11002_vm6 = vcmp.lt.f32.partialorder %v4227_v0, 0  ;;  %vm11005_vm3 = vnez %v10912_v31  ;;  %vm11006_vm11 = vnez %v10915_v21  ;;  %vm11007_vm8 = vnez %v10773_v52 }
  0x77   :  { %v1294_v15 = vsel %vm11000_vm1, %v1293_v51, %v1287_v30  ;;  %vm5407_vm9 = vmxor %vm11002_vm6, %vm11001_vm2  ;;  %v785_v62 = vsel %vm11005_vm3, 1065353216, %v783_v40  ;;  %v887_v22 = vsel %vm11006_vm11, 2143289344, %v883_v6  ;;  %vm11008_vm1 = vcmp.lt.s32.totalorder %v4505_v3, 0  ;;  %v11020_v30 = vld [vmem:[#allocation30_spill] sm:$0xff]  ;;  %v11023_v6 = vld [vmem:[#allocation7_spill] sm:$0xff] }
  0x78   :  { %vm5420_vm7 = vmand %vm11008_vm1, %vm11007_vm8  ;;  %v1490_v31 = vsel %vm5361_vm0, 2143289344, %v3953_v53  ;;  %vm11012_vm11 = vnez %v10921_v38  ;;  %vm11014_vm2 = vnez %v11013_v24  ;;  %vm11015_vm3 = vcmp.ne.f32.partialorder %v4505_v3, %v4505_v3  ;;  %v11022_v53 = vld [vmem:[#allocation25_spill] sm:$0xff]  ;;  %v3961_v24 = vpop.eup %3960 }
  0x79   :  { %vm11011_vm6 = vmor %vm5242_vm4, %vm5283_vm14  ;;  %v991_v21 = vsel %vm11012_vm11, 2143289344, %v987_v8  ;;  %v1095_v60 = vsel %vm11014_vm2, 2143289344, %v1091_v7  ;;  %3962 = vpow2.f32 %v1673_v47  ;;  %v1777_v9 = vmul.f32 %v3955_v1, %v4227_v0 }
  0x7a   :  { %v1395_v18 = vsel %vm11011_vm6, 2139095040, %v10838_v23  ;;  %vm5441_vm1 = vmor %vm11015_vm3, %vm10844_vm13  ;;  %vm11019_vm14 = vcmp.eq.f32.partialorder %v4485_v58, 2139095040  ;;  %vm11021_vm0 = vcmp.eq.f32.partialorder %v4492_v61, 2139095040  ;;  %vm1591_vm2 = vcmp.gt.f32.partialorder %v11022_v53, 1065353216 }
  0x7b   :  { %v11017_v29 = vsel %vm5441_vm1, 4294967295, %v11016_v29  ;;  %v1195_v38 = vsel %vm11019_vm14, %v11018_v37, %v1190_v45  ;;  %v1299_v51 = vsel %vm11021_vm0, %v11020_v30, %v1294_v15  ;;  %v1881_v40 = vmul.f32 %v3957_v55, %v4227_v0  ;;  %v11036_v55 = vld [vmem:[#allocation11_spill] sm:$0xff]  ;;  %v11042_v45 = vld [vmem:[#allocation8_spill] sm:$0xff]  ;;  %v11061_v37 = vld [vmem:[#allocation33_spill] sm:$0xff] }
  0x7c   :  { %vm11024_vm3 = vcmp.eq.f32.partialorder %v4227_v0, 1065353216  ;;  %v1391_v61 = vsel %vm5420_vm7, %v1390_v25, %v1388_v19  ;;  %vm11025_vm14 = vcmp.eq.f32.partialorder %v4505_v3, 3212836864  ;;  %vm11026_vm0 = vcmp.eq.f32.partialorder %v4562_v26, 0  ;;  %v11048_v25 = vld [vmem:[#allocation12_spill] sm:$0xff] }
  0x7d   :  { %v5463_v58 = vsel %vm11024_vm3, %v11023_v6, %v785_v62  ;;  %v1397_v46 = vsel %vm11025_vm14, 1065353216, %v1395_v18  ;;  %v1492_v47 = vsel %vm11026_vm0, %v4529_v11, %v1490_v31  ;;  %vm11027_vm11 = vcmp.lt.f32.partialorder %v4564_v27, 0  ;;  %v11053_v31 = vld [vmem:[#allocation13_spill] sm:$0xff] }
  0x7e   :  { %vm5476_vm4 = vmand %vm11027_vm11, %vm10982_vm12  ;;  %v889_v8 = vsel %vm5251_vm5, 1065353216, %v887_v22  ;;  %vm11030_vm7 = vnez %v10951_v17  ;;  %vm11031_vm3 = vnez %v10955_v39  ;;  %vm11032_vm14 = vcmp.eq.f32.partialorder %v4564_v27, 0  ;;  %v11095_v39 = vld [vmem:[#allocation31_spill] sm:$0xff] }
  0x7f   :  { %v993_v19 = vsel %vm11030_vm7, 1065353216, %v991_v21  ;;  %v1097_v5 = vsel %vm11031_vm3, 1065353216, %v1095_v60  ;;  %vm11033_vm0 = vcmp.lt.f32.partialorder %v4227_v0, 0  ;;  %v5495_v59 = vand.u32 2147483647, %v11036_v55 }
  0x80   :  { %vm5490_vm10 = vmand %vm11033_vm0, %vm11032_vm14  ;;  %vm11037_vm11 = vnez %v10966_v4  ;;  %vm11038_vm5 = vnez %v10973_v44  ;;  %3964 = vpow2.f32 %v1777_v9  ;;  %vm11045_vm7 = vcmp.eq.f32.partialorder %v4505_v3, 1065353216 }
  0x81   :  { %v1199_v13 = vsel %vm11037_vm11, 2143289344, %v1195_v38  ;;  %v1303_v17 = vsel %vm11038_vm5, 2143289344, %v1299_v51  ;;  %vm11039_vm3 = vmmov %vm11033_vm0  ;;  %vm10681_vm0 = vcmp.lt.f32.partialorder %v11042_v45, 0  ;;  %vm11043_vm11 = vcmp.eq.f32.partialorder %v4427_v32, 2139095040 }
  0x82   :  { %vm5506_vm6 = vmxor %vm11039_vm3, %vm1591_vm2  ;;  %v1398_v4 = vsel %vm11043_vm11, %v1397_v46, %v1391_v61  ;;  %vm11044_vm5 = vcmp.eq.f32.partialorder %v4227_v0, 0  ;;  %v1494_v15 = vxor.u32 2147483648, %v1492_v47  ;;  %3966 = vpow2.f32 %v1881_v40 }
  0x83   :  { %vm5519_vm1 = vmor %vm11045_vm7, %vm11044_vm5  ;;  %v5524_v62 = vand.u32 2147483647, %v11048_v25  ;;  %vm11049_vm2 = vcmp.lt.s32.totalorder %v4562_v26, 0  ;;  %v1594_v18 = vsel %vm5476_vm4, 2143289344, %v3959_v56  ;;  %vm10682_vm11 = vcmp.eq.f32.partialorder %v11042_v45, 0  ;;  %v3963_v40 = vpop.eup %3962 }
  0x84   :  { %vm5530_vm3 = vmand %vm11049_vm2, %vm11007_vm8  ;;  %v5544_v21 = vand.u32 2147483647, %v11053_v31  ;;  %vm11054_vm5 = vcmp.eq.f32.partialorder %v4227_v0, 1065353216  ;;  %vm11055_vm2 = vnez %v10981_v42  ;;  %vm1695_vm4 = vcmp.gt.f32.partialorder %v11056_v57, 1065353216 }
  0x85   :  { %vm11052_vm7 = vmor %vm5386_vm15, %vm5407_vm9  ;;  %v5549_v60 = vsel %vm11054_vm5, %v4429_v33, %v889_v8  ;;  %v1201_v50 = vsel %vm11055_vm2, 1065353216, %v1199_v13  ;;  %3968 = vlog2.f32 %v5495_v59  ;;  %v5568_v33 = vsel %vm11054_vm5, %v4446_v41, %v1097_v5  ;;  %v11091_v5 = vld [vmem:[#allocation10_spill] sm:$0xff] }
  0x86   :  { %v1499_v36 = vsel %vm11052_vm7, 2139095040, %v10838_v23  ;;  %vm11057_vm7 = vmmov %vm11054_vm5  ;;  %11059 = vst [vmem:[#allocation27_spill] sm:$0xff] %v5568_v33  ;;  %vm11060_vm2 = vnez %v10992_v14  ;;  %vm11062_vm15 = vcmp.eq.f32.partialorder %v4554_v20, 2139095040  ;;  %vm11063_vm14 = vcmp.ne.f32.partialorder %v4562_v26, %v4562_v26  ;;  %v11092_v13 = vld [vmem:[#allocation14_spill] sm:$0xff] }
  0x87   :  { %v5563_v9 = vsel %vm11057_vm7, %v4432_v35, %v993_v19  ;;  %v1305_v42 = vsel %vm11060_vm2, 1065353216, %v1303_v17  ;;  %v1403_v38 = vsel %vm11062_vm15, %v11061_v37, %v1398_v4  ;;  %vm5580_vm9 = vmor %vm11063_vm14, %vm10844_vm13  ;;  %v11064_v35 = vmov 0  ;;  %v11104_v37 = vld [vmem:[#allocation32_spill] sm:$0xff] }
  0x88   :  { %11058 = vst [vmem:[#allocation26_spill] sm:$0xff] %v5563_v9  ;;  %v11065_v35 = vsel %vm5580_vm9, 4294967295, %v11064_v35  ;;  %vm5588_vm7 = vmand %vm10681_vm0, %vm10982_vm12  ;;  %v1495_v20 = vsel %vm5530_vm3, %v1494_v15, %v1492_v47  ;;  %vm11068_vm15 = vcmp.eq.f32.partialorder %v4562_v26, 3212836864  ;;  %vm11069_vm14 = vcmp.eq.f32.partialorder %v4564_v27, 0 }
  0x89   :  { %v1501_v14 = vsel %vm11068_vm15, 1065353216, %v1499_v36  ;;  %v1596_v30 = vsel %vm11069_vm14, %v4529_v11, %v1594_v18  ;;  %vm11070_vm5 = vcmp.lt.f32.partialorder %v4227_v0, 0  ;;  %3970 = vlog2.f32 %v5524_v62 }
  0x8a   :  { %vm5603_vm2 = vmand %vm11070_vm5, %vm10682_vm11  ;;  %vm11073_vm3 = vcmp.eq.f32.partialorder %v4227_v0, 1065353216  ;;  %v1985_v46 = vmul.f32 %v3961_v24, %v4227_v0  ;;  %3972 = vlog2.f32 %v5544_v21  ;;  %vm11081_vm11 = vcmp.eq.f32.partialorder %v4227_v0, 0  ;;  %v3965_v22 = vpop.eup %3964 }
  0x8b   :  { %v5611_v6 = vsel %vm11073_vm3, %v4462_v49, %v1201_v50  ;;  %vm11075_vm14 = vmmov %vm11070_vm5  ;;  %vm11082_vm15 = vcmp.eq.f32.partialorder %v4562_v26, 1065353216  ;;  %vm11085_vm9 = vcmp.lt.f32.partialorder %v4564_v27, 0  ;;  %vm11087_vm13 = vcmp.eq.f32.partialorder %v4427_v32, 2139095040 }
  0x8c   :  { %11074 = vst [vmem:[#allocation6_spill] sm:$0xff] %v5611_v6  ;;  %vm5618_vm0 = vmxor %vm11075_vm14, %vm1695_vm4  ;;  %v5644_v56 = vsel %vm11085_vm9, %v4669_v16, %v4503_v2  ;;  %v1598_v19 = vxor.u32 2147483648, %v1596_v30  ;;  %v5661_v17 = vand.u32 2147483647, %v11092_v13  ;;  %v1698_v15 = vsel %vm5588_vm7, 2143289344, %v3963_v40  ;;  %v3967_v18 = vpop.eup %3966  ;;  %v11117_v40 = vld [vmem:[#allocation15_spill] sm:$0xff] }
  0x8d   :  { %vm11078_vm5 = vmmov %vm11073_vm3  ;;  %vm11080_vm3 = vnez %v11017_v29  ;;  %v1502_v29 = vsel %vm11087_vm13, %v1501_v14, %v1495_v20  ;;  %3974 = vpow2.f32 %v1985_v46  ;;  %v5750_v46 = vand.u32 2147483647, %v11117_v40 }
  0x8e   :  { %v5627_v47 = vsel %vm11078_vm5, %v4474_v54, %v1305_v42  ;;  %v1407_v49 = vsel %vm11080_vm3, 2143289344, %v1403_v38  ;;  %vm5635_vm4 = vmor %vm11082_vm15, %vm11081_vm11  ;;  %v11086_v54 = vld [vmem:[#allocation9_spill] sm:$0xff]  ;;  %vm11088_vm11 = vcmp.lt.s32.totalorder %v4564_v27, 0  ;;  %vm11100_vm3 = vnez %v10794_v48 }
  0x8f   :  { %11079 = vst [vmem:[#allocation34_spill] sm:$0xff] %v5627_v47  ;;  %vm5655_vm15 = vmand %vm11088_vm11, %vm11007_vm8  ;;  %vm10684_vm14 = vcmp.eq.f32.partialorder %v11086_v54, 0  ;;  %vm11096_vm7 = vcmp.lt.f32.partialorder %v11086_v54, 0  ;;  %v1409_v24 = vsel %vm5519_vm1, 1065353216, %v1407_v49  ;;  %v11102_v42 = vmov 0  ;;  %v3969_v20 = vpop.eup %3968 }
  0x90   :  { %vm11093_vm13 = vmor %vm5490_vm10, %vm5506_vm6  ;;  %vm11094_vm10 = vcmp.lt.f32.partialorder %v11042_v45, 0  ;;  %vm11105_vm1 = vcmp.lt.f32.partialorder %v11091_v5, 0  ;;  %vm11110_vm5 = vcmp.lt.f32.partialorder %v4227_v0, 0  ;;  %3976 = vlog2.f32 %v5661_v17 }
  0x91   :  { %v1603_v4 = vsel %vm11093_vm13, 2139095040, %v10838_v23  ;;  %v5683_v7 = vsel %vm11094_vm10, %v4669_v16, %v4503_v2  ;;  %vm5690_vm13 = vmand %vm11096_vm7, %vm10982_vm12  ;;  %vm11099_vm10 = vcmp.eq.f32.partialorder %v4689_v12, 2139095040  ;;  %vm11101_vm7 = vcmp.ne.f32.partialorder %v4564_v27, %v4564_v27 }
  0x92   :  { %v1507_v50 = vsel %vm11099_vm10, %v5292_v10, %v1502_v29  ;;  %vm5706_vm11 = vmor %vm11101_vm7, %vm11100_vm3  ;;  %v1599_v10 = vsel %vm5655_vm15, %v1598_v19, %v1596_v30  ;;  %vm11108_vm10 = vcmp.eq.f32.partialorder %v4564_v27, 3212836864  ;;  %vm11109_vm7 = vcmp.eq.f32.partialorder %v11042_v45, 0 }
  0x93   :  { %v11103_v42 = vsel %vm5706_vm11, 4294967295, %v11102_v42  ;;  %vm5716_vm6 = vmand %vm11105_vm1, %vm10982_vm12  ;;  %v1605_v44 = vsel %vm11108_vm10, 1065353216, %v1603_v4  ;;  %v1700_v38 = vsel %vm11109_vm7, %v4529_v11, %v1698_v15  ;;  %v1802_v14 = vsel %vm5690_vm13, 2143289344, %v3965_v22  ;;  %v3971_v4 = vpop.eup %3970 }
  0x94   :  { %vm5731_vm9 = vmand %vm11110_vm5, %vm10684_vm14  ;;  %vm11113_vm10 = vcmp.gt.f32.partialorder %v11095_v39, 1065353216  ;;  %vm11118_vm15 = vcmp.eq.f32.partialorder %v4227_v0, 1065353216  ;;  %vm11119_vm13 = vcmp.eq.f32.partialorder %v4227_v0, 0  ;;  %vm11120_vm1 = vcmp.eq.f32.partialorder %v4564_v27, 1065353216 }
  0x95   :  { %vm11114_vm7 = vmmov %vm11110_vm5  ;;  %v5755_v49 = vsel %vm11118_vm15, %v4505_v3, %v1409_v24  ;;  %v11121_v29 = vmov 0  ;;  %v1906_v3 = vsel %vm5716_vm6, 2143289344, %v3967_v18  ;;  %vm11124_vm15 = vcmp.eq.f32.partialorder %v11091_v5, 0  ;;  %v3973_v24 = vpop.eup %3972 }
  0x96   :  { %vm5744_vm11 = vmxor %vm11114_vm7, %vm11113_vm10  ;;  %vm11123_vm10 = vcmp.lt.f32.partialorder %v11086_v54, 0  ;;  %v1702_v36 = vxor.u32 2147483648, %v1700_v38  ;;  %vm1902_vm6 = vcmp.lt.s32.totalorder %v11091_v5, 0  ;;  %vm11129_vm7 = vcmp.gt.f32.partialorder %v11104_v37, 1065353216 }
  0x97   :  { %vm5761_vm14 = vmor %vm11120_vm1, %vm11119_vm13  ;;  %v5769_v8 = vsel %vm11123_vm10, %v4669_v16, %v4503_v2  ;;  %vm11127_vm1 = vnez %v11065_v35  ;;  %vm11128_vm13 = vcmp.eq.f32.partialorder %v4427_v32, 2139095040  ;;  %vm11138_vm10 = vcmp.eq.f32.partialorder %v11091_v5, 0  ;;  %v11150_v35 = vld [vmem:[#allocation16_spill] sm:$0xff] }
  0x98   :  { %v11122_v29 = vsel %vm5761_vm14, 4294967295, %v11121_v29  ;;  %vm5778_vm12 = vmand %vm11110_vm5, %vm11124_vm15  ;;  %v1511_v15 = vsel %vm11127_vm1, 2143289344, %v1507_v50  ;;  %v1606_v22 = vsel %vm11128_vm13, %v1605_v44, %v1599_v10  ;;  %vm11133_vm15 = vcmp.lt.s32.totalorder %v11042_v45, 0 }
  0x99   :  { %vm11130_vm14 = vmmov %vm11110_vm5  ;;  %v2089_v10 = vmul.f32 %v3969_v20, %v4227_v0  ;;  %v1908_v51 = vsel %vm11138_vm10, %v4529_v11, %v1906_v3  ;;  %3978 = vlog2.f32 %v5750_v46  ;;  %v1513_v61 = vsel %vm5635_vm4, 1065353216, %v1511_v15 }
  0x9a   :  { %vm5792_vm5 = vmxor %vm11130_vm14, %vm11129_vm7  ;;  %vm11137_vm14 = vcmp.eq.f32.partialorder %v11086_v54, 0  ;;  %v2297_v15 = vmul.f32 %v3973_v24, %v4227_v0  ;;  %v5875_v24 = vand.u32 2147483647, %v11150_v35  ;;  %vm11156_vm4 = vcmp.ne.f32.partialorder %v11086_v54, %v11086_v54 }
  0x9b   :  { %vm5800_vm1 = vmand %vm11133_vm15, %vm11007_vm8  ;;  %v1804_v12 = vsel %vm11137_vm14, %v4529_v11, %v1802_v14  ;;  %vm11140_vm14 = vcmp.ne.f32.partialorder %v11042_v45, %v11042_v45  ;;  %3980 = vpow2.f32 %v2089_v10  ;;  %v11211_v20 = vmov 0 }
  0x9c   :  { %vm11136_vm13 = vmor %vm5603_vm2, %vm5618_vm0  ;;  %vm10686_vm0 = vcmp.lt.f32.partialorder %v4597_v43, 0  ;;  %v1703_v1 = vsel %vm5800_vm1, %v1702_v36, %v1700_v38  ;;  %v1806_v3 = vxor.u32 2147483648, %v1804_v12  ;;  %vm11147_vm1 = vnez %v10758_v63 }
  0x9d   :  { %v1707_v50 = vsel %vm11136_vm13, 2139095040, %v10838_v23  ;;  %vm1810_vm15 = vmor %vm5731_vm9, %vm5744_vm11  ;;  %vm11139_vm13 = vcmp.eq.f32.partialorder %v11022_v53, 2139095040  ;;  %v2193_v53 = vmul.f32 %v3971_v4, %v4227_v0  ;;  %v3975_v4 = vpop.eup %3974  ;;  %vm11152_vm9 = vcmp.eq.f32.partialorder %v4227_v0, 0 }
  0x9e   :  { %v1611_v44 = vsel %vm11139_vm13, %v5644_v56, %v1606_v22  ;;  %vm5835_vm7 = vmor %vm11140_vm14, %vm11100_vm3  ;;  %vm11143_vm13 = vcmp.eq.f32.partialorder %v11042_v45, 3212836864  ;;  %vm11144_vm14 = vcmp.lt.s32.totalorder %v11086_v54, 0  ;;  %v1811_v38 = vsel %vm1810_vm15, 2139095040, %v10838_v23  ;;  %v3977_v6 = vpop.eup %3976 }
  0x9f   :  { %v1709_v56 = vsel %vm11143_vm13, 1065353216, %v1707_v50  ;;  %vm5854_vm10 = vmand %vm11144_vm14, %vm11007_vm8  ;;  %v1910_v22 = vxor.u32 2147483648, %v1908_v51  ;;  %vm11151_vm14 = vcmp.eq.f32.partialorder %v4227_v0, 1065353216  ;;  %vm11153_vm11 = vcmp.eq.f32.partialorder %v11042_v45, 1065353216 }
  0xa0   :  { %vm5870_vm13 = vmand %vm10686_vm0, %vm11147_vm1  ;;  %v5880_v41 = vsel %vm11151_vm14, %v4562_v26, %v1513_v61  ;;  %v11157_v50 = vmov 0  ;;  %vm11164_vm2 = vcmp.eq.f32.partialorder %v4427_v32, 2139095040  ;;  %3982 = vpow2.f32 %v2193_v53 }
  0xa1   :  { %vm5886_vm15 = vmor %vm11153_vm11, %vm11152_vm9  ;;  %vm1924_vm11 = vcmp.ne.f32.partialorder %v11091_v5, %v11091_v5  ;;  %v1710_v33 = vsel %vm11164_vm2, %v1709_v56, %v1703_v1  ;;  %v1807_v18 = vsel %vm5854_vm10, %v1806_v3, %v1804_v12  ;;  %vm11170_vm2 = vcmp.gt.f32.partialorder %v5310_v28, 1065353216 }
  0xa2   :  { %vm5895_vm0 = vmor %vm11156_vm4, %vm11100_vm3  ;;  %vm11162_vm4 = vcmp.lt.f32.partialorder %v11091_v5, 0  ;;  %3984 = vpow2.f32 %v2297_v15  ;;  %v11176_v12 = vmov 0  ;;  %v11183_v3 = vmov 0 }
  0xa3   :  { %v11158_v50 = vsel %vm5895_vm0, 4294967295, %v11157_v50  ;;  %vm5903_vm14 = vmand %vm1902_vm6, %vm11007_vm8  ;;  %v1922_v61 = vsel %vm11162_vm4, %v4669_v16, %v4503_v2  ;;  %vm11163_vm6 = vnez %v11103_v42  ;;  %vm11169_vm4 = vcmp.eq.f32.partialorder %v11086_v54, 3212836864 }
  0xa4   :  { %vm11161_vm9 = vmor %vm5778_vm12, %vm5792_vm5  ;;  %v1615_v47 = vsel %vm11163_vm6, 2143289344, %v1611_v44  ;;  %vm11165_vm12 = vcmp.eq.f32.partialorder %v4597_v43, 0  ;;  %vm11166_vm5 = vcmp.lt.f32.partialorder %v4227_v0, 0  ;;  %v1813_v42 = vsel %vm11169_vm4, 1065353216, %v1811_v38  ;;  %v11194_v38 = vld [vmem:[#allocation17_spill] sm:$0xff] }
  0xa5   :  { %v1915_v10 = vsel %vm11161_vm9, 2139095040, %v10838_v23  ;;  %vm5928_vm9 = vmand %vm11166_vm5, %vm11165_vm12  ;;  %v2010_v44 = vsel %vm5870_vm13, 2143289344, %v3975_v4  ;;  %vm11174_vm12 = vcmp.eq.f32.partialorder %v4227_v0, 0  ;;  %v1911_v53 = vsel %vm5903_vm14, %v1910_v22, %v1908_v51 }
  0xa6   :  { %vm11171_vm6 = vmmov %vm11166_vm5  ;;  %vm11175_vm5 = vcmp.eq.f32.partialorder %v11086_v54, 1065353216  ;;  %vm11178_vm13 = vcmp.eq.f32.partialorder %v11091_v5, 3212836864  ;;  %3986 = vlog2.f32 %v5875_v24  ;;  %vm11181_vm14 = vnez %v11122_v29 }
  0xa7   :  { %vm5942_vm0 = vmxor %vm11171_vm6, %vm11170_vm2  ;;  %v1917_v56 = vsel %vm11178_vm13, 1065353216, %v1915_v10  ;;  %v1617_v51 = vsel %vm11181_vm14, 1065353216, %v1615_v47  ;;  %v2401_v15 = vmul.f32 %v3977_v6, %v4227_v0  ;;  %vm11185_vm2 = vcmp.eq.f32.partialorder %v11056_v57, 2139095040  ;;  %v3979_v57 = vpop.eup %3978 }
  0xa8   :  { %vm5950_vm10 = vmor %vm11175_vm5, %vm11174_vm12  ;;  %vm11182_vm5 = vcmp.eq.f32.partialorder %v11091_v5, 1065353216  ;;  %v1715_v4 = vsel %vm11185_vm2, %v5683_v7, %v1710_v33  ;;  %vm11186_vm14 = vcmp.eq.f32.partialorder %v4427_v32, 2139095040  ;;  %vm11187_vm6 = vcmp.eq.f32.partialorder %v4597_v43, 0  ;;  %v11267_v7 = vld [vmem:[#allocation19_spill] sm:$0xff] }
  0xa9   :  { %v11177_v12 = vsel %vm5950_vm10, 4294967295, %v11176_v12  ;;  %vm5963_vm4 = vmor %vm1924_vm11, %vm11100_vm3  ;;  %v1814_v47 = vsel %vm11186_vm14, %v1813_v42, %v1807_v18  ;;  %v2012_v29 = vsel %vm11187_vm6, %v4529_v11, %v2010_v44  ;;  %vm11190_vm11 = vcmp.eq.f32.partialorder %v11036_v55, 0 }
  0xaa   :  { %vm5976_vm13 = vmor %vm11182_vm5, %vm11174_vm12  ;;  %vm11188_vm5 = vcmp.lt.f32.partialorder %v4597_v43, 0  ;;  %vm11191_vm10 = vcmp.lt.f32.partialorder %v4227_v0, 0  ;;  %v6015_v22 = vand.u32 2147483647, %v11194_v38  ;;  %vm11196_vm6 = vcmp.gt.f32.partialorder %v5495_v59, 1065353216 }
  0xab   :  { %v11184_v3 = vsel %vm5976_vm13, 4294967295, %v11183_v3  ;;  %v5999_v6 = vsel %vm11188_vm5, %v4669_v16, %v4503_v2  ;;  %vm11189_vm2 = vmmov %vm11186_vm14  ;;  %vm11195_vm5 = vcmp.eq.f32.partialorder %v4227_v0, 1065353216  ;;  %v2014_v44 = vxor.u32 2147483648, %v2012_v29 }
  0xac   :  { %v1918_v33 = vsel %vm11189_vm2, %v1917_v56, %v1911_v53  ;;  %vm6010_vm12 = vmand %vm11191_vm10, %vm11190_vm11  ;;  %v6020_v36 = vsel %vm11195_vm5, %v4564_v27, %v1617_v51  ;;  %vm11200_vm11 = vcmp.lt.f32.partialorder %v11036_v55, 0  ;;  %v1719_v27 = vsel %vm5835_vm7, 2143289344, %v1715_v4  ;;  %v3981_v53 = vpop.eup %3980 }
  0xad   :  { %vm11197_vm13 = vmmov %vm11191_vm10  ;;  %v6036_v10 = vsel %vm11200_vm11, %v4669_v16, %v4503_v2  ;;  %vm11201_vm2 = vcmp.eq.f32.partialorder %v11095_v39, 2139095040  ;;  %3988 = vpow2.f32 %v2401_v15  ;;  %vm11205_vm11 = vcmp.eq.f32.partialorder %v11104_v37, 2139095040 }
  0xae   :  { %vm6028_vm10 = vmxor %vm11197_vm13, %vm11196_vm6  ;;  %v1819_v18 = vsel %vm11201_vm2, %v5769_v8, %v1814_v47  ;;  %vm11202_vm13 = vcmp.lt.s32.totalorder %v4597_v43, 0  ;;  %v1923_v56 = vsel %vm11205_vm11, %v1922_v61, %v1918_v33  ;;  %vm11207_vm2 = vcmp.lt.f32.partialorder %v11036_v55, 0  ;;  %v3983_v61 = vpop.eup %3982 }
  0xaf   :  { %vm6048_vm6 = vmand %vm11202_vm13, %vm11007_vm8  ;;  %v2505_v37 = vmul.f32 %v3979_v57, %v4227_v0  ;;  %vm11210_vm11 = vcmp.ne.f32.partialorder %v4597_v43, %v4597_v43  ;;  %3990 = vlog2.f32 %v6015_v22  ;;  %v1721_v19 = vsel %vm5886_vm15, 1065353216, %v1719_v27  ;;  %v3985_v15 = vpop.eup %3984 }
  0xb0   :  { %vm11206_vm7 = vmor %vm5928_vm9, %vm5942_vm0  ;;  %vm11214_vm0 = vcmp.lt.s32.totalorder %v11036_v55, 0  ;;  %v11215_v51 = vmov 0  ;;  %v1927_v4 = vsel %vm5963_vm4, 2143289344, %v1923_v56  ;;  %v2015_v47 = vsel %vm6048_vm6, %v2014_v44, %v2012_v29 }
  0xb1   :  { %v2019_v39 = vsel %vm11206_vm7, 2139095040, %v10838_v23  ;;  %vm6064_vm13 = vmand %vm11207_vm2, %vm11147_vm1  ;;  %vm11217_vm2 = vcmp.lt.f32.partialorder %v11048_v25, 0  ;;  %vm11226_vm6 = vcmp.lt.f32.partialorder %v11053_v31, 0  ;;  %3992 = vpow2.f32 %v2505_v37 }
  0xb2   :  { %vm6075_vm14 = vmor %vm11210_vm11, %vm11100_vm3  ;;  %vm11213_vm11 = vnez %v11158_v50  ;;  %v2114_v33 = vsel %vm6064_vm13, 2143289344, %v3981_v53  ;;  %vm11234_vm4 = vcmp.eq.f32.partialorder %v4597_v43, 1065353216  ;;  %v11235_v53 = vmov 0 }
  0xb3   :  { %v11212_v20 = vsel %vm6075_vm14, 4294967295, %v11211_v20  ;;  %v1823_v1 = vsel %vm11213_vm11, 2143289344, %v1819_v18  ;;  %vm6097_vm9 = vmand %vm11214_vm0, %vm11007_vm8  ;;  %vm11222_vm11 = vcmp.eq.f32.partialorder %v11048_v25, 0  ;;  %v3987_v18 = vpop.eup %3986  ;;  %vm11238_vm3 = vcmp.lt.f32.partialorder %v4227_v0, 0 }
  0xb4   :  { %v11216_v51 = vsel %vm6097_vm9, 4294967295, %v11215_v51  ;;  %vm6106_vm5 = vmand %vm11217_vm2, %vm11147_vm1  ;;  %vm11237_vm9 = vcmp.gt.f32.partialorder %v5524_v62, 1065353216  ;;  %v11245_v8 = vmov 0  ;;  %v6277_v26 = vand.u32 2147483647, %v11267_v7 }
  0xb5   :  { %vm11220_vm15 = vmmov %vm11217_vm2  ;;  %vm11221_vm2 = vcmp.eq.f32.partialorder %v4597_v43, 3212836864  ;;  %v2218_v37 = vsel %vm6106_vm5, 2143289344, %v3983_v61  ;;  %vm11255_vm5 = vcmp.eq.f32.partialorder %v4227_v0, 1065353216 }
  0xb6   :  { %v6114_v50 = vsel %vm11220_vm15, %v4669_v16, %v4503_v2  ;;  %v2021_v57 = vsel %vm11221_vm2, 1065353216, %v2019_v39  ;;  %vm11223_vm15 = vcmp.lt.f32.partialorder %v4227_v0, 0  ;;  %vm6139_vm2 = vmand %vm11226_vm6, %vm11147_vm1  ;;  %11268 = vst [vmem:[#allocation7_spill] sm:$0xff] %v6277_v26 }
  0xb7   :  { %vm6129_vm7 = vmand %vm11223_vm15, %vm11222_vm11  ;;  %vm11230_vm11 = vcmp.eq.f32.partialorder %v4227_v0, 1065353216  ;;  %vm11232_vm15 = vnez %v11177_v12 }
  0xb8   :  { %vm11229_vm13 = vmmov %vm11226_vm6  ;;  %v6152_v42 = vsel %vm11230_vm11, %v11042_v45, %v1721_v19  ;;  %v1825_v44 = vsel %vm11232_vm15, 1065353216, %v1823_v1  ;;  %vm11233_vm6 = vcmp.eq.f32.partialorder %v4227_v0, 0  ;;  %v2322_v19 = vsel %vm6139_vm2, 2143289344, %v3985_v15  ;;  %v11258_v15 = vld [vmem:[#allocation18_spill] sm:$0xff] }
  0xb9   :  { %v6147_v29 = vsel %vm11229_vm13, %v4669_v16, %v4503_v2  ;;  %11231 = vst [vmem:[#allocation28_spill] sm:$0xff] %v6152_v42  ;;  %vm6160_vm0 = vmor %vm11234_vm4, %vm11233_vm6  ;;  %vm11241_vm13 = vnez %v11184_v3  ;;  %vm11247_vm6 = vcmp.eq.f32.partialorder %v11053_v31, 0  ;;  %v6222_v61 = vsel %vm11255_vm5, %v11086_v54, %v1825_v44  ;;  %v3989_v54 = vpop.eup %3988 }
  0xba   :  { %v11236_v53 = vsel %vm6160_vm0, 4294967295, %v11235_v53  ;;  %vm6169_vm14 = vmxor %vm11238_vm3, %vm11237_vm9  ;;  %v1929_v12 = vsel %vm11241_vm13, 1065353216, %v1927_v4  ;;  %vm11242_vm0 = vcmp.eq.f32.partialorder %v4427_v32, 2139095040  ;;  %vm11243_vm3 = vcmp.eq.f32.partialorder %v11036_v55, 0  ;;  %11256 = vst [vmem:[#allocation30_spill] sm:$0xff] %v6222_v61  ;;  %v3991_v44 = vpop.eup %3990 }
  0xbb   :  { %v2022_v56 = vsel %vm11242_vm0, %v2021_v57, %v2015_v47  ;;  %v2116_v39 = vsel %vm11243_vm3, %v4529_v11, %v2114_v33  ;;  %vm11244_vm9 = vcmp.lt.s32.totalorder %v11048_v25, 0  ;;  %vm11248_vm13 = vcmp.lt.f32.partialorder %v4227_v0, 0  ;;  %v3993_v42 = vpop.eup %3992 }
  0xbc   :  { %vm6190_vm11 = vmand %vm11244_vm9, %vm11007_vm8  ;;  %vm11251_vm3 = vcmp.gt.f32.partialorder %v5544_v21, 1065353216  ;;  %v2609_v4 = vmul.f32 %v3987_v18, %v4227_v0  ;;  %v6237_v47 = vand.u32 2147483647, %v11258_v15  ;;  %v6242_v57 = vsel %vm11255_vm5, %v11091_v5, %v1929_v12 }
  0xbd   :  { %v11246_v8 = vsel %vm6190_vm11, 4294967295, %v11245_v8  ;;  %vm6199_vm4 = vmand %vm11248_vm13, %vm11247_vm6  ;;  %vm10688_vm6 = vcmp.lt.f32.partialorder %v11117_v40, 0  ;;  %11259 = vst [vmem:[#allocation25_spill] sm:$0xff] %v6242_v57  ;;  %vm11260_vm2 = vcmp.eq.f32.partialorder %v5310_v28, 2139095040  ;;  %v2118_v18 = vxor.u32 2147483648, %v2116_v39 }
  0xbe   :  { %vm11252_vm9 = vmmov %vm11248_vm13  ;;  %v2027_v33 = vsel %vm11260_vm2, %v5999_v6, %v2022_v56  ;;  %vm11266_vm0 = vcmp.eq.f32.partialorder %v11053_v31, 0  ;;  %v6294_v56 = vsel %vm10688_vm6, %v4669_v16, %v4503_v2  ;;  %3994 = vpow2.f32 %v2609_v4 }
  0xbf   :  { %vm6212_vm15 = vmxor %vm11252_vm9, %vm11251_vm3  ;;  %vm11257_vm9 = vcmp.lt.f32.partialorder %v11092_v13, 0  ;;  %v2324_v6 = vsel %vm11266_vm0, %v4529_v11, %v2322_v19  ;;  %vm11273_vm5 = vnez %v11212_v20  ;;  %v11276_v19 = vmov 0 }
  0xc0   :  { %v6233_v30 = vsel %vm11257_vm9, %v4669_v16, %v4503_v2  ;;  %vm11261_vm3 = vmmov %vm11257_vm9  ;;  %vm11265_vm9 = vcmp.eq.f32.partialorder %v11048_v25, 0  ;;  %vm11279_vm6 = vcmp.lt.f32.partialorder %v4227_v0, 0  ;;  %3996 = vlog2.f32 %v6237_v47 }
  0xc1   :  { %vm6253_vm13 = vmand %vm11261_vm3, %vm11147_vm1  ;;  %v2220_v5 = vsel %vm11265_vm9, %v4529_v11, %v2218_v37  ;;  %v2031_v37 = vsel %vm11273_vm5, 2143289344, %v2027_v33  ;;  %vm11282_vm3 = vnez %v11216_v51  ;;  %v2326_v61 = vxor.u32 2147483648, %v2324_v6 }
  0xc2   :  { %vm11264_vm2 = vmor %vm6010_vm12, %vm6028_vm10  ;;  %vm11269_vm12 = vcmp.eq.f32.partialorder %v11092_v13, 0  ;;  %vm11270_vm10 = vcmp.lt.f32.partialorder %v4227_v0, 0  ;;  %v2426_v57 = vsel %vm6253_vm13, 2143289344, %v3989_v54  ;;  %v2119_v4 = vsel %vm11282_vm3, %v2118_v18, %v2116_v39 }
  0xc3   :  { %v2123_v28 = vsel %vm11264_vm2, 2139095040, %v10838_v23  ;;  %vm6283_vm9 = vmand %vm11270_vm10, %vm11269_vm12  ;;  %vm11274_vm12 = vnez %v10794_v48  ;;  %vm11275_vm10 = vcmp.ne.f32.partialorder %v11036_v55, %v11036_v55  ;;  %vm11278_vm2 = vcmp.gt.f32.partialorder %v5661_v17, 1065353216 }
  0xc4   :  { %vm6303_vm0 = vmor %vm11275_vm10, %vm11274_vm12  ;;  %vm11283_vm13 = vcmp.eq.f32.partialorder %v11036_v55, 3212836864  ;;  %v2222_v33 = vxor.u32 2147483648, %v2220_v5  ;;  %v2713_v18 = vmul.f32 %v3991_v44, %v4227_v0  ;;  %3998 = vlog2.f32 %v6277_v26  ;;  %v11306_v44 = vld [vmem:[#allocation20_spill] sm:$0xff] }
  0xc5   :  { %v11277_v19 = vsel %vm6303_vm0, 4294967295, %v11276_v19  ;;  %vm6314_vm11 = vmxor %vm11279_vm6, %vm11278_vm2  ;;  %v2125_v54 = vsel %vm11283_vm13, 1065353216, %v2123_v28  ;;  %vm11284_vm2 = vcmp.lt.s32.totalorder %v11053_v31, 0  ;;  %vm11288_vm13 = vcmp.lt.s32.totalorder %v11092_v13, 0 }
  0xc6   :  { %vm6332_vm5 = vmand %vm11284_vm2, %vm11007_vm8  ;;  %vm11293_vm10 = vnez %v11236_v53  ;;  %vm11294_vm2 = vcmp.eq.f32.partialorder %v4427_v32, 2139095040  ;;  %v11300_v28 = vmov 0  ;;  %v11303_v53 = vmov 0 }
  0xc7   :  { %vm11287_vm3 = vmor %vm6129_vm7, %vm6169_vm14  ;;  %vm11292_vm7 = vcmp.eq.f32.partialorder %v11092_v13, 0  ;;  %v2033_v3 = vsel %vm11293_vm10, 1065353216, %v2031_v37  ;;  %v2126_v1 = vsel %vm11294_vm2, %v2125_v54, %v2119_v4  ;;  %vm11302_vm10 = vcmp.ne.f32.partialorder %v11053_v31, %v11053_v31 }
  0xc8   :  { %v2227_v51 = vsel %vm11287_vm3, 2139095040, %v10838_v23  ;;  %vm6346_vm6 = vmand %vm11288_vm13, %vm11007_vm8  ;;  %v2428_v45 = vsel %vm11292_vm7, %v4529_v11, %v2426_v57  ;;  %v11297_v57 = vmov 0  ;;  %vm11299_vm7 = vcmp.ne.f32.partialorder %v11048_v25, %v11048_v25 }
  0xc9   :  { %vm11291_vm14 = vmor %vm6199_vm4, %vm6212_vm15  ;;  %vm11295_vm15 = vcmp.eq.f32.partialorder %v4227_v0, 0  ;;  %vm11296_vm4 = vcmp.eq.f32.partialorder %v11036_v55, 1065353216  ;;  %v6404_v37 = vand.u32 2147483647, %v11306_v44  ;;  %vm11308_vm3 = vcmp.eq.f32.partialorder %v11048_v25, 3212836864 }
  0xca   :  { %v2331_v27 = vsel %vm11291_vm14, 2139095040, %v10838_v23  ;;  %vm6376_vm14 = vmor %vm11296_vm4, %vm11295_vm15  ;;  %vm11305_vm15 = vcmp.lt.f32.partialorder %v11117_v40, 0  ;;  %v2229_v54 = vsel %vm11308_vm3, 1065353216, %v2227_v51  ;;  %v2327_v26 = vsel %vm6332_vm5, %v2326_v61, %v2324_v6 }
  0xcb   :  { %v11298_v57 = vsel %vm6376_vm14, 4294967295, %v11297_v57  ;;  %vm6385_vm13 = vmor %vm11299_vm7, %vm11274_vm12  ;;  %vm11307_vm7 = vnez %v11246_v8  ;;  %vm11313_vm5 = vcmp.eq.f32.partialorder %v11117_v40, 0  ;;  %4000 = vpow2.f32 %v2713_v18 }
  0xcc   :  { %v11301_v28 = vsel %vm6385_vm13, 4294967295, %v11300_v28  ;;  %vm6394_vm2 = vmor %vm11302_vm10, %vm11274_vm12  ;;  %v2223_v4 = vsel %vm11307_vm7, %v2222_v33, %v2220_v5  ;;  %vm11312_vm7 = vcmp.eq.f32.partialorder %v11053_v31, 3212836864  ;;  %v2430_v5 = vxor.u32 2147483648, %v2428_v45 }
  0xcd   :  { %v11304_v53 = vsel %vm6394_vm2, 4294967295, %v11303_v53  ;;  %vm2529_vm4 = vmand %vm11305_vm15, %vm11147_vm1  ;;  %vm11309_vm15 = vcmp.lt.s32.totalorder %v11117_v40, 0  ;;  %v2333_v8 = vsel %vm11312_vm7, 1065353216, %v2331_v27  ;;  %vm11315_vm2 = vcmp.lt.f32.partialorder %v4227_v0, 0 }
  0xce   :  { %v2530_v9 = vsel %vm2529_vm4, 2143289344, %v3993_v42  ;;  %vm6418_vm0 = vmand %vm11309_vm15, %vm11007_vm8  ;;  %vm11318_vm15 = vcmp.eq.f32.partialorder %v4227_v0, 1065353216  ;;  %vm11319_vm7 = vcmp.eq.f32.partialorder %v4227_v0, 0  ;;  %vm11320_vm3 = vcmp.eq.f32.partialorder %v11048_v25, 1065353216 }
  0xcf   :  { %v2532_v61 = vsel %vm11313_vm5, %v4529_v11, %v2530_v9  ;;  %vm11314_vm4 = vmmov %vm11313_vm5  ;;  %v6439_v6 = vsel %vm11318_vm15, %v4597_v43, %v2033_v3  ;;  %v11321_v9 = vmov 0  ;;  %vm11324_vm5 = vcmp.gt.f32.partialorder %v5750_v46, 1065353216 }
  0xd0   :  { %vm6432_vm10 = vmand %vm11315_vm2, %vm11314_vm4  ;;  %v2534_v14 = vxor.u32 2147483648, %v2532_v61  ;;  %vm11325_vm4 = vcmp.lt.f32.partialorder %v4227_v0, 0  ;;  %4002 = vlog2.f32 %v6404_v37 }
  0xd1   :  { %vm6445_vm13 = vmor %vm11320_vm3, %vm11319_vm7  ;;  %vm11326_vm3 = vcmp.eq.f32.partialorder %v5495_v59, 2139095040  ;;  %v3995_v59 = vpop.eup %3994 }
  0xd2   :  { %v11322_v9 = vsel %vm6445_vm13, 4294967295, %v11321_v9  ;;  %vm11323_vm2 = vmor %vm6283_vm9, %vm6314_vm11  ;;  %v2131_v43 = vsel %vm11326_vm3, %v6036_v10, %v2126_v1  ;;  %vm11327_vm13 = vcmp.eq.f32.partialorder %v11053_v31, 1065353216  ;;  %vm11330_vm9 = vcmp.lt.f32.partialorder %v11150_v35, 0  ;;  %v3997_v3 = vpop.eup %3996 }
  0xd3   :  { %v2435_v33 = vsel %vm11323_vm2, 2139095040, %v10838_v23  ;;  %vm2537_vm15 = vmxor %vm11325_vm4, %vm11324_vm5  ;;  %v6477_v20 = vsel %vm11330_vm9, %v4669_v16, %v4503_v2  ;;  %v2431_v1 = vsel %vm6346_vm6, %v2430_v5, %v2428_v45  ;;  %vm11336_vm3 = vcmp.eq.f32.partialorder %v11092_v13, 3212836864 }
  0xd4   :  { %vm6467_vm8 = vmor %vm11327_vm13, %vm11319_vm7  ;;  %vm11331_vm13 = vcmp.eq.f32.partialorder %v4427_v32, 2139095040  ;;  %vm11337_vm7 = vcmp.ne.f32.partialorder %v11117_v40, %v11117_v40  ;;  %vm11340_vm6 = vnez %v11277_v19  ;;  %v11343_v45 = vmov 0  ;;  %v3999_v19 = vpop.eup %3998 }
  0xd5   :  { %vm2538_vm11 = vmor %vm6432_vm10, %vm2537_vm15  ;;  %v2230_v10 = vsel %vm11331_vm13, %v2229_v54, %v2223_v4  ;;  %vm11333_vm10 = vcmp.ne.f32.partialorder %v11092_v13, %v11092_v13  ;;  %v11338_v4 = vmov 0  ;;  %v2135_v39 = vsel %vm11340_vm6, 2143289344, %v2131_v43 }
  0xd6   :  { %vm11332_vm5 = vmmov %vm11331_vm13  ;;  %v2539_v27 = vsel %vm2538_vm11, 2139095040, %v10838_v23  ;;  %v2535_v54 = vsel %vm6418_vm0, %v2534_v14, %v2532_v61  ;;  %vm11346_vm11 = vcmp.lt.f32.partialorder %v11150_v35, 0 }
  0xd7   :  { %v2334_v51 = vsel %vm11332_vm5, %v2333_v8, %v2327_v26  ;;  %vm6491_vm4 = vmor %vm11333_vm10, %vm11274_vm12  ;;  %v2437_v26 = vsel %vm11336_vm3, 1065353216, %v2435_v33  ;;  %vm11341_vm10 = vcmp.eq.f32.partialorder %v4227_v0, 0  ;;  %vm11342_vm3 = vcmp.eq.f32.partialorder %v11092_v13, 1065353216  ;;  %v11353_v33 = vld [vmem:[#allocation21_spill] sm:$0xff] }
  0xd8   :  { %vm6506_vm9 = vmor %vm11337_vm7, %vm11274_vm12  ;;  %vm11345_vm7 = vcmp.eq.f32.partialorder %v11117_v40, 3212836864  ;;  %vm11350_vm5 = vcmp.lt.s32.totalorder %v11150_v35, 0  ;;  %v6548_v14 = vand.u32 2147483647, %v11353_v33 }
  0xd9   :  { %v11339_v4 = vsel %vm6506_vm9, 4294967295, %v11338_v4  ;;  %vm6519_vm2 = vmor %vm11342_vm3, %vm11341_vm10  ;;  %v2541_v8 = vsel %vm11345_vm7, 1065353216, %v2539_v27  ;;  %vm11347_vm10 = vcmp.eq.f32.partialorder %v5524_v62, 2139095040  ;;  %vm11348_vm3 = vcmp.eq.f32.partialorder %v5544_v21, 2139095040 }
  0xda   :  { %v11344_v45 = vsel %vm6519_vm2, 4294967295, %v11343_v45  ;;  %vm2633_vm13 = vmand %vm11346_vm11, %vm11147_vm1  ;;  %v2235_v5 = vsel %vm11347_vm10, %v6114_v50, %v2230_v10  ;;  %v2339_v44 = vsel %vm11348_vm3, %v6147_v29, %v2334_v51  ;;  %vm11349_vm7 = vnez %v10773_v52 }
  0xdb   :  { %v2634_v61 = vsel %vm2633_vm13, 2143289344, %v3995_v59  ;;  %vm6543_vm14 = vmand %vm11350_vm5, %vm11349_vm7  ;;  %vm11354_vm11 = vcmp.eq.f32.partialorder %v4427_v32, 2139095040  ;;  %vm11355_vm10 = vcmp.eq.f32.partialorder %v11150_v35, 0  ;;  %vm11357_vm3 = vcmp.lt.f32.partialorder %v4227_v0, 0 }
  0xdc   :  { %v2438_v62 = vsel %vm11354_vm11, %v2437_v26, %v2431_v1  ;;  %v2636_v21 = vsel %vm11355_vm10, %v4529_v11, %v2634_v61  ;;  %vm11356_vm13 = vmmov %vm11355_vm10  ;;  %v2817_v29 = vmul.f32 %v3997_v3, %v4227_v0  ;;  %vm11364_vm5 = vnez %v11298_v57  ;;  %v4001_v26 = vpop.eup %4000  ;;  %v11384_v61 = vld [vmem:[#allocation22_spill] sm:$0xff] }
  0xdd   :  { %vm6559_vm0 = vmand %vm11357_vm3, %vm11356_vm13  ;;  %v2638_v59 = vxor.u32 2147483648, %v2636_v21  ;;  %vm11363_vm13 = vcmp.lt.f32.partialorder %v11194_v38, 0  ;;  %v2137_v51 = vsel %vm11364_vm5, 1065353216, %v2135_v39  ;;  %vm11366_vm9 = vnez %v11304_v53 }
  0xde   :  { %vm11360_vm6 = vmmov %vm11354_vm11  ;;  %vm11361_vm11 = vcmp.gt.f32.partialorder %v5875_v24, 1065353216  ;;  %v6576_v10 = vsel %vm11363_vm13, %v4669_v16, %v4503_v2  ;;  %v2343_v3 = vsel %vm11366_vm9, 2143289344, %v2339_v44  ;;  %v2921_v1 = vmul.f32 %v3999_v19, %v4227_v0 }
  0xdf   :  { %v2542_v43 = vsel %vm11360_vm6, %v2541_v8, %v2535_v54  ;;  %vm11362_vm10 = vmmov %vm11357_vm3  ;;  %vm2756_vm3 = vcmp.ne.f32.partialorder %v11194_v38, %v11194_v38  ;;  %vm11365_vm6 = vnez %v11301_v28  ;;  %vm11367_vm13 = vcmp.eq.f32.partialorder %v5661_v17, 2139095040  ;;  %v4003_v8 = vpop.eup %4002 }
  0xe0   :  { %vm2641_vm15 = vmxor %vm11362_vm10, %vm11361_vm11  ;;  %v2239_v27 = vsel %vm11365_vm6, 2143289344, %v2235_v5  ;;  %v2443_v54 = vsel %vm11367_vm13, %v6233_v30, %v2438_v62  ;;  %vm11368_vm5 = vcmp.eq.f32.partialorder %v4227_v0, 0  ;;  %vm11369_vm2 = vcmp.eq.f32.partialorder %v11117_v40, 1065353216 }
  0xe1   :  { %vm2642_vm11 = vmor %vm6559_vm0, %vm2641_vm15  ;;  %v2639_v28 = vsel %vm6543_vm14, %v2638_v59, %v2636_v21  ;;  %4004 = vlog2.f32 %v6548_v14  ;;  %vm11372_vm15 = vcmp.eq.f32.partialorder %v5750_v46, 2139095040  ;;  %vm11373_vm9 = vcmp.eq.f32.partialorder %v11150_v35, 3212836864 }
  0xe2   :  { %vm6597_vm6 = vmor %vm11369_vm2, %vm11368_vm5  ;;  %v2643_v53 = vsel %vm2642_vm11, 2139095040, %v10838_v23  ;;  %v2547_v17 = vsel %vm11372_vm15, %v6294_v56, %v2542_v43  ;;  %vm11374_vm2 = vcmp.ne.f32.partialorder %v11150_v35, %v11150_v35  ;;  %4006 = vpow2.f32 %v2817_v29 }
  0xe3   :  { %v2645_v30 = vsel %vm11373_vm9, 1065353216, %v2643_v53  ;;  %vm6615_vm0 = vmor %vm11374_vm2, %vm11274_vm12  ;;  %vm10692_vm14 = vcmp.lt.f32.partialorder %v11258_v15, 0  ;;  %vm11377_vm11 = vcmp.eq.f32.partialorder %v4227_v0, 1065353216  ;;  %vm11378_vm13 = vnez %v11322_v9 }
  0xe4   :  { %v2138_v46 = vsel %vm11377_vm11, %v11036_v55, %v2137_v51  ;;  %v2241_v56 = vsel %vm11378_vm13, 1065353216, %v2239_v27  ;;  %vm11379_vm5 = vcmp.eq.f32.partialorder %v4427_v32, 2139095040  ;;  %vm11380_vm15 = vcmp.lt.f32.partialorder %v11194_v38, 0 }
  0xe5   :  { %v2646_v19 = vsel %vm11379_vm5, %v2645_v30, %v2639_v28  ;;  %vm2737_vm9 = vmand %vm11380_vm15, %vm11147_vm1  ;;  %v2345_v5 = vsel %vm6467_vm8, 1065353216, %v2343_v3  ;;  %v2447_v44 = vsel %vm6491_vm4, 2143289344, %v2443_v54  ;;  %vm11381_vm11 = vcmp.lt.s32.totalorder %v11194_v38, 0  ;;  %v11434_v3 = vld [vmem:[#allocation25_spill] sm:$0xff] }
  0xe6   :  { %v2738_v55 = vsel %vm2737_vm9, 2143289344, %v4001_v26  ;;  %vm6640_vm13 = vmand %vm11381_vm11, %vm11349_vm7  ;;  %v6645_v42 = vand.u32 2147483647, %v11384_v61  ;;  %vm11385_vm5 = vnez %v11339_v4  ;;  %vm11386_vm8 = vcmp.eq.f32.partialorder %v11194_v38, 0 }
  0xe7   :  { %v2551_v62 = vsel %vm11385_vm5, 2143289344, %v2547_v17  ;;  %v2740_v12 = vsel %vm11386_vm8, %v4529_v11, %v2738_v55  ;;  %vm11387_vm4 = vmmov %vm11386_vm8  ;;  %4008 = vpow2.f32 %v2921_v1  ;;  %vm11391_vm2 = vcmp.eq.f32.partialorder %v5875_v24, 2139095040  ;;  %v11423_v55 = vld [vmem:[#allocation7_spill] sm:$0xff] }
  0xe8   :  { %vm11388_vm15 = vmmov %vm11362_vm10  ;;  %v2651_v4 = vsel %vm11391_vm2, %v6477_v20, %v2646_v19  ;;  %v2742_v21 = vxor.u32 2147483648, %v2740_v12  ;;  %vm11392_vm5 = vcmp.gt.f32.partialorder %v6015_v22, 1065353216  ;;  %v6672_v50 = vsel %vm10692_vm14, %v4669_v16, %v4503_v2 }
  0xe9   :  { %vm6656_vm9 = vmand %vm11388_vm15, %vm11387_vm4  ;;  %v3025_v29 = vmul.f32 %v4003_v8, %v4227_v0  ;;  %vm11394_vm4 = vcmp.eq.f32.partialorder %v4227_v0, 1065353216  ;;  %vm11396_vm15 = vnez %v11344_v45  ;;  %v2553_v59 = vsel %vm6597_vm6, 1065353216, %v2551_v62 }
  0xea   :  { %vm11393_vm8 = vmmov %vm11362_vm10  ;;  %v2242_v43 = vsel %vm11394_vm4, %v11048_v25, %v2241_v56  ;;  %v2449_v20 = vsel %vm11396_vm15, 1065353216, %v2447_v44  ;;  %vm11397_vm11 = vcmp.eq.f32.partialorder %v4227_v0, 0  ;;  %vm11398_vm14 = vcmp.eq.f32.partialorder %v11150_v35, 1065353216  ;;  %v11417_v56 = vld [vmem:[#allocation28_spill] sm:$0xff] }
  0xeb   :  { %vm2745_vm10 = vmxor %vm11393_vm8, %vm11392_vm5  ;;  %vm2939_vm8 = vcmp.lt.f32.partialorder %v11267_v7, 0  ;;  %4010 = vlog2.f32 %v6645_v42  ;;  %v2655_v51 = vsel %vm6615_vm0, 2143289344, %v2651_v4  ;;  %vm11401_vm6 = vcmp.eq.f32.partialorder %v11194_v38, 3212836864 }
  0xec   :  { %vm11395_vm2 = vmmov %vm11394_vm4  ;;  %v203_v1 = vadd.f32 %v5463_v58, %v5397_v34  ;;  %v229_v26 = vadd.f32 %v5880_v41, %v5755_v49  ;;  %4012 = vpow2.f32 %v3025_v29  ;;  %v255_v34 = vadd.f32 %v2242_v43, %v2138_v46  ;;  %v4005_v58 = vpop.eup %4004  ;;  %v11430_v43 = vld [vmem:[#allocation30_spill] sm:$0xff] }
  0xed   :  { %v2346_v24 = vsel %vm11395_vm2, %v11053_v31, %v2345_v5  ;;  %vm2746_vm5 = vmor %vm6656_vm9, %vm2745_vm10  ;;  %v2743_v31 = vsel %vm6640_vm13, %v2742_v21, %v2740_v12  ;;  %vm2940_vm10 = vcmp.eq.f32.partialorder %v11267_v7, 0  ;;  %vm11405_vm13 = vcmp.eq.f32.partialorder %v4427_v32, 2139095040  ;;  %v4007_v30 = vpop.eup %4006  ;;  %v11429_v21 = vld [vmem:[#allocation27_spill] sm:$0xff] }
  0xee   :  { %vm6692_vm4 = vmor %vm11398_vm14, %vm11397_vm11  ;;  %v2747_v45 = vsel %vm2746_vm5, 2139095040, %v10838_v23  ;;  %vm2838_vm15 = vcmp.lt.s32.totalorder %v11258_v15, 0  ;;  %v204_v53 = vadd.f32 %v5549_v60, %v203_v1  ;;  %v230_v17 = vadd.f32 %v6020_v36, %v229_v26  ;;  %v11416_v36 = vld [vmem:[#allocation26_spill] sm:$0xff] }
  0xef   :  { %v2749_v27 = vsel %vm11401_vm6, 1065353216, %v2747_v45  ;;  %vm6710_vm14 = vmor %vm2756_vm3, %vm11274_vm12  ;;  %vm11407_vm3 = vcmp.eq.f32.partialorder %v11194_v38, 1065353216  ;;  %v2657_v8 = vsel %vm6692_vm4, 1065353216, %v2655_v51  ;;  %vm11413_vm6 = vcmp.lt.f32.partialorder %v11258_v15, 0  ;;  %v11433_v51 = vld [vmem:[#allocation6_spill] sm:$0xff] }
  0xf0   :  { %vm11404_vm0 = vmmov %vm11395_vm2  ;;  %v2750_v57 = vsel %vm11405_vm13, %v2749_v27, %v2743_v31  ;;  %vm11410_vm2 = vcmp.eq.f32.partialorder %v6015_v22, 2139095040  ;;  %v256_v60 = vadd.f32 %v2346_v24, %v255_v34  ;;  %v205_v46 = vadd.f32 %v11416_v36, %v204_v53  ;;  %v11432_v31 = vld [vmem:[#allocation24_spill] sm:$0xff] }
  0xf1   :  { %v2450_v54 = vsel %vm11404_vm0, %v11092_v13, %v2449_v20  ;;  %vm11406_vm9 = vmmov %vm11397_vm11  ;;  %v2755_v49 = vsel %vm11410_vm2, %v6576_v10, %v2750_v57  ;;  %v11411_v13 = vld [vmem:[#allocation23_spill] sm:$0xff]  ;;  %v231_v19 = vadd.f32 %v11417_v56, %v230_v17  ;;  %vm11420_vm2 = vcmp.lt.f32.partialorder %v4227_v0, 0  ;;  %v4009_v12 = vpop.eup %4008 }
  0xf2   :  { %vm6727_vm11 = vmor %vm11407_vm3, %vm11406_vm9  ;;  %v6736_v41 = vand.u32 2147483647, %v11411_v13  ;;  %v2759_v22 = vsel %vm6710_vm14, 2143289344, %v2755_v49  ;;  %vm10693_vm9 = vcmask 1040384   ;;  %vm11419_vm3 = vcmp.eq.f32.partialorder %v11258_v15, 0 }
  0xf3   :  { %vm11412_vm5 = vmmov %vm11404_vm0  ;;  %v3129_v9 = vmul.f32 %v4005_v58, %v4227_v0  ;;  %v257_v62 = vadd.f32 %v2450_v54, %v256_v60  ;;  %v206_v29 = vadd.f32 %v11429_v21, %v205_v46  ;;  %v232_v24 = vadd.f32 %v11430_v43, %v231_v19 }
  0xf4   :  { %v2554_v39 = vsel %vm11412_vm5, %v11117_v40, %v2553_v59  ;;  %vm6751_vm0 = vmand %vm11413_vm6, %vm11147_vm1  ;;  %v2761_v40 = vsel %vm6727_vm11, 1065353216, %v2759_v22  ;;  %vm2943_vm6 = vcmp.gt.f32.partialorder %v11423_v55, 1065353216  ;;  %4014 = vlog2.f32 %v6736_v41 }
  0xf5   :  { %vm11418_vm14 = vmmov %vm11412_vm5  ;;  %v2842_v18 = vsel %vm6751_vm0, 2143289344, %v4007_v30  ;;  %v234_v59 = vsel %vm10693_vm9, %v6439_v6, 0.0  ;;  %v258_v25 = vadd.f32 %v2554_v39, %v257_v62  ;;  %v6803_v45 = vand.u32 2147483647, %v11432_v31  ;;  %v4011_v54 = vpop.eup %4010 }
  0xf6   :  { %v2762_v5 = vsel %vm11418_vm14, %v11194_v38, %v2761_v40  ;;  %vm6769_vm5 = vmand %vm11420_vm2, %vm11419_vm3  ;;  %v207_v27 = vadd.f32 %v11433_v51, %v206_v29  ;;  %v233_v1 = vadd.f32 %v11434_v3, %v232_v24  ;;  %v6820_v28 = vsel %vm2939_vm8, %v4669_v16, %v4503_v2  ;;  %v4013_v30 = vpop.eup %4012 }
  0xf7   :  { %vm11424_vm4 = vmmov %vm11418_vm14  ;;  %vm11425_vm14 = vcmp.gt.f32.partialorder %v6237_v47, 1065353216  ;;  %v260_v26 = vsel %vm10693_vm9, %v2762_v5, 0.0  ;;  %4016 = vpow2.f32 %v3129_v9  ;;  %v3233_v19 = vmul.f32 %v4011_v54, %v4227_v0 }
  0xf8   :  { %v2658_v38 = vsel %vm11424_vm4, %v11150_v35, %v2657_v8  ;;  %vm11426_vm3 = vmmov %vm11420_vm2  ;;  %v11431_v35 = vld [vmem:[#allocation34_spill] sm:$0xff]  ;;  %v235_v17 = vadd.f32 %v234_v59, %v233_v1  ;;  %v11442_v8 = vld [vmem:[#allocation20_spill] sm:$0xff]  ;;  %4018 = vlog2.f32 %v6803_v45 }
  0xf9   :  { %vm6785_vm2 = vmxor %vm11426_vm3, %vm11425_vm14  ;;  %v208_v20 = vsel %vm10693_vm9, %v11431_v35, 0.0  ;;  %vm11435_vm14 = vcmp.eq.f32.partialorder %v11258_v15, 0  ;;  %v259_v34 = vadd.f32 %v2658_v38, %v258_v25  ;;  %vm3044_vm11 = vcmp.eq.f32.partialorder %v11442_v8, 0 }
  0xfa   :  { %vm2945_vm4 = vmand %vm2939_vm8, %vm11147_vm1  ;;  %v2844_v6 = vsel %vm11435_vm14, %v4529_v11, %v2842_v18  ;;  %vm11436_vm14 = vcmp.lt.f32.partialorder %v4227_v0, 0  ;;  %v209_v53 = vadd.f32 %v208_v20, %v207_v27  ;;  %v236_v40 = vrot.slane %v235_v17, 4 }
  0xfb   :  { %vm2850_vm3 = vmor %vm6769_vm5, %vm6785_vm2  ;;  %v2946_v57 = vsel %vm2945_vm4, 2143289344, %v4009_v12  ;;  %v261_v22 = vadd.f32 %v260_v26, %v259_v34  ;;  %v2846_v10 = vxor.u32 2147483648, %v2844_v6  ;;  %vm11448_vm2 = vcmp.ne.f32.partialorder %v11258_v15, %v11258_v15 }
  0xfc   :  { %v2948_v58 = vsel %vm2940_vm10, %v4529_v11, %v2946_v57  ;;  %vm6829_vm9 = vmand %vm11436_vm14, %vm2940_vm10  ;;  %vm2964_vm10 = vcmp.ne.f32.partialorder %v11267_v7, %v11267_v7  ;;  %v210_v60 = vrot.slane %v209_v53, 4  ;;  %v2851_v46 = vsel %vm2850_vm3, 2139095040, %v10838_v23 }
  0xfd   :  { %vm11439_vm4 = vmmov %vm11436_vm14  ;;  %vm3043_vm14 = vcmp.lt.f32.partialorder %v11442_v8, 0  ;;  %v2950_v56 = vxor.u32 2147483648, %v2948_v58  ;;  %v11451_v12 = vmov 0  ;;  %v237_v18 = vadd.f32 %v236_v40, %v235_v17 }
  0xfe   :  { %vm6838_vm0 = vmxor %vm11439_vm4, %vm2943_vm6  ;;  %vm3047_vm6 = vcmp.gt.f32.partialorder %v6404_v37, 1065353216  ;;  %v211_v44 = vadd.f32 %v210_v60, %v209_v53  ;;  %v6906_v38 = vsel %vm3043_vm14, %v4669_v16, %v4503_v2  ;;  %v262_v4 = vrot.slane %v261_v22, 4  ;;  %v4015_v35 = vpop.eup %4014 }
  0xff   :  { %vm2954_vm8 = vmor %vm6829_vm9, %vm6838_vm0  ;;  %vm3046_vm9 = vcmp.lt.s32.totalorder %v11442_v8, 0  ;;  %vm11445_vm0 = vcmp.lt.s32.totalorder %v11267_v7, 0  ;;  %4020 = vpow2.f32 %v3233_v19  ;;  %v238_v54 = vrot.slane %v237_v18, 2 }
 0x100   :  { %vm6857_vm4 = vmand %vm2838_vm15, %vm11349_vm7  ;;  %v2955_v9 = vsel %vm2954_vm8, 2139095040, %v10838_v23  ;;  %v212_v3 = vrot.slane %v211_v44, 2  ;;  %vm11468_vm5 = vcmp.eq.f32.partialorder %v11267_v7, 1065353216  ;;  %v3337_v53 = vmul.f32 %v4015_v35, %v4227_v0 }
 0x101   :  { %vm6873_vm15 = vmand %vm11445_vm0, %vm11349_vm7  ;;  %v2847_v21 = vsel %vm6857_vm4, %v2846_v10, %v2844_v6  ;;  %vm11456_vm4 = vcmp.eq.f32.partialorder %v11267_v7, 3212836864  ;;  %v263_v6 = vadd.f32 %v262_v4, %v261_v22  ;;  %v4017_v57 = vpop.eup %4016  ;;  %v11472_v17 = vmov 0 }
 0x102   :  { %vm6885_vm3 = vmor %vm11448_vm2, %vm11274_vm12  ;;  %v2951_v20 = vsel %vm6873_vm15, %v2950_v56, %v2948_v58  ;;  %v2957_v59 = vsel %vm11456_vm4, 1065353216, %v2955_v9  ;;  %v4019_v39 = vpop.eup %4018  ;;  %v213_v40 = vadd.f32 %v212_v3, %v211_v44  ;;  %v239_v56 = vadd.f32 %v238_v54, %v237_v18 }
 0x103   :  { %vm6894_vm8 = vmor %vm2964_vm10, %vm11274_vm12  ;;  %vm11453_vm10 = vcmp.eq.f32.partialorder %v11258_v15, 3212836864  ;;  %4022 = vpow2.f32 %v3337_v53  ;;  %v3441_v44 = vmul.f32 %v4019_v39, %v4227_v0 }
 0x104   :  { %v11452_v12 = vsel %vm6894_vm8, 4294967295, %v11451_v12  ;;  %vm3049_vm0 = vmand %vm3043_vm14, %vm11147_vm1  ;;  %v2853_v29 = vsel %vm11453_vm10, 1065353216, %v2851_v46  ;;  %vm11461_vm14 = vcmp.eq.f32.partialorder %v4427_v32, 2139095040 }
 0x105   :  { %v3050_v43 = vsel %vm3049_vm0, 2143289344, %v4013_v30  ;;  %vm6918_vm13 = vmand %vm3046_vm9, %vm11349_vm7  ;;  %vm11457_vm9 = vcmp.lt.f32.partialorder %v4227_v0, 0  ;;  %v2854_v1 = vsel %vm11461_vm14, %v2853_v29, %v2847_v21  ;;  %v214_v21 = vrot.slane %v213_v40, 1 }
 0x106   :  { %v3052_v25 = vsel %vm3044_vm11, %v4529_v11, %v3050_v43  ;;  %vm6935_vm0 = vmand %vm11457_vm9, %vm3044_vm11  ;;  %vm11462_vm11 = vcmp.eq.f32.partialorder %v4227_v0, 0  ;;  %4024 = vpow2.f32 %v3441_v44 }
 0x107   :  { %v3054_v27 = vxor.u32 2147483648, %v3052_v25  ;;  %vm11460_vm15 = vmmov %vm11457_vm9  ;;  %vm11463_vm9 = vcmp.eq.f32.partialorder %v11258_v15, 1065353216 }
 0x108   :  { %vm3057_vm4 = vmxor %vm11460_vm15, %vm3047_vm6  ;;  %vm3150_vm6 = vcmp.lt.s32.totalorder %v11353_v33, 0 }
 0x109   :  { %vm6951_vm2 = vmor %vm11463_vm9, %vm11462_vm11  ;;  %v3055_v10 = vsel %vm6918_vm13, %v3054_v27, %v3052_v25  ;;  %v4021_v29 = vpop.eup %4020 }
 0x10a   :  { %vm3058_vm8 = vmor %vm6935_vm0, %vm3057_vm4  ;;  %vm11471_vm4 = vcmp.ne.f32.partialorder %v11442_v8, %v11442_v8 }
 0x10b   :  { %vm11466_vm15 = vmmov %vm11461_vm14  ;;  %v3059_v49 = vsel %vm3058_vm8, 2139095040, %v10838_v23  ;;  %vm11474_vm8 = vcmp.lt.f32.partialorder %v11353_v33, 0 }
 0x10c   :  { %v2958_v34 = vsel %vm11466_vm15, %v2957_v59, %v2951_v20  ;;  %vm11467_vm14 = vmmov %vm11462_vm11  ;;  %v3170_v30 = vsel %vm11474_vm8, %v4669_v16, %v4503_v2  ;;  %vm11479_vm15 = vcmp.eq.f32.partialorder %v4227_v0, 0 }
 0x10d   :  { %vm6964_vm10 = vmor %vm11468_vm5, %vm11467_vm14  ;;  %vm11475_vm14 = vcmp.eq.f32.partialorder %v6237_v47, 2139095040  ;;  %v11481_v47 = vmov 0 }
 0x10e   :  { %vm6976_vm11 = vmor %vm11471_vm4, %vm11274_vm12  ;;  %v2859_v22 = vsel %vm11475_vm14, %v6672_v50, %v2854_v1  ;;  %vm11476_vm4 = vcmp.eq.f32.partialorder %v11442_v8, 3212836864  ;;  %vm11480_vm14 = vcmp.eq.f32.partialorder %v11442_v8, 1065353216  ;;  %v215_v1 = vadd.f32 %v214_v21, %v213_v40 }
 0x10f   :  { %v11473_v17 = vsel %vm6976_vm11, 4294967295, %v11472_v17  ;;  %v3061_v60 = vsel %vm11476_vm4, 1065353216, %v3059_v49  ;;  %vm11477_vm5 = vmmov %vm11474_vm8  ;;  %vm11478_vm8 = vcmp.eq.f32.partialorder %v11423_v55, 2139095040  ;;  %v264_v55 = vrot.slane %v263_v6, 2 }
 0x110   :  { %vm3153_vm9 = vmand %vm11477_vm5, %vm11147_vm1  ;;  %v2963_v36 = vsel %vm11478_vm8, %v6820_v28, %v2958_v34  ;;  %vm11485_vm5 = vcmp.eq.f32.partialorder %v11353_v33, 0  ;;  %vm11487_vm4 = vcmp.lt.f32.partialorder %v4227_v0, 0  ;;  %v2863_v18 = vsel %vm6885_vm3, 2143289344, %v2859_v22 }
 0x111   :  { %vm7006_vm0 = vmor %vm11480_vm14, %vm11479_vm15  ;;  %v3154_v50 = vsel %vm3153_vm9, 2143289344, %v4017_v57  ;;  %vm3251_vm9 = vcmp.lt.f32.partialorder %v11384_v61, 0  ;;  %vm11490_vm14 = vcmp.eq.f32.partialorder %v4427_v32, 2139095040  ;;  %vm11494_vm3 = vcmp.ne.f32.partialorder %v11353_v33, %v11353_v33 }
 0x112   :  { %v11482_v47 = vsel %vm7006_vm0, 4294967295, %v11481_v47  ;;  %vm7014_vm13 = vmand %vm3150_vm6, %vm11349_vm7  ;;  %v3156_v28 = vsel %vm11485_vm5, %v4529_v11, %v3154_v50  ;;  %vm3252_vm6 = vcmp.eq.f32.partialorder %v11384_v61, 0  ;;  %v3062_v5 = vsel %vm11490_vm14, %v3061_v60, %v3055_v10 }
 0x113   :  { %vm11486_vm15 = vmmov %vm11485_vm5  ;;  %v3158_v9 = vxor.u32 2147483648, %v3156_v28  ;;  %vm11491_vm0 = vcmp.gt.f32.partialorder %v6548_v14, 1065353216  ;;  %vm3254_vm14 = vcmp.lt.s32.totalorder %v11384_v61, 0  ;;  %v265_v35 = vadd.f32 %v264_v55, %v263_v6 }
 0x114   :  { %vm7025_vm8 = vmand %vm11487_vm4, %vm11486_vm15  ;;  %vm11493_vm15 = vnez %v11452_v12  ;;  %v240_v12 = vrot.slane %v239_v56, 1  ;;  %vm11503_vm7 = vcmp.eq.f32.partialorder %v4427_v32, 2139095040  ;;  %v3274_v53 = vsel %vm3251_vm9, %v4669_v16, %v4503_v2 }
 0x115   :  { %vm11492_vm5 = vmmov %vm11487_vm4  ;;  %v2967_v4 = vsel %vm11493_vm15, 2143289344, %v2963_v36  ;;  %v3159_v43 = vsel %vm7014_vm13, %v3158_v9, %v3156_v28  ;;  %vm11499_vm13 = vcmp.eq.f32.partialorder %v4227_v0, 0  ;;  %v266_v34 = vrot.slane %v265_v35, 1 }
 0x116   :  { %vm3161_vm11 = vmxor %vm11492_vm5, %vm11491_vm0  ;;  %vm11500_vm5 = vcmp.eq.f32.partialorder %v11353_v33, 1065353216  ;;  %v241_v57 = vadd.f32 %v240_v12, %v239_v56  ;;  %v7142_v10 = vmul.f32 0.020408163, %v215_v1 }
 0x117   :  { %vm3162_vm4 = vmor %vm7025_vm8, %vm3161_vm11  ;;  %vm11497_vm11 = vcmp.eq.f32.partialorder %v6404_v37, 2139095040  ;;  %vm11498_vm8 = vcmp.eq.f32.partialorder %v11353_v33, 3212836864  ;;  %v2865_v37 = vsel %vm6951_vm2, 1065353216, %v2863_v18  ;;  %vm11508_vm2 = vcmp.lt.f32.partialorder %v4227_v0, 0 }
 0x118   :  { %v3163_v24 = vsel %vm3162_vm4, 2139095040, %v10838_v23  ;;  %vm7054_vm0 = vmor %vm11494_vm3, %vm11274_vm12  ;;  %v3067_v20 = vsel %vm11497_vm11, %v6906_v38, %v3062_v5  ;;  %vm3255_vm4 = vcmp.gt.f32.partialorder %v6645_v42, 1065353216  ;;  %v2969_v38 = vsel %vm6964_vm10, 1065353216, %v2967_v4 }
 0x119   :  { %v3165_v59 = vsel %vm11498_vm8, 1065353216, %v3163_v24  ;;  %vm7067_vm15 = vmor %vm11500_vm5, %vm11499_vm13  ;;  %vm3276_vm13 = vcmp.ne.f32.partialorder %v11384_v61, %v11384_v61  ;;  %vm11507_vm3 = vnez %v11473_v17  ;;  %v7156_v50 = vmul.f32 0.020408163, %v241_v57 }
 0x11a   :  { %v3166_v51 = vsel %vm11503_vm7, %v3165_v59, %v3159_v43  ;;  %vm3257_vm11 = vmand %vm3251_vm9, %vm11147_vm1  ;;  %vm11504_vm7 = vnez %v10773_v52  ;;  %v3071_v54 = vsel %vm11507_vm3, 2143289344, %v3067_v20  ;;  %vm11515_vm9 = vnez %v11482_v47 }
 0x11b   :  { %v3258_v27 = vsel %vm3257_vm11, 2143289344, %v4021_v29  ;;  %vm7090_vm5 = vmand %vm3254_vm14, %vm11504_vm7  ;;  %vm11511_vm14 = vcmp.eq.f32.partialorder %v6548_v14, 2139095040  ;;  %v3073_v39 = vsel %vm11515_vm9, 1065353216, %v3071_v54  ;;  %v267_v47 = vadd.f32 %v266_v34, %v265_v35 }
 0x11c   :  { %v3260_v26 = vsel %vm3252_vm6, %v4529_v11, %v3258_v27  ;;  %vm7103_vm10 = vmand %vm11508_vm2, %vm3252_vm6  ;;  %v3171_v58 = vsel %vm11511_vm14, %v3170_v30, %v3166_v51  ;;  %vm3355_vm6 = vcmp.lt.f32.partialorder %v11411_v13, 0  ;;  %v4023_v30 = vpop.eup %4022  ;;  %v7196_v44 = vand.u32 2147483647, %v7142_v10 }
 0x11d   :  { %v3262_v49 = vxor.u32 2147483648, %v3260_v26  ;;  %vm11512_vm3 = vmmov %vm11508_vm2  ;;  %vm11513_vm2 = vcmp.eq.f32.partialorder %v4227_v0, 1065353216  ;;  %v3175_v60 = vsel %vm7054_vm0, 2143289344, %v3171_v58  ;;  %vm3359_vm0 = vcmp.gt.f32.partialorder %v6736_v41, 1065353216  ;;  %v4025_v18 = vpop.eup %4024 }
 0x11e   :  { %vm3265_vm11 = vmxor %vm11512_vm3, %vm3255_vm4  ;;  %v2866_v17 = vsel %vm11513_vm2, %v11258_v15, %v2865_v37  ;;  %vm3356_vm4 = vcmp.eq.f32.partialorder %v11411_v13, 0  ;;  %vm3358_vm3 = vcmp.lt.s32.totalorder %v11411_v13, 0  ;;  %v3177_v9 = vsel %vm7067_vm15, 1065353216, %v3175_v60 }
 0x11f   :  { %vm11514_vm14 = vmmov %vm11513_vm2  ;;  %v3263_v22 = vsel %vm7090_vm5, %v3262_v49, %v3260_v26  ;;  %vm11519_vm5 = vcmp.eq.f32.partialorder %v4227_v0, 0  ;;  %v7204_v29 = vmul.f32 0.020408163, %v267_v47  ;;  %v7207_v43 = vand.u32 2147483647, %v7156_v50 }
 0x120   :  { %v2970_v14 = vsel %vm11514_vm14, %v11267_v7, %v2969_v38  ;;  %vm3266_vm8 = vmor %vm7103_vm10, %vm3265_vm11  ;;  %vm11518_vm10 = vcmp.eq.f32.partialorder %v11384_v61, 3212836864  ;;  %vm3357_vm14 = vcmp.eq.f32.partialorder %v11411_v13, 1065353216  ;;  %v3378_v24 = vsel %vm3355_vm6, %v4669_v16, %v4503_v2 }
 0x121   :  { %v3267_v15 = vsel %vm3266_vm8, 2139095040, %v10838_v23  ;;  %vm7138_vm2 = vmor %vm3276_vm13, %vm11274_vm12  ;;  %vm11520_vm8 = vcmp.eq.f32.partialorder %v11384_v61, 1065353216  ;;  %vm11523_vm13 = vcmp.eq.f32.partialorder %v4427_v32, 2139095040  ;;  %v281_v56 = vadd.f32 %v2970_v14, %v2866_v17 }
 0x122   :  { %v3269_v40 = vsel %vm11518_vm10, 1065353216, %v3267_v15  ;;  %vm7152_vm11 = vmor %vm11520_vm8, %vm11519_vm5  ;;  %vm11524_vm10 = vcmp.eq.f32.partialorder %v4227_v0, 1065353216  ;;  %vm11525_vm5 = vcmp.eq.f32.partialorder %v6645_v42, 2139095040  ;;  %4026 = vlog2.f32 %v7196_v44 }
 0x123   :  { %v3270_v46 = vsel %vm11523_vm13, %v3269_v40, %v3263_v22  ;;  %vm3361_vm9 = vmand %vm3355_vm6, %vm11147_vm1  ;;  %v3074_v55 = vsel %vm11524_vm10, %v11442_v8, %v3073_v39  ;;  %vm3372_vm13 = vcmp.eq.f32.partialorder %v11411_v13, 3212836864  ;;  %vm3462_vm6 = vcmp.lt.s32.totalorder %v11432_v31, 0 }
 0x124   :  { %v3275_v28 = vsel %vm11525_vm5, %v3274_v53, %v3270_v46  ;;  %v3362_v19 = vsel %vm3361_vm9, 2143289344, %v4023_v30  ;;  %vm7175_vm8 = vmand %vm3358_vm3, %vm11504_vm7  ;;  %vm11528_vm9 = vcmp.lt.f32.partialorder %v4227_v0, 0  ;;  %vm3380_vm3 = vcmp.ne.f32.partialorder %v11411_v13, %v11411_v13 }
 0x125   :  { %v3364_v8 = vsel %vm3356_vm4, %v4529_v11, %v3362_v19  ;;  %vm7189_vm10 = vmand %vm11528_vm9, %vm3356_vm4  ;;  %v3279_v4 = vsel %vm7138_vm2, 2143289344, %v3275_v28  ;;  %vm3360_vm4 = vcmp.eq.f32.partialorder %v6736_v41, 2139095040  ;;  %vm3459_vm2 = vcmp.lt.f32.partialorder %v11432_v31, 0 }
 0x126   :  { %v3366_v21 = vxor.u32 2147483648, %v3364_v8  ;;  %vm11531_vm15 = vmmov %vm11528_vm9  ;;  %v282_v62 = vadd.f32 %v3074_v55, %v281_v56  ;;  %v3281_v25 = vsel %vm7152_vm11, 1065353216, %v3279_v4  ;;  %vm3463_vm11 = vcmp.gt.f32.partialorder %v6803_v45, 1065353216 }
 0x127   :  { %vm3369_vm5 = vmxor %vm11531_vm15, %vm3359_vm0  ;;  %vm11532_vm0 = vcmp.eq.f32.partialorder %v4227_v0, 1065353216  ;;  %4028 = vlog2.f32 %v7207_v43  ;;  %v7256_v38 = vand.u32 2147483647, %v7204_v29  ;;  %v3482_v53 = vsel %vm3459_vm2, %v4669_v16, %v4503_v2 }
 0x128   :  { %vm3370_vm9 = vmor %vm7189_vm10, %vm3369_vm5  ;;  %v3178_v12 = vsel %vm11532_vm0, %v11353_v33, %v3177_v9  ;;  %v3367_v35 = vsel %vm7175_vm8, %v3366_v21, %v3364_v8  ;;  %vm11535_vm8 = vcmp.eq.f32.partialorder %v4227_v0, 0  ;;  %vm11538_vm5 = vcmp.eq.f32.partialorder %v4427_v32, 2139095040 }
 0x129   :  { %v3371_v20 = vsel %vm3370_vm9, 2139095040, %v10838_v23  ;;  %vm7228_vm10 = vmor %vm3380_vm3, %vm11274_vm12  ;;  %vm3460_vm3 = vcmp.eq.f32.partialorder %v11432_v31, 0  ;;  %v283_v54 = vadd.f32 %v3178_v12, %v282_v62  ;;  %4030 = vlog2.f32 %v7256_v38 }
 0x12a   :  { %v3373_v33 = vsel %vm3372_vm13, 1065353216, %v3371_v20  ;;  %vm7241_vm15 = vmor %vm3357_vm14, %vm11535_vm8  ;;  %v11551_v21 = vmov 0  ;;  %v11558_v51 = vmov 0 }
 0x12b   :  { %v3374_v37 = vsel %vm11538_vm5, %v3373_v33, %v3367_v35  ;;  %vm3465_vm13 = vmand %vm3459_vm2, %vm11147_vm1  ;;  %vm3484_vm5 = vcmp.ne.f32.partialorder %v11432_v31, %v11432_v31 }
 0x12c   :  { %v3379_v27 = vsel %vm3360_vm4, %v3378_v24, %v3374_v37  ;;  %v3466_v3 = vsel %vm3465_vm13, 2143289344, %v4025_v18  ;;  %vm7262_vm14 = vmand %vm3462_vm6, %vm11504_vm7  ;;  %vm11542_vm4 = vcmp.lt.f32.partialorder %v4227_v0, 0  ;;  %vm3461_vm13 = vcmp.eq.f32.partialorder %v11432_v31, 1065353216  ;;  %v4027_v15 = vpop.eup %4026 }
 0x12d   :  { %vm11541_vm9 = vmmov %vm11532_vm0  ;;  %v3383_v6 = vsel %vm7228_vm10, 2143289344, %v3379_v27  ;;  %v3468_v41 = vsel %vm3460_vm3, %v4529_v11, %v3466_v3  ;;  %vm3476_vm10 = vcmp.eq.f32.partialorder %v11432_v31, 3212836864 }
 0x12e   :  { %v3282_v26 = vsel %vm11541_vm9, %v11384_v61, %v3281_v25  ;;  %vm3472_vm0 = vmand %vm11542_vm4, %vm3460_vm3  ;;  %v3385_v57 = vsel %vm7241_vm15, 1065353216, %v3383_v6  ;;  %v3470_v34 = vxor.u32 2147483648, %v3468_v41  ;;  %v7287_v61 = vstv %s3492_s10 }
 0x12f   :  { %vm11543_vm6 = vmmov %vm11542_vm4  ;;  %11544 = vst [vmem:[#allocation11_spill] sm:$0xff] %v7287_v61  ;;  %vm3464_vm3 = vcmp.eq.f32.partialorder %v6803_v45, 2139095040  ;;  %v284_v17 = vadd.f32 %v3282_v26, %v283_v54  ;;  %vm11545_vm15 = vcmp.eq.f32.partialorder %v4227_v0, 1065353216  ;;  %vm11546_vm4 = vcmp.eq.f32.partialorder %v4427_v32, 2139095040 }
 0x130   :  { %vm3473_vm8 = vmxor %vm11543_vm6, %vm3463_vm11  ;;  %v3471_v58 = vsel %vm7262_vm14, %v3470_v34, %v3468_v41  ;;  %v3386_v14 = vsel %vm11545_vm15, %v11411_v13, %v3385_v57  ;;  %vm11547_vm14 = vcmp.eq.f32.partialorder %v4227_v0, 0  ;;  %v7309_v39 = vand.u32 2147483647, %v7287_v61 }
 0x131   :  { %vm3474_vm9 = vmor %vm3472_vm0, %vm3473_vm8  ;;  %v285_v60 = vadd.f32 %v3386_v14, %v284_v17  ;;  %v4029_v40 = vpop.eup %4028  ;;  %vm11550_vm6 = vcmask 1040384   ;;  %v3547_v56 = vmul.f32 %v4027_v15, %v7287_v61  ;;  %v3502_v28 = vtrunc.f32 %v7287_v61 }
 0x132   :  { %v3475_v49 = vsel %vm3474_vm9, 2139095040, %v10838_v23  ;;  %vm3486_vm11 = vmor %vm3484_vm5, %vm11274_vm12  ;;  %11548 = vst [vmem:[#allocation8_spill] sm:$0xff] %v7309_v39  ;;  %v3506_v47 = vtrunc.f32 %v7309_v39  ;;  %v3651_v19 = vmul.f32 %v4029_v40, %v7287_v61  ;;  %vm10695_vm8 = vcmp.eq.f32.partialorder %v7309_v39, 2139095040 }
 0x133   :  { %v3477_v30 = vsel %vm3476_vm10, 1065353216, %v3475_v49  ;;  %vm3488_vm0 = vmor %vm3461_vm13, %vm11547_vm14  ;;  %v4031_v5 = vpop.eup %4030  ;;  %4032 = vpow2.f32 %v3547_v56  ;;  %vm3503_vm10 = vcmp.ne.f32.partialorder %v7287_v61, %v3502_v28  ;;  %vm10696_vm9 = vcmp.lt.f32.partialorder %v7142_v10, 0 }
 0x134   :  { %v3478_v45 = vsel %vm11546_vm4, %v3477_v30, %v3471_v58  ;;  %vm11549_vm2 = vmmov %vm11545_vm15  ;;  %v3507_v8 = vcvt.f32.s32 %v3506_v47  ;;  %4034 = vpow2.f32 %v3651_v19  ;;  %vm10697_vm15 = vcmp.eq.f32.partialorder %v7142_v10, 0 }
 0x135   :  { %v3483_v22 = vsel %vm3464_vm3, %v3482_v53, %v3478_v45  ;;  %vm7324_vm5 = vmor %vm3503_vm10, %vm10695_vm8  ;;  %vm10698_vm14 = vcmp.lt.f32.partialorder %v7156_v50, 0  ;;  %vm3673_vm8 = vcmp.gt.f32.partialorder %v7207_v43, 1065353216  ;;  %v11569_v49 = vmov 2139095040  }
 0x136   :  { %v3487_v7 = vsel %vm3486_vm11, 2143289344, %v3483_v22  ;;  %v3508_v4 = vand.u32 1, %v3507_v8  ;;  %v11552_v21 = vsel %vm7324_vm5, 4294967295, %v11551_v21  ;;  %vm3510_vm3 = vmneg %vm7324_vm5  ;;  %vm3505_vm11 = vcmp.lt.f32.partialorder %v7309_v39, 1266679808 }
 0x137   :  { %v3489_v36 = vsel %vm3488_vm0, 1065353216, %v3487_v7  ;;  %11553 = vst [vmem:[#allocation12_spill] sm:$0xff] %v11552_v21  ;;  %vm10699_vm0 = vcmp.lt.f32.partialorder %v7287_v61, 0  ;;  %vm3672_vm12 = vcmp.lt.s32.totalorder %v7156_v50, 0  ;;  %vm7436_vm1 = vcmp.ne.f32.partialorder %v7287_v61, %v7287_v61 }
 0x138   :  { %v3490_v13 = vsel %vm11549_vm2, %v11432_v31, %v3489_v36  ;;  %v3755_v31 = vmul.f32 %v4031_v5, %v7287_v61  ;;  %vm3509_vm13 = vcmp.eq.s32.totalorder %v3508_v4, 1  ;;  %vm3569_vm2 = vcmp.gt.f32.partialorder %v7196_v44, 1065353216  ;;  %vm7350_vm10 = vmand %vm10699_vm0, %vm10697_vm15 }
 0x139   :  { %v286_v46 = vsel %vm11550_vm6, %v3490_v13, 0.0  ;;  %vm3511_vm4 = vmand %vm3509_vm13, %vm3510_vm3  ;;  %vm3670_vm13 = vcmp.eq.f32.partialorder %v7156_v50, 0  ;;  %v7386_v6 = vsel %vm10699_vm0, 2139095040, %v10838_v23  ;;  %v11578_v7 = vmov 0 }
 0x13a   :  { %v287_v55 = vadd.f32 %v286_v46, %v285_v60  ;;  %4036 = vpow2.f32 %v3755_v31  ;;  %vm7342_vm6 = vmand %vm10696_vm9, %vm7324_vm5  ;;  %11565 = vst [vmem:[#allocation29_spill] sm:$0xff] %v7386_v6  ;;  %v11579_v7 = vsel %vm7436_vm1, 4294967295, %v11578_v7  ;;  %v20_v60 = vld [vmem:[%s10629_s1] sm:$0xff] }
 0x13b   :  { %vm7355_vm3 = vmand %vm3505_vm11, %vm3511_vm4  ;;  %vm10700_vm11 = vcmp.lt.f32.partialorder %v7204_v29, 0  ;;  %11580 = vst [vmem:[#allocation9_spill] sm:$0xff] %v11579_v7  ;;  %v7473_v28 = vmax.f32 %v20_v60, 1e-06 }
 0x13c   :  { %v288_v9 = vrot.slane %v287_v55, 4  ;;  %v11559_v51 = vsel %vm7355_vm3, 4294967295, %v11558_v51  ;;  %vm3675_vm9 = vmand %vm10698_vm14, %vm7324_vm5 }
 0x13d   :  { %v4033_v35 = vpop.eup %4032  ;;  %11560 = vst [vmem:[#allocation13_spill] sm:$0xff] %v11559_v51  ;;  %vm7371_vm15 = vmxor %vm10699_vm0, %vm3569_vm2 }
 0x13e   :  { %v289_v42 = vadd.f32 %v288_v9, %v287_v55  ;;  %v4035_v20 = vpop.eup %4034  ;;  %v3572_v27 = vsel %vm7342_vm6, 2143289344, %v4033_v35  ;;  %vm7378_vm4 = vmand %vm10699_vm0, %vm3670_vm13  ;;  %vm3774_vm6 = vcmp.eq.f32.partialorder %v7204_v29, 0  ;;  %v22_v55 = vld [vmem:[%s10629_s1 + $0x10] sm:$0xff]  ;;  %v7507_v35 = vand.u32 2147483647, %v7473_v28 }
 0x13f   :  { %v3676_v1 = vsel %vm3675_vm9, 2143289344, %v4035_v20  ;;  %vm7390_vm2 = vmxor %vm10699_vm0, %vm3673_vm8  ;;  %vm11568_vm9 = vcmp.eq.f32.partialorder %v7142_v10, 0  ;;  %vm3777_vm0 = vcmp.gt.f32.partialorder %v7256_v38, 1065353216 }
 0x140   :  { %v290_v18 = vrot.slane %v289_v42, 2  ;;  %v3574_v57 = vsel %vm11568_vm9, %v7386_v6, %v3572_v27  ;;  %v3678_v34 = vsel %vm3670_vm13, %v7386_v6, %v3676_v1  ;;  %vm3779_vm14 = vmand %vm10700_vm11, %vm7324_vm5  ;;  %vm11570_vm9 = vcmp.lt.f32.partialorder %v7287_v61, 0 }
 0x141   :  { %v7411_v53 = vsel %vm11570_vm9, 0, %v11569_v49  ;;  %vm3568_vm13 = vcmp.lt.s32.totalorder %v7142_v10, 0  ;;  %v3576_v17 = vxor.u32 2147483648, %v3574_v57  ;;  %v3680_v14 = vxor.u32 2147483648, %v3678_v34  ;;  %vm11572_vm8 = vmmov %vm11570_vm9  ;;  %v36_v49 = vld [vmem:[%s10629_s1 + $0x80] sm:$0xff] }
 0x142   :  { %v291_v24 = vadd.f32 %v290_v18, %v289_v42  ;;  %11571 = vst [vmem:[#allocation33_spill] sm:$0xff] %v7411_v53  ;;  %vm7421_vm7 = vmand %vm11572_vm8, %vm3774_vm6  ;;  %v3534_v15 = vxor.u32 2147483648, %v7411_v53  ;;  %vm3686_vm11 = vcmp.eq.f32.partialorder %v7156_v50, 3212836864  ;;  %vm3776_vm5 = vcmp.lt.s32.totalorder %v7204_v29, 0 }
 0x144   :  { %v292_v62 = vrot.slane %v291_v24, 1  ;;  %v4037_v54 = vpop.eup %4036  ;;  %v7478_v19 = vsel %vm7355_vm3, %v3534_v15, %v7411_v53 }
 0x145   :  { %v3780_v58 = vsel %vm3779_vm14, 2143289344, %v4037_v54  ;;  %vm11575_vm14 = vmmov %vm11572_vm8  ;;  %11583 = vst [vmem:[#allocation10_spill] sm:$0xff] %v7478_v19 }
 0x146   :  { %v293_v12 = vadd.f32 %v292_v62, %v291_v24  ;;  %v3782_v45 = vsel %vm3774_vm6, %v7386_v6, %v3780_v58  ;;  %vm7428_vm9 = vmxor %vm11575_vm14, %vm3777_vm0  ;;  %vm3582_vm6 = vcmp.eq.f32.partialorder %v7142_v10, 3212836864  ;;  %v7494_v24 = vmax.f32 %v22_v55, 1e-06 }
 0x147   :  { %vm3575_vm8 = vmand %vm3568_vm13, %vm7355_vm3  ;;  %v3784_v46 = vxor.u32 2147483648, %v3782_v45 }
 0x148   :  { %v7335_v59 = vmul.f32 0.020408163, %v293_v12  ;;  %vm11581_vm0 = vmor %vm7350_vm10, %vm7371_vm15  ;;  %v3577_v13 = vsel %vm3575_vm8, %v3576_v17, %v3574_v57  ;;  %vm3590_vm10 = vcmp.ne.f32.partialorder %v7142_v10, %v7142_v10  ;;  %vm3790_vm8 = vcmp.eq.f32.partialorder %v7204_v29, 3212836864  ;;  %v26_v17 = vld [vmem:[%s10629_s1 + $0x30] sm:$0xff] }
 0x149   :  { %v3581_v40 = vsel %vm11581_vm0, 2139095040, %v10838_v23  ;;  %vm3679_vm14 = vmand %vm3672_vm12, %vm7355_vm3  ;;  %vm3570_vm12 = vcmp.eq.f32.partialorder %v7196_v44, 2139095040  ;;  %vm3567_vm0 = vcmp.eq.f32.partialorder %v7142_v10, 1065353216  ;;  %v24_v44 = vld [vmem:[%s10629_s1 + $0x20] sm:$0xff]  ;;  %v7546_v54 = vand.u32 2147483647, %v7494_v24 }
 0x14a   :  { %v7365_v37 = vand.u32 2147483647, %v7335_v59  ;;  %vm11582_vm13 = vmor %vm7378_vm4, %vm7390_vm2  ;;  %v3681_v47 = vsel %vm3679_vm14, %v3680_v14, %v3678_v34  ;;  %vm3674_vm4 = vcmp.eq.f32.partialorder %v7207_v43, 2139095040  ;;  %v3583_v5 = vsel %vm3582_vm6, 1065353216, %v3581_v40  ;;  %v30_v43 = vld [vmem:[%s10629_s1 + $0x50] sm:$0xff] }
 0x14b   :  { %v3685_v36 = vsel %vm11582_vm13, 2139095040, %v10838_v23  ;;  %vm3788_vm15 = vmor %vm7421_vm7, %vm7428_vm9  ;;  %vm11584_vm7 = vcmp.eq.f32.partialorder %v7309_v39, 2139095040  ;;  %vm11587_vm6 = vcmp.lt.f32.partialorder %v7156_v50, 0  ;;  %vm3878_vm13 = vcmp.eq.f32.partialorder %v7335_v59, 0 }
 0x14c   :  { %4038 = vlog2.f32 %v7365_v37  ;;  %v3687_v9 = vsel %vm3686_vm11, 1065353216, %v3685_v36  ;;  %v3584_v42 = vsel %vm11584_vm7, %v3583_v5, %v3577_v13  ;;  %vm11585_vm2 = vmmov %vm11584_vm7  ;;  %v3789_v18 = vsel %vm3788_vm15, 2139095040, %v10838_v23 }
 0x14d   :  { %v3688_v31 = vsel %vm11585_vm2, %v3687_v9, %v3681_v47  ;;  %vm3783_vm9 = vmand %vm3776_vm5, %vm7355_vm3  ;;  %vm11586_vm11 = vcmp.lt.f32.partialorder %v7142_v10, 0  ;;  %v3692_v12 = vsel %vm11587_vm6, %v7478_v19, %v7411_v53  ;;  %vm3694_vm5 = vcmp.ne.f32.partialorder %v7156_v50, %v7156_v50 }
 0x14e   :  { %v3785_v4 = vsel %vm3783_vm9, %v3784_v46, %v3782_v45  ;;  %v3588_v62 = vsel %vm11586_vm11, %v7478_v19, %v7411_v53  ;;  %vm7516_vm14 = vmor %vm3590_vm10, %vm7436_vm1  ;;  %v3693_v33 = vsel %vm3674_vm4, %v3692_v12, %v3688_v31  ;;  %v3791_v27 = vsel %vm3790_vm8, 1065353216, %v3789_v18 }
 0x14f   :  { %v3589_v20 = vsel %vm3570_vm12, %v3588_v62, %v3584_v42  ;;  %vm11590_vm15 = vcmp.eq.f32.partialorder %v7287_v61, 0  ;;  %vm3778_vm10 = vcmp.eq.f32.partialorder %v7256_v38, 2139095040  ;;  %vm11593_vm7 = vmmov %vm11585_vm2  ;;  %vm3881_vm4 = vcmp.gt.f32.partialorder %v7365_v37, 1065353216 }
 0x150   :  { %vm7528_vm12 = vmor %vm3567_vm0, %vm11590_vm15  ;;  %v3792_v1 = vsel %vm11593_vm7, %v3791_v27, %v3785_v4  ;;  %vm3671_vm2 = vcmp.eq.f32.partialorder %v7156_v50, 1065353216  ;;  %vm3798_vm8 = vcmp.ne.f32.partialorder %v7204_v29, %v7204_v29  ;;  %v3593_v38 = vsel %vm7516_vm14, 2143289344, %v3589_v20 }
 0x151   :  { %vm7539_vm9 = vmor %vm3694_vm5, %vm7436_vm1  ;;  %vm11596_vm0 = vcmp.lt.f32.partialorder %v7204_v29, 0  ;;  %vm11597_vm11 = vcmp.lt.f32.partialorder %v7287_v61, 0  ;;  %v7564_v34 = vmax.f32 %v24_v44, 1e-06  ;;  %v3595_v14 = vsel %vm7528_vm12, 1065353216, %v3593_v38 }
 0x152   :  { %v3697_v26 = vsel %vm7539_vm9, 2143289344, %v3693_v33  ;;  %v3796_v41 = vsel %vm11596_vm0, %v7478_v19, %v7411_v53  ;;  %vm7560_vm6 = vmand %vm11597_vm11, %vm3878_vm13  ;;  %vm3877_vm9 = vcmp.lt.f32.partialorder %v7335_v59, 0  ;;  %v7606_v40 = vmax.f32 %v26_v17, 1e-06  ;;  %v38_v17 = vld [vmem:[%s10629_s1 + $0x90] sm:$0xff] }
 0x153   :  { %v3797_v58 = vsel %vm3778_vm10, %v3796_v41, %v3792_v1  ;;  %vm11600_vm5 = vmmov %vm11597_vm11  ;;  %vm3775_vm10 = vcmp.eq.f32.partialorder %v7204_v29, 1065353216  ;;  %v7599_v15 = vand.u32 2147483647, %v7564_v34  ;;  %vm10708_vm11 = vcmask 1041409  }
 0x154   :  { %vm7568_vm14 = vmxor %vm11600_vm5, %vm3881_vm4  ;;  %v7645_v62 = vand.u32 2147483647, %v7606_v40  ;;  %v7667_v41 = vmax.f32 %v30_v43, 1e-06  ;;  %v66_v43 = vld [vmem:[%s10629_s1 + $0x170] sm:$0xff] }
 0x155   :  { %vm3698_vm7 = vmor %vm3671_vm2, %vm11590_vm15  ;;  %vm10709_vm2 = vcmp.eq.f32.partialorder %v7287_v61, 1065353216 }
 0x156   :  { %v4039_v56 = vpop.eup %4038  ;;  %v3699_v30 = vsel %vm3698_vm7, 1065353216, %v3697_v26  ;;  %vm7587_vm4 = vmor %vm3798_vm8, %vm7436_vm1  ;;  %vm11605_vm8 = vnez %v11552_v21  ;;  %v3596_v36 = vsel %vm10709_vm2, %v7142_v10, %v3595_v14  ;;  %vm3879_vm7 = vcmp.eq.f32.partialorder %v7335_v59, 1065353216  ;;  %v40_v14 = vld [vmem:[%s10629_s1 + $0xa0] sm:$0xff] }
 0x157   :  { %v3859_v8 = vmul.f32 %v4039_v56, %v7287_v61  ;;  %v3801_v22 = vsel %vm7587_vm4, 2143289344, %v3797_v58  ;;  %vm3892_vm12 = vmor %vm7560_vm6, %vm7568_vm14  ;;  %v3700_v13 = vsel %vm10709_vm2, %v7156_v50, %v3699_v30  ;;  %vm3880_vm14 = vcmp.lt.s32.totalorder %v7335_v59, 0  ;;  %v28_v50 = vld [vmem:[%s10629_s1 + $0x40] sm:$0xff]  ;;  %v34_v58 = vld [vmem:[%s10629_s1 + $0x70] sm:$0xff] }
 0x158   :  { %vm3883_vm0 = vmand %vm3877_vm9, %vm11605_vm8  ;;  %v3893_v55 = vsel %vm3892_vm12, 2139095040, %v10838_v23  ;;  %vm10707_vm12 = vcmask 1042434   ;;  %v405_v42 = vsel %vm10708_vm11, %v3700_v13, %v3596_v36  ;;  %v7642_v4 = vmax.f32 %v28_v50, 1e-06  ;;  %v48_v36 = vld [vmem:[%s10629_s1 + $0xe0] sm:$0xff]  ;;  %v50_v13 = vld [vmem:[%s10629_s1 + $0xf0] sm:$0xff] }
 0x159   :  { %4040 = vpow2.f32 %v3859_v8  ;;  %vm11606_vm6 = vmmov %vm11590_vm15  ;;  %vm3894_vm15 = vcmp.eq.f32.partialorder %v7335_v59, 3212836864  ;;  %v7689_v45 = vand.u32 2147483647, %v7667_v41  ;;  %v7714_v50 = vmax.f32 %v36_v49, 1e-06 }
 0x15a   :  { %4042 = vlog2.f32 %v7507_v35  ;;  %vm3802_vm5 = vmor %vm3775_vm10, %vm11606_vm6  ;;  %vm3882_vm10 = vcmp.eq.f32.partialorder %v7365_v37, 2139095040  ;;  %v3895_v8 = vsel %vm3894_vm15, 1065353216, %v3893_v55  ;;  %v3900_v37 = vsel %vm3877_vm9, %v7478_v19, %v7411_v53  ;;  %v54_v55 = vld [vmem:[%s10629_s1 + $0x110] sm:$0xff] }
 0x15b   :  { %4044 = vlog2.f32 %v7546_v54  ;;  %v3803_v46 = vsel %vm3802_vm5, 1065353216, %v3801_v22  ;;  %vm3887_vm4 = vmand %vm3880_vm14, %vm7355_vm3  ;;  %vm11608_vm5 = vcmp.eq.f32.partialorder %v7287_v61, 0  ;;  %vm10706_vm15 = vcmask 1043459   ;;  %v42_v22 = vld [vmem:[%s10629_s1 + $0xb0] sm:$0xff] }
 0x15c   :  { %4046 = vlog2.f32 %v7599_v15  ;;  %v3804_v5 = vsel %vm10709_vm2, %v7204_v29, %v3803_v46  ;;  %vm3906_vm14 = vmor %vm3879_vm7, %vm11608_vm5  ;;  %v7660_v3 = vand.u32 2147483647, %v7642_v4  ;;  %v44_v46 = vld [vmem:[%s10629_s1 + $0xc0] sm:$0xff]  ;;  %vm10717_vm9 = vcmp.lt.f32.partialorder %v7473_v28, 0 }
 0x15d   :  { %v406_v25 = vsel %vm10707_vm12, %v3804_v5, %v405_v42  ;;  %4048 = vlog2.f32 %v7645_v62  ;;  %v56_v5 = vld [vmem:[%s10629_s1 + $0x120] sm:$0xff]  ;;  %vm600_vm7 = vcmp.eq.f32.partialorder %v7473_v28, 0  ;;  %v58_v42 = vld [vmem:[%s10629_s1 + $0x130] sm:$0xff]  ;;  %vm11619_vm12 = vcmp.lt.f32.partialorder %v4227_v0, 0 }
 0x15e   :  { %vm11660_vm8 = vcmp.lt.f32.partialorder %v7606_v40, 0 }
 0x163   :  { %v4041_v60 = vpop.eup %4040 }
 0x164   :  { %v3884_v47 = vsel %vm3883_vm0, 2143289344, %v4041_v60  ;;  %v4043_v31 = vpop.eup %4042  ;;  %vm11607_vm0 = vcmp.eq.f32.partialorder %v7309_v39, 2139095040  ;;  %v46_v60 = vld [vmem:[%s10629_s1 + $0xd0] sm:$0x1] }
 0x165   :  { %v3886_v56 = vsel %vm3878_vm13, %v7386_v6, %v3884_v47  ;;  %vm3902_vm13 = vcmp.ne.f32.partialorder %v7335_v59, %v7335_v59  ;;  %v4045_v29 = vpop.eup %4044  ;;  %v581_v27 = vmul.f32 %v4043_v31, %v4227_v0  ;;  %v60_v31 = vld [vmem:[%s10629_s1 + $0x140] sm:$0x1] }
 0x166   :  { %v3888_v10 = vxor.u32 2147483648, %v3886_v56  ;;  %vm3904_vm6 = vmor %vm3902_vm13, %vm7436_vm1  ;;  %v685_v38 = vmul.f32 %v4045_v29, %v4227_v0  ;;  %v4047_v26 = vpop.eup %4046  ;;  %v62_v29 = vld [vmem:[%s10629_s1 + $0x150] sm:$0xff]  ;;  %vm11609_vm13 = vnez %v10758_v63  ;;  %vm11645_vm1 = vnez %v10773_v52 }
 0x167   :  { %4050 = vpow2.f32 %v581_v27  ;;  %v789_v57 = vmul.f32 %v4047_v26, %v4227_v0  ;;  %v4049_v47 = vpop.eup %4048  ;;  %v7763_v26 = vmax.f32 %v50_v13, 1e-06 }
 0x168   :  { %v3889_v9 = vsel %vm3887_vm4, %v3888_v10, %v3886_v56  ;;  %4052 = vlog2.f32 %v7660_v3  ;;  %v52_v56 = vld [vmem:[%s10629_s1 + $0x100] sm:$0xff]  ;;  %v7712_v10 = vmax.f32 %v34_v58, 1e-06  ;;  %vm603_vm4 = vcmp.gt.f32.partialorder %v7507_v35, 1065353216 }
 0x169   :  { %v3896_v18 = vsel %vm11607_vm0, %v3895_v8, %v3889_v9  ;;  %4054 = vpow2.f32 %v685_v38  ;;  %v7720_v9 = vmax.f32 %v38_v17, 1e-06  ;;  %v7722_v8 = vmax.f32 %v40_v14, 1e-06  ;;  %vm7753_vm0 = vmand %vm10717_vm9, %vm11609_vm13  ;;  %v68_v58 = vld [vmem:[%s10629_s1 + $0x180] sm:$0xff] }
 0x16a   :  { %v3901_v12 = vsel %vm3882_vm10, %v3900_v37, %v3896_v18  ;;  %4056 = vpow2.f32 %v789_v57  ;;  %v7731_v18 = vmax.f32 %v42_v22, 1e-06  ;;  %vm10714_vm10 = vcmp.lt.f32.partialorder %v7494_v24, 0  ;;  %vm7798_vm11 = vmxor %vm11619_vm12, %vm603_vm4 }
 0x16b   :  { %v3905_v20 = vsel %vm3904_vm6, 2143289344, %v3901_v12  ;;  %4058 = vlog2.f32 %v7689_v45  ;;  %v7761_v38 = vmax.f32 %v48_v36, 1e-06  ;;  %vm11612_vm6 = vcmp.lt.f32.partialorder %v4227_v0, 0 }
 0x16c   :  { %v3907_v33 = vsel %vm3906_vm14, 1065353216, %v3905_v20  ;;  %v64_v20 = vld [vmem:[%s10629_s1 + $0x160] sm:$0xff]  ;;  %vm7769_vm5 = vmand %vm11612_vm6, %vm600_vm7  ;;  %vm10718_vm14 = vcmp.eq.f32.partialorder %v7494_v24, 0  ;;  %v7777_v49 = vmax.f32 %v52_v56, 1e-06  ;;  %vm11641_vm9 = vcmp.gt.f32.partialorder %v7599_v15, 1065353216 }
 0x16d   :  { %v3908_v44 = vsel %vm10709_vm2, %v7335_v59, %v3907_v33  ;;  %v32_v59 = vld [vmem:[%s10629_s1 + $0x60] sm:$0x1]  ;;  %v7746_v33 = vmax.f32 %v46_v60, 1e-06  ;;  %v7779_v17 = vmax.f32 %v54_v55, 1e-06  ;;  %vm7786_vm6 = vmand %vm10714_vm10, %vm11609_vm13 }
 0x16e   :  { %v407_v1 = vsel %vm10706_vm15, %v3908_v44, %v406_v25  ;;  %v7686_v30 = vmax.f32 %v32_v59, 1e-06  ;;  %v7744_v25 = vmax.f32 %v44_v46, 1e-06  ;;  %v893_v44 = vmul.f32 %v4049_v47, %v4227_v0  ;;  %v70_v47 = vld [vmem:[%s10629_s1 + $0x190] sm:$0xff]  ;;  %v72_v46 = vld [vmem:[%s10629_s1 + $0x1a0] sm:$0xff]  ;;  %vm7818_vm4 = vmand %vm11619_vm12, %vm10718_vm14 }
 0x16f   :  { %474 = vmatprep.mubr.f32.mxu0 %v407_v1  ;;  %vm707_vm15 = vcmp.gt.f32.partialorder %v7546_v54, 1065353216  ;;  %v7790_v22 = vmax.f32 %v56_v5, 1e-06  ;;  %v7792_v60 = vmax.f32 %v58_v42, 1e-06  ;;  %vm10719_vm2 = vcmp.lt.f32.partialorder %v7564_v34, 0 }
 0x170   :  { %v7736_v37 = vand.u32 2147483647, %v7686_v30  ;;  %v7804_v13 = vand.u32 2147483647, %v7712_v10  ;;  %v7812_v56 = vmax.f32 %v60_v31, 1e-06  ;;  %vm7836_vm10 = vmxor %vm11619_vm12, %vm707_vm15 }
 0x171   :  { %v4051_v12 = vpop.eup %4050  ;;  %11617 = vst [vmem:[#allocation14_spill] sm:$0xff] %v7790_v22  ;;  %11618 = vst [vmem:[#allocation31_spill] sm:$0xff] %v7792_v60  ;;  %v7824_v42 = vmax.f32 %v62_v29, 1e-06  ;;  %v7826_v7 = vmax.f32 %v64_v20, 1e-06 }
 0x172   :  { %v4053_v1 = vpop.eup %4052  ;;  %4060 = vlog2.f32 %v7736_v37  ;;  %11622 = vst [vmem:[#allocation32_spill] sm:$0xff] %v7812_v56  ;;  %v606_v31 = vsel %vm7753_vm0, 2143289344, %v4051_v12  ;;  %v7842_v29 = vmax.f32 %v68_v58, 1e-06  ;;  %v7851_v20 = vmax.f32 %v70_v47, 1e-06  ;;  %vm7860_vm12 = vmand %vm10719_vm2, %vm11609_vm13 }
 0x173   :  { %v4055_v57 = vpop.eup %4054  ;;  %4062 = vpow2.f32 %v893_v44  ;;  %v997_v5 = vmul.f32 %v4053_v1, %v4227_v0  ;;  %11625 = vst [vmem:[#allocation15_spill] sm:$0xff] %v7824_v42  ;;  %11626 = vst [vmem:[#allocation16_spill] sm:$0xff] %v7826_v7  ;;  %v7840_v44 = vmax.f32 %v66_v43, 1e-06  ;;  %v7853_v27 = vmax.f32 %v72_v46, 1e-06 }
 0x174   :  { %v710_v19 = vsel %vm7786_vm6, 2143289344, %v4055_v57  ;;  %11630 = vst [vmem:[#allocation18_spill] sm:$0xff] %v7842_v29  ;;  %vm10722_vm6 = vcmp.eq.f32.partialorder %v7564_v34, 0  ;;  %v4057_v12 = vpop.eup %4056  ;;  %11631 = vst [vmem:[#allocation19_spill] sm:$0xff] %v7851_v20  ;;  %4064 = vlog2.f32 %v7804_v13  ;;  %v608_v43 = vsel %vm600_vm7, %v4529_v11, %v606_v31 }
 0x175   :  { %11629 = vst [vmem:[#allocation17_spill] sm:$0xff] %v7840_v44  ;;  %11632 = vst [vmem:[#allocation21_spill] sm:$0xff] %v7853_v27  ;;  %vm11635_vm0 = vcmp.eq.f32.partialorder %v7494_v24, 0  ;;  %4066 = vpow2.f32 %v997_v5  ;;  %v4059_v58 = vpop.eup %4058  ;;  %vm11636_vm14 = vcmp.lt.f32.partialorder %v7473_v28, 0  ;;  %vm11637_vm15 = vcmp.lt.f32.partialorder %v4227_v0, 0 }
 0x176   :  { %v712_v57 = vsel %vm11635_vm0, %v4529_v11, %v710_v19  ;;  %v7880_v14 = vsel %vm11636_vm14, %v4669_v16, %v4503_v2  ;;  %vm7890_vm2 = vmand %vm11637_vm15, %vm10722_vm6  ;;  %vm11640_vm14 = vcmp.lt.f32.partialorder %v7494_v24, 0  ;;  %v814_v46 = vsel %vm7860_vm12, 2143289344, %v4057_v12 }
 0x177   :  { %v7899_v47 = vsel %vm11640_vm14, %v4669_v16, %v4503_v2  ;;  %vm11642_vm7 = vmmov %vm11637_vm15  ;;  %v7912_v31 = vand.u32 2147483647, %v7714_v50  ;;  %vm11646_vm14 = vcmp.lt.s32.totalorder %v7473_v28, 0  ;;  %v610_v12 = vxor.u32 2147483648, %v608_v43 }
 0x178   :  { %vm7907_vm0 = vmxor %vm11642_vm7, %vm11641_vm9  ;;  %v714_v39 = vxor.u32 2147483648, %v712_v57  ;;  %vm810_vm12 = vcmp.lt.s32.totalorder %v7564_v34, 0  ;;  %v1101_v59 = vmul.f32 %v4059_v58, %v4227_v0  ;;  %v7960_v58 = vand.u32 2147483647, %v7720_v9 }
 0x179   :  { %vm7919_vm6 = vmand %vm11646_vm14, %vm11645_vm1  ;;  %vm11650_vm14 = vcmp.lt.s32.totalorder %v7494_v24, 0  ;;  %vm11655_vm9 = vnez %v10794_v48  ;;  %4068 = vlog2.f32 %v7912_v31  ;;  %v11665_v7 = vmov 0 }
 0x17a   :  { %vm11649_vm7 = vmor %vm7769_vm5, %vm7798_vm11  ;;  %vm11654_vm5 = vcmp.eq.f32.partialorder %v7564_v34, 0  ;;  %v611_v20 = vsel %vm7919_vm6, %v610_v12, %v608_v43  ;;  %4070 = vpow2.f32 %v1101_v59  ;;  %v11684_v5 = vmov 0 }
 0x17b   :  { %v615_v51 = vsel %vm11649_vm7, 2139095040, %v10838_v23  ;;  %vm7937_vm3 = vmand %vm11650_vm14, %vm11645_vm1  ;;  %v816_v61 = vsel %vm11654_vm5, %v4529_v11, %v814_v46  ;;  %vm10740_vm14 = vcmp.eq.f32.partialorder %v7606_v40, 0  ;;  %vm11674_vm5 = vcmp.eq.f32.partialorder %v7473_v28, 1065353216 }
 0x17c   :  { %v4061_v36 = vpop.eup %4060  ;;  %vm11653_vm11 = vmor %vm7818_vm4, %vm7836_vm10  ;;  %vm11656_vm10 = vcmp.ne.f32.partialorder %v7473_v28, %v7473_v28  ;;  %v715_v44 = vsel %vm7937_vm3, %v714_v39, %v712_v57  ;;  %v818_v6 = vxor.u32 2147483648, %v816_v61  ;;  %4072 = vlog2.f32 %v7960_v58 }
 0x17d   :  { %v719_v21 = vsel %vm11653_vm11, 2139095040, %v10838_v23  ;;  %v4063_v27 = vpop.eup %4062  ;;  %vm7967_vm4 = vmor %vm11656_vm10, %vm11655_vm9  ;;  %vm11659_vm11 = vcmp.lt.f32.partialorder %v7564_v34, 0  ;;  %vm11663_vm10 = vcmp.eq.f32.partialorder %v7473_v28, 3212836864  ;;  %v1205_v57 = vmul.f32 %v4061_v36, %v4227_v0 }
 0x17e   :  { %v7975_v55 = vsel %vm11659_vm11, %v4669_v16, %v4503_v2  ;;  %vm7984_vm7 = vmand %vm11660_vm8, %vm11609_vm13  ;;  %v617_v29 = vsel %vm11663_vm10, 1065353216, %v615_v51  ;;  %vm11664_vm11 = vcmp.ne.f32.partialorder %v7494_v24, %v7494_v24  ;;  %vm11669_vm10 = vcmp.eq.f32.partialorder %v7494_v24, 3212836864  ;;  %v4065_v1 = vpop.eup %4064 }
 0x17f   :  { %vm8000_vm8 = vmor %vm11664_vm11, %vm11655_vm9  ;;  %v721_v39 = vsel %vm11669_vm10, 1065353216, %v719_v21  ;;  %v918_v59 = vsel %vm7984_vm7, 2143289344, %v4063_v27  ;;  %v4067_v19 = vpop.eup %4066  ;;  %v8077_v42 = vand.u32 2147483647, %v7722_v8  ;;  %v11693_v22 = vmov 0 }
 0x180   :  { %v11666_v7 = vsel %vm8000_vm8, 4294967295, %v11665_v7  ;;  %vm8009_vm6 = vmand %vm810_vm12, %vm11645_vm1  ;;  %vm11673_vm12 = vcmp.eq.f32.partialorder %v4227_v0, 0  ;;  %vm11678_vm8 = vcmp.gt.f32.partialorder %v7645_v62, 1065353216  ;;  %4074 = vpow2.f32 %v1205_v57 }
 0x181   :  { %vm11670_vm11 = vmmov %vm11637_vm15  ;;  %4076 = vlog2.f32 %v8077_v42  ;;  %v11802_v57 = vmov 0 }
 0x182   :  { %vm8020_vm15 = vmand %vm11670_vm11, %vm10740_vm14 }
 0x183   :  { %vm8029_vm3 = vmor %vm11674_vm5, %vm11673_vm12 }
 0x184   :  { %vm11677_vm10 = vmor %vm7890_vm2, %vm7907_vm0  ;;  %vm11682_vm2 = vcmp.eq.f32.partialorder %v4227_v0, 0  ;;  %vm11683_vm0 = vcmp.eq.f32.partialorder %v7494_v24, 1065353216 }
 0x185   :  { %v823_v21 = vsel %vm11677_vm10, 2139095040, %v10838_v23  ;;  %vm11679_vm5 = vmmov %vm11670_vm11  ;;  %vm11687_vm11 = vcmp.lt.f32.partialorder %v7642_v4, 0 }
 0x186   :  { %vm8047_vm12 = vmxor %vm11679_vm5, %vm11678_vm8  ;;  %vm11686_vm8 = vcmp.lt.f32.partialorder %v7606_v40, 0  ;;  %vm1019_vm5 = vcmp.gt.f32.partialorder %v7660_v3, 1065353216 }
 0x187   :  { %vm8056_vm10 = vmor %vm11683_vm0, %vm11682_vm2  ;;  %v8065_v27 = vsel %vm11686_vm8, %v4669_v16, %v4503_v2  ;;  %vm11690_vm2 = vcmp.eq.f32.partialorder %v4427_v32, 2139095040  ;;  %vm11692_vm8 = vcmp.ne.f32.partialorder %v7564_v34, %v7564_v34 }
 0x188   :  { %v11685_v5 = vsel %vm8056_vm10, 4294967295, %v11684_v5  ;;  %vm8072_vm14 = vmand %vm11687_vm11, %vm11609_vm13  ;;  %v618_v56 = vsel %vm11690_vm2, %v617_v29, %v611_v20  ;;  %v819_v29 = vsel %vm8009_vm6, %v818_v6, %v816_v61  ;;  %vm11697_vm6 = vcmp.eq.f32.partialorder %v7642_v4, 0 }
 0x189   :  { %vm11691_vm0 = vmmov %vm11690_vm2  ;;  %vm11695_vm2 = vcmp.eq.f32.partialorder %v7564_v34, 3212836864  ;;  %v1022_v61 = vsel %vm8072_vm14, 2143289344, %v4067_v19  ;;  %vm11701_vm11 = vcmp.eq.f32.partialorder %v7507_v35, 2139095040 }
 0x18a   :  { %v722_v60 = vsel %vm11691_vm0, %v721_v39, %v715_v44  ;;  %vm8088_vm7 = vmor %vm11692_vm8, %vm11655_vm9  ;;  %v825_v44 = vsel %vm11695_vm2, 1065353216, %v823_v21  ;;  %vm11696_vm0 = vcmp.eq.f32.partialorder %v7606_v40, 0  ;;  %vm11698_vm2 = vcmp.lt.f32.partialorder %v4227_v0, 0 }
 0x18b   :  { %v11694_v22 = vsel %vm8088_vm7, 4294967295, %v11693_v22  ;;  %v920_v20 = vsel %vm11696_vm0, %v4529_v11, %v918_v59  ;;  %vm8114_vm10 = vmand %vm11698_vm2, %vm11697_vm6  ;;  %v1309_v39 = vmul.f32 %v4065_v1, %v4227_v0  ;;  %v623_v6 = vsel %vm11701_vm11, %v7880_v14, %v618_v56  ;;  %v4069_v59 = vpop.eup %4068 }
 0x18c   :  { %vm11702_vm14 = vmmov %vm11698_vm2  ;;  %vm11705_vm6 = vcmp.lt.f32.partialorder %v7642_v4, 0  ;;  %vm11706_vm11 = vcmp.eq.f32.partialorder %v7546_v54, 2139095040  ;;  %vm11709_vm7 = vcmp.eq.f32.partialorder %v7564_v34, 1065353216  ;;  %v11710_v14 = vmov 0  ;;  %v4071_v36 = vpop.eup %4070 }
 0x18d   :  { %vm8126_vm8 = vmxor %vm11702_vm14, %vm1019_vm5  ;;  %v8134_v21 = vsel %vm11705_vm6, %v4669_v16, %v4503_v2  ;;  %v727_v35 = vsel %vm11706_vm11, %v7899_v47, %v722_v60  ;;  %vm11707_vm5 = vcmp.eq.f32.partialorder %v4427_v32, 2139095040  ;;  %vm11708_vm14 = vcmp.eq.f32.partialorder %v4227_v0, 0 }
 0x18e   :  { %v826_v56 = vsel %vm11707_vm5, %v825_v44, %v819_v29  ;;  %vm8148_vm0 = vmor %vm11709_vm7, %vm11708_vm14  ;;  %v922_v1 = vxor.u32 2147483648, %v920_v20  ;;  %vm11712_vm2 = vcmp.lt.s32.totalorder %v7606_v40, 0  ;;  %vm11716_vm5 = vcmp.eq.f32.partialorder %v7642_v4, 0 }
 0x18f   :  { %v11711_v14 = vsel %vm8148_vm0, 4294967295, %v11710_v14  ;;  %vm8157_vm11 = vmand %vm11712_vm2, %vm11645_vm1  ;;  %v1024_v47 = vsel %vm11716_vm5, %v4529_v11, %v1022_v61  ;;  %v627_v19 = vsel %vm7967_vm4, 2143289344, %v623_v6  ;;  %vm11717_vm2 = vcmp.ne.f32.partialorder %v7606_v40, %v7606_v40 }
 0x190   :  { %vm11715_vm7 = vmor %vm8020_vm15, %vm8047_vm12  ;;  %vm11720_vm4 = vcmp.lt.f32.partialorder %v7667_v41, 0  ;;  %4078 = vpow2.f32 %v1309_v39  ;;  %vm11722_vm5 = vcmp.eq.f32.partialorder %v7599_v15, 2139095040  ;;  %vm11723_vm6 = vcmp.lt.s32.totalorder %v7642_v4, 0 }
 0x191   :  { %v927_v60 = vsel %vm11715_vm7, 2139095040, %v10838_v23  ;;  %vm8179_vm0 = vmor %vm11717_vm2, %vm11655_vm9  ;;  %v8192_v53 = vsel %vm11720_vm4, %v4669_v16, %v4503_v2  ;;  %vm11721_vm7 = vnez %v11666_v7  ;;  %v831_v29 = vsel %vm11722_vm5, %v7975_v55, %v826_v56  ;;  %v4073_v7 = vpop.eup %4072 }
 0x192   :  { %vm1030_vm15 = vmor %vm8114_vm10, %vm8126_vm8  ;;  %v731_v46 = vsel %vm11721_vm7, 2143289344, %v727_v35  ;;  %v923_v61 = vsel %vm8157_vm11, %v922_v1, %v920_v20  ;;  %vm11726_vm7 = vcmp.eq.f32.partialorder %v7606_v40, 3212836864  ;;  %v1026_v55 = vxor.u32 2147483648, %v1024_v47  ;;  %v4075_v54 = vpop.eup %4074 }
 0x193   :  { %vm8204_vm12 = vmand %vm11723_vm6, %vm11645_vm1  ;;  %v929_v15 = vsel %vm11726_vm7, 1065353216, %v927_v60  ;;  %v1413_v6 = vmul.f32 %v4069_v59, %v4227_v0  ;;  %v629_v20 = vsel %vm8029_vm3, 1065353216, %v627_v19  ;;  %vm11731_vm7 = vcmp.eq.f32.partialorder %v7606_v40, 1065353216 }
 0x194   :  { %vm11727_vm5 = vmmov %vm11720_vm4  ;;  %v11732_v35 = vmov 0  ;;  %v1031_v56 = vsel %vm1030_vm15, 2139095040, %v10838_v23  ;;  %vm11735_vm2 = vcmp.lt.f32.partialorder %v4227_v0, 0  ;;  %vm11738_vm4 = vnez %v11685_v5 }
 0x195   :  { %vm8218_vm6 = vmand %vm11727_vm5, %vm11609_vm13  ;;  %vm11734_vm5 = vcmp.eq.f32.partialorder %v7667_v41, 0  ;;  %v733_v1 = vsel %vm11738_vm4, 1065353216, %v731_v46  ;;  %vm11740_vm10 = vcmp.ne.f32.partialorder %v7642_v4, %v7642_v4  ;;  %vm11743_vm15 = vcmp.gt.f32.partialorder %v7689_v45, 1065353216 }
 0x196   :  { %vm11730_vm11 = vmmov %vm11708_vm14  ;;  %v8280_v5 = vand.u32 2147483647, %v7731_v18  ;;  %v1126_v19 = vsel %vm8218_vm6, 2143289344, %v4071_v36  ;;  %v1027_v36 = vsel %vm8204_vm12, %v1026_v55, %v1024_v47  ;;  %vm11753_vm6 = vcmp.eq.f32.partialorder %v7642_v4, 3212836864 }
 0x197   :  { %vm8231_vm14 = vmor %vm11731_vm7, %vm11730_vm11  ;;  %v11755_v39 = vmov 0  ;;  %4080 = vpow2.f32 %v1413_v6  ;;  %vm11758_vm12 = vnez %v11711_v14  ;;  %vm11770_vm7 = vcmp.gt.f32.partialorder %v7736_v37, 1065353216 }
 0x198   :  { %v11733_v35 = vsel %vm8231_vm14, 4294967295, %v11732_v35  ;;  %vm8245_vm3 = vmand %vm11735_vm2, %vm11734_vm5  ;;  %vm11739_vm14 = vnez %v11694_v22  ;;  %4082 = vlog2.f32 %v8280_v5  ;;  %v8507_v6 = vand.u32 2147483647, %v7777_v49 }
 0x199   :  { %v835_v51 = vsel %vm11739_vm14, 2143289344, %v831_v29  ;;  %vm8260_vm8 = vmor %vm11740_vm10, %vm11655_vm9  ;;  %vm11746_vm14 = vcmp.lt.f32.partialorder %v7686_v30, 0  ;;  %vm11747_vm10 = vcmp.eq.f32.partialorder %v4427_v32, 2139095040  ;;  %v1517_v29 = vmul.f32 %v4073_v7, %v4227_v0 }
 0x19a   :  { %vm8268_vm5 = vmxor %vm11735_vm2, %vm11743_vm15  ;;  %v8277_v22 = vsel %vm11746_vm14, %v4669_v16, %v4503_v2  ;;  %v930_v60 = vsel %vm11747_vm10, %v929_v15, %v923_v61  ;;  %vm11751_vm10 = vcmp.eq.f32.partialorder %v4227_v0, 1065353216  ;;  %v1033_v15 = vsel %vm11753_vm6, 1065353216, %v1031_v56 }
 0x19b   :  { %vm11748_vm2 = vmmov %vm11746_vm14  ;;  %v8300_v61 = vsel %vm11751_vm10, %v7473_v28, %v629_v20  ;;  %v4077_v28 = vpop.eup %4076  ;;  %v8319_v47 = vsel %vm11751_vm10, %v7494_v24, %v733_v1  ;;  %v837_v44 = vsel %vm11758_vm12, 1065353216, %v835_v51  ;;  %v11761_v7 = vmov 0 }
 0x19c   :  { %vm8291_vm4 = vmand %vm11748_vm2, %vm11609_vm13  ;;  %11752 = vst [vmem:[#allocation22_spill] sm:$0xff] %v8300_v61  ;;  %vm11754_vm2 = vcmp.lt.s32.totalorder %v7667_v41, 0  ;;  %vm11763_vm12 = vcmp.eq.f32.partialorder %v7645_v62, 2139095040  ;;  %4084 = vpow2.f32 %v1517_v29  ;;  %v8374_v56 = vand.u32 2147483647, %v7744_v25  ;;  %v4079_v1 = vpop.eup %4078 }
 0x19d   :  { %vm8310_vm15 = vmand %vm11754_vm2, %vm11645_vm1  ;;  %11757 = vst [vmem:[#allocation23_spill] sm:$0xff] %v8319_v47  ;;  %vm11760_vm2 = vcmp.eq.f32.partialorder %v7642_v4, 1065353216  ;;  %v935_v24 = vsel %vm11763_vm12, %v8065_v27, %v930_v60  ;;  %v1230_v55 = vsel %vm8291_vm4, 2143289344, %v4075_v54  ;;  %vm11769_vm12 = vcmp.eq.f32.partialorder %v4427_v32, 2139095040 }
 0x19e   :  { %v11756_v39 = vsel %vm8310_vm15, 4294967295, %v11755_v39  ;;  %vm11759_vm6 = vmmov %vm11730_vm11  ;;  %vm11764_vm15 = vcmp.eq.f32.partialorder %v7667_v41, 0  ;;  %v1034_v62 = vsel %vm11769_vm12, %v1033_v15, %v1027_v36  ;;  %v1621_v60 = vmul.f32 %v4077_v28, %v4227_v0 }
 0x19f   :  { %vm8327_vm14 = vmor %vm11760_vm2, %vm11759_vm6  ;;  %v1128_v14 = vsel %vm11764_vm15, %v4529_v11, %v1126_v19  ;;  %vm11765_vm6 = vcmp.eq.f32.partialorder %v7686_v30, 0  ;;  %vm11766_vm2 = vcmp.lt.f32.partialorder %v4227_v0, 0  ;;  %v8408_v36 = vand.u32 2147483647, %v7761_v38 }
 0x1a0   :  { %v11762_v7 = vsel %vm8327_vm14, 4294967295, %v11761_v7  ;;  %vm8349_vm11 = vmand %vm11766_vm2, %vm11765_vm6  ;;  %v1130_v19 = vxor.u32 2147483648, %v1128_v14  ;;  %4086 = vlog2.f32 %v8374_v56  ;;  %vm11795_vm15 = vcmp.lt.s32.totalorder %v7686_v30, 0 }
 0x1a1   :  { %vm11771_vm4 = vmmov %vm11766_vm2  ;;  %vm11774_vm2 = vcmp.lt.f32.partialorder %v7712_v10, 0  ;;  %4088 = vpow2.f32 %v1621_v60  ;;  %v4081_v54 = vpop.eup %4080  ;;  %v11839_v29 = vmov 0 }
 0x1a2   :  { %vm8362_vm14 = vmxor %vm11771_vm4, %vm11770_vm7  ;;  %v8371_v20 = vsel %vm11774_vm2, %v4669_v16, %v4503_v2  ;;  %vm11782_vm7 = vcmp.lt.f32.partialorder %v4227_v0, 0  ;;  %4090 = vlog2.f32 %v8408_v36 }
 0x1a3   :  { %vm11775_vm12 = vmmov %vm11751_vm10 }
 0x1a4   :  { %v8379_v51 = vsel %vm11775_vm12, %v7564_v34, %v837_v44  ;;  %vm11777_vm4 = vmmov %vm11774_vm2  ;;  %v939_v34 = vsel %vm8179_vm0, 2143289344, %v935_v24  ;;  %vm11780_vm12 = vcmp.eq.f32.partialorder %v7686_v30, 0  ;;  %vm11785_vm2 = vcmp.eq.f32.partialorder %v7660_v3, 2139095040 }
 0x1a5   :  { %11776 = vst [vmem:[#allocation26_spill] sm:$0xff] %v8379_v51  ;;  %vm8386_vm6 = vmand %vm11777_vm4, %vm11609_vm13  ;;  %v1232_v46 = vsel %vm11780_vm12, %v4529_v11, %v1230_v55  ;;  %vm11781_vm4 = vcmp.eq.f32.partialorder %v7712_v10, 0  ;;  %v1039_v43 = vsel %vm11785_vm2, %v8134_v21, %v1034_v62  ;;  %vm11787_vm12 = vcmp.gt.f32.partialorder %v7804_v13, 1065353216 }
 0x1a6   :  { %vm8403_vm10 = vmand %vm11782_vm7, %vm11781_vm4  ;;  %v8430_v3 = vand.u32 2147483647, %v7763_v26  ;;  %v11791_v21 = vmov 0  ;;  %v1334_v12 = vsel %vm8386_vm6, 2143289344, %v4079_v1  ;;  %v1234_v55 = vxor.u32 2147483648, %v1232_v46 }
 0x1a7   :  { %vm11786_vm0 = vmor %vm8245_vm3, %vm8268_vm5  ;;  %vm11790_vm3 = vcmp.ne.f32.partialorder %v7667_v41, %v7667_v41 }
 0x1a8   :  { %v1135_v15 = vsel %vm11786_vm0, 2139095040, %v10838_v23  ;;  %vm8423_vm4 = vmxor %vm11782_vm7, %vm11787_vm12  ;;  %vm11793_vm12 = vcmp.lt.f32.partialorder %v7714_v50, 0  ;;  %vm11794_vm7 = vnez %v11733_v35  ;;  %v1043_v35 = vsel %vm8260_vm8, 2143289344, %v1039_v43 }
 0x1a9   :  { %vm8437_vm5 = vmor %vm11790_vm3, %vm11655_vm9  ;;  %v8452_v59 = vsel %vm11793_vm12, %v4669_v16, %v4503_v2  ;;  %v941_v44 = vsel %vm11794_vm7, 1065353216, %v939_v34  ;;  %vm11798_vm7 = vnez %v11756_v39  ;;  %vm11799_vm3 = vcmp.eq.f32.partialorder %v7667_v41, 3212836864 }
 0x1aa   :  { %v11792_v21 = vsel %vm8437_vm5, 4294967295, %v11791_v21  ;;  %vm1238_vm2 = vmor %vm8349_vm11, %vm8362_vm14  ;;  %v1131_v62 = vsel %vm11798_vm7, %v1130_v19, %v1128_v14  ;;  %v1137_v1 = vsel %vm11799_vm3, 1065353216, %v1135_v15  ;;  %vm11800_vm12 = vcmp.eq.f32.partialorder %v4227_v0, 0 }
 0x1ab   :  { %vm8462_vm6 = vmand %vm11795_vm15, %vm11645_vm1  ;;  %vm11801_vm0 = vcmp.eq.f32.partialorder %v7667_v41, 1065353216  ;;  %v1239_v39 = vsel %vm1238_vm2, 2139095040, %v10838_v23  ;;  %vm11804_vm8 = vcmp.eq.f32.partialorder %v7712_v10, 0  ;;  %vm11805_vm3 = vnez %v10758_v63 }
 0x1ac   :  { %vm8484_vm13 = vmor %vm11801_vm0, %vm11800_vm12  ;;  %v1336_v14 = vsel %vm11804_vm8, %v4529_v11, %v1334_v12  ;;  %vm11806_vm7 = vcmp.lt.f32.partialorder %v7714_v50, 0  ;;  %4092 = vlog2.f32 %v8430_v3  ;;  %vm11809_vm11 = vcmp.eq.f32.partialorder %v4227_v0, 1065353216 }
 0x1ad   :  { %v11803_v57 = vsel %vm8484_vm13, 4294967295, %v11802_v57  ;;  %vm8501_vm15 = vmand %vm11806_vm7, %vm11805_vm3  ;;  %v8512_v27 = vsel %vm11809_vm11, %v7606_v40, %v941_v44  ;;  %vm11811_vm14 = vcmp.ne.f32.partialorder %v7686_v30, %v7686_v30  ;;  %v11812_v34 = vmov 0  ;;  %v4083_v40 = vpop.eup %4082 }
 0x1ae   :  { %11810 = vst [vmem:[#allocation28_spill] sm:$0xff] %v8512_v27  ;;  %vm8519_vm2 = vmor %vm11811_vm14, %vm11655_vm9  ;;  %vm11814_vm0 = vcmp.eq.f32.partialorder %v7714_v50, 0  ;;  %vm11815_vm12 = vcmp.lt.f32.partialorder %v4227_v0, 0  ;;  %vm11818_vm14 = vnez %v11762_v7  ;;  %v1235_v12 = vsel %vm8462_vm6, %v1234_v55, %v1232_v46  ;;  %v4085_v46 = vpop.eup %4084 }
 0x1af   :  { %v11813_v34 = vsel %vm8519_vm2, 4294967295, %v11812_v34  ;;  %vm8527_vm8 = vmand %vm11815_vm12, %vm11814_vm0  ;;  %v1045_v43 = vsel %vm11818_vm14, 1065353216, %v1043_v35  ;;  %vm11819_vm2 = vcmp.eq.f32.partialorder %v4427_v32, 2139095040  ;;  %vm11820_vm12 = vcmp.gt.f32.partialorder %v7912_v31, 1065353216 }
 0x1b0   :  { %v1138_v15 = vsel %vm11819_vm2, %v1137_v1, %v1131_v62  ;;  %vm11821_vm7 = vcmp.lt.f32.partialorder %v4227_v0, 0  ;;  %vm11824_vm2 = vcmp.lt.f32.partialorder %v7720_v9, 0  ;;  %vm11825_vm6 = vcmp.eq.f32.partialorder %v7686_v30, 3212836864 }
 0x1b1   :  { %vm8546_vm5 = vmxor %vm11821_vm7, %vm11820_vm12  ;;  %v8556_v7 = vsel %vm11824_vm2, %v4669_v16, %v4503_v2  ;;  %v1241_v24 = vsel %vm11825_vm6, 1065353216, %v1239_v39  ;;  %v1338_v55 = vxor.u32 2147483648, %v1336_v14  ;;  %v1438_v35 = vsel %vm8501_vm15, 2143289344, %v4081_v54 }
 0x1b2   :  { %vm11826_vm12 = vmmov %vm11824_vm2  ;;  %v8572_v1 = vand.u32 2147483647, %v7746_v33  ;;  %vm11829_vm2 = vcmp.eq.f32.partialorder %v4227_v0, 0  ;;  %vm11830_vm6 = vcmp.eq.f32.partialorder %v7686_v30, 1065353216  ;;  %vm11833_vm15 = vcmp.lt.s32.totalorder %v7712_v10, 0 }
 0x1b3   :  { %vm8567_vm14 = vmand %vm11826_vm12, %vm11805_vm3  ;;  %4094 = vlog2.f32 %v8507_v6  ;;  %vm11837_vm0 = vcmp.eq.f32.partialorder %v7689_v45, 2139095040  ;;  %v11861_v62 = vmov 0  ;;  %v11872_v44 = vmov 0 }
 0x1b4   :  { %vm8578_vm13 = vmor %vm11830_vm6, %vm11829_vm2  ;;  %vm10746_vm2 = vcmp.lt.f32.partialorder %v7722_v8, 0  ;;  %v1143_v27 = vsel %vm11837_vm0, %v8192_v53, %v1138_v15  ;;  %v1725_v53 = vmul.f32 %v4083_v40, %v4227_v0  ;;  %vm11841_vm0 = vcmp.eq.f32.partialorder %v4227_v0, 1065353216 }
 0x1b5   :  { %vm8586_vm7 = vmand %vm11833_vm15, %vm11645_vm1  ;;  %vm11838_vm15 = vcmp.ne.f32.partialorder %v7712_v10, %v7712_v10  ;;  %v8622_v45 = vsel %vm10746_vm2, %v4669_v16, %v4503_v2  ;;  %v8628_v28 = vsel %vm11841_vm0, %v7642_v4, %v1045_v43  ;;  %v1542_v47 = vsel %vm8567_vm14, 2143289344, %v4085_v46  ;;  %v4087_v4 = vpop.eup %4086 }
 0x1b6   :  { %vm11836_vm12 = vmor %vm8403_vm10, %vm8423_vm4  ;;  %11842 = vst [vmem:[#allocation7_spill] sm:$0xff] %v8628_v28  ;;  %vm11844_vm4 = vcmp.eq.f32.partialorder %v7714_v50, 0  ;;  %vm11846_vm6 = vcmp.lt.f32.partialorder %v4227_v0, 0  ;;  %v1339_v43 = vsel %vm8586_vm7, %v1338_v55, %v1336_v14  ;;  %4096 = vlog2.f32 %v8572_v1 }
 0x1b7   :  { %v1343_v60 = vsel %vm11836_vm12, 2139095040, %v10838_v23  ;;  %vm8607_vm11 = vmor %vm11838_vm15, %vm11655_vm9  ;;  %vm11843_vm15 = vcmp.eq.f32.partialorder %v4427_v32, 2139095040  ;;  %v1440_v51 = vsel %vm11844_vm4, %v4529_v11, %v1438_v35  ;;  %vm11845_vm12 = vcmp.eq.f32.partialorder %v7720_v9, 0  ;;  %v4089_v35 = vpop.eup %4088 }
 0x1b8   :  { %v11840_v29 = vsel %vm8607_vm11, 4294967295, %v11839_v29  ;;  %v1242_v15 = vsel %vm11843_vm15, %v1241_v24, %v1235_v12  ;;  %vm8641_vm10 = vmand %vm11846_vm6, %vm11845_vm12  ;;  %vm11849_vm15 = vcmp.eq.f32.partialorder %v7712_v10, 3212836864  ;;  %vm11850_vm4 = vcmp.gt.f32.partialorder %v7960_v58, 1065353216 }
 0x1b9   :  { %v1345_v12 = vsel %vm11849_vm15, 1065353216, %v1343_v60  ;;  %vm11851_vm14 = vmmov %vm11846_vm6  ;;  %v8661_v24 = vand.u32 2147483647, %v7779_v17  ;;  %vm11854_vm7 = vnez %v11792_v21  ;;  %v4091_v21 = vpop.eup %4090  ;;  %vm11859_vm15 = vcmp.eq.f32.partialorder %v4227_v0, 0 }
 0x1ba   :  { %vm8654_vm2 = vmxor %vm11851_vm14, %vm11850_vm4  ;;  %v1147_v14 = vsel %vm11854_vm7, 2143289344, %v1143_v27  ;;  %vm11855_vm4 = vcmp.lt.f32.partialorder %v7722_v8, 0  ;;  %vm11858_vm7 = vcmp.eq.f32.partialorder %v7736_v37, 2139095040  ;;  %vm11860_vm12 = vcmp.eq.f32.partialorder %v7712_v10, 1065353216 }
 0x1bb   :  { %vm8671_vm14 = vmand %vm11855_vm4, %vm11805_vm3  ;;  %v1247_v27 = vsel %vm11858_vm7, %v8277_v22, %v1242_v15  ;;  %vm11863_vm6 = vcmp.lt.s32.totalorder %v7714_v50, 0  ;;  %v1442_v60 = vxor.u32 2147483648, %v1440_v51  ;;  %vm11866_vm7 = vcmp.eq.f32.partialorder %v7720_v9, 0  ;;  %v4093_v22 = vpop.eup %4092 }
 0x1bc   :  { %vm8686_vm4 = vmor %vm11860_vm12, %vm11859_vm15  ;;  %v1544_v37 = vsel %vm11866_vm7, %v4529_v11, %v1542_v47  ;;  %4098 = vpow2.f32 %v1725_v53  ;;  %vm11867_vm12 = vcmp.eq.f32.partialorder %v4427_v32, 2139095040  ;;  %v1646_v53 = vsel %vm8671_vm14, 2143289344, %v4089_v35 }
 0x1bd   :  { %v11862_v62 = vsel %vm8686_vm4, 4294967295, %v11861_v62  ;;  %vm8694_vm0 = vmand %vm11863_vm6, %vm11645_vm1  ;;  %v1346_v15 = vsel %vm11867_vm12, %v1345_v12, %v1339_v43  ;;  %vm11869_vm12 = vcmp.lt.f32.partialorder %v7731_v18, 0  ;;  %vm11875_vm11 = vcmp.lt.f32.partialorder %v4227_v0, 0 }
 0x1be   :  { %vm11868_vm15 = vmor %vm8527_vm8, %vm8546_vm5  ;;  %v8720_v47 = vsel %vm11869_vm12, %v4669_v16, %v4503_v2  ;;  %vm11870_vm5 = vnez %v11803_v57  ;;  %vm11871_vm8 = vcmp.ne.f32.partialorder %v7714_v50, %v7714_v50  ;;  %vm11874_vm12 = vcmp.eq.f32.partialorder %v7722_v8, 0 }
 0x1bf   :  { %v1447_v28 = vsel %vm11868_vm15, 2139095040, %v10838_v23  ;;  %v1149_v19 = vsel %vm11870_vm5, 1065353216, %v1147_v14  ;;  %vm8729_vm15 = vmor %vm11871_vm8, %vm11655_vm9  ;;  %v1829_v43 = vmul.f32 %v4087_v4, %v4227_v0  ;;  %4100 = vlog2.f32 %v8661_v24 }
 0x1c0   :  { %v11873_v44 = vsel %vm8729_vm15, 4294967295, %v11872_v44  ;;  %vm8740_vm4 = vmand %vm11875_vm11, %vm11874_vm12  ;;  %vm11878_vm5 = vnez %v11813_v34  ;;  %v1546_v14 = vxor.u32 2147483648, %v1544_v37  ;;  %vm11879_vm8 = vcmp.gt.f32.partialorder %v8077_v42, 1065353216 }
 0x1c1   :  { %v1251_v12 = vsel %vm11878_vm5, 2143289344, %v1247_v27  ;;  %vm11880_vm14 = vmmov %vm11875_vm11  ;;  %v2037_v55 = vmul.f32 %v4091_v21, %v4227_v0  ;;  %vm11883_vm12 = vcmp.eq.f32.partialorder %v7804_v13, 2139095040  ;;  %v1443_v34 = vsel %vm8694_vm0, %v1442_v60, %v1440_v51  ;;  %v4095_v21 = vpop.eup %4094 }
 0x1c2   :  { %vm8752_vm7 = vmxor %vm11880_vm14, %vm11879_vm8  ;;  %v1351_v4 = vsel %vm11883_vm12, %v8371_v20, %v1346_v15  ;;  %vm11884_vm5 = vcmp.eq.f32.partialorder %v7714_v50, 3212836864  ;;  %vm11885_vm8 = vcmp.lt.s32.totalorder %v7720_v9, 0  ;;  %v2141_v61 = vmul.f32 %v4093_v22, %v4227_v0 }
 0x1c3   :  { %v1449_v27 = vsel %vm11884_vm5, 1065353216, %v1447_v28  ;;  %vm1545_vm14 = vmand %vm11885_vm8, %vm11645_vm1  ;;  %vm11886_vm11 = vcmp.eq.f32.partialorder %v4227_v0, 0  ;;  %vm11887_vm12 = vcmp.eq.f32.partialorder %v7714_v50, 1065353216  ;;  %vm11891_vm5 = vcmp.eq.f32.partialorder %v7722_v8, 0  ;;  %v11892_v28 = vld [vmem:[#allocation14_spill] sm:$0xff] }
 0x1c4   :  { %vm8775_vm15 = vmor %vm11887_vm12, %vm11886_vm11  ;;  %v1648_v51 = vsel %vm11891_vm5, %v4529_v11, %v1646_v53  ;;  %v8790_v54 = vand.u32 2147483647, %v11892_v28  ;;  %vm11893_vm11 = vcmp.eq.f32.partialorder %v4227_v0, 1065353216  ;;  %v1253_v40 = vsel %vm8578_vm13, 1065353216, %v1251_v12 }
 0x1c5   :  { %vm11890_vm0 = vmor %vm8641_vm10, %vm8654_vm2  ;;  %v8795_v60 = vsel %vm11893_vm11, %v7667_v41, %v1149_v19  ;;  %4102 = vpow2.f32 %v1829_v43  ;;  %vm11895_vm12 = vnez %v11840_v29  ;;  %v1547_v15 = vsel %vm1545_vm14, %v1546_v14, %v1544_v37  ;;  %v4097_v29 = vpop.eup %4096 }
 0x1c6   :  { %v1551_v20 = vsel %vm11890_vm0, 2139095040, %v10838_v23  ;;  %11894 = vst [vmem:[#allocation27_spill] sm:$0xff] %v8795_v60  ;;  %vm1654_vm2 = vmor %vm8740_vm4, %vm8752_vm7  ;;  %v1355_v46 = vsel %vm11895_vm12, 2143289344, %v1351_v4  ;;  %vm11896_vm0 = vcmp.eq.f32.partialorder %v4427_v32, 2139095040  ;;  %vm11897_vm13 = vcmp.ne.f32.partialorder %v7720_v9, %v7720_v9 }
 0x1c7   :  { %v1450_v22 = vsel %vm11896_vm0, %v1449_v27, %v1443_v34  ;;  %vm8813_vm5 = vmor %vm11897_vm13, %vm11655_vm9  ;;  %vm11900_vm6 = vcmp.eq.f32.partialorder %v7731_v18, 0  ;;  %vm11901_vm10 = vcmp.lt.f32.partialorder %v4227_v0, 0  ;;  %4104 = vpow2.f32 %v2037_v55  ;;  %v4099_v55 = vpop.eup %4098 }
 0x1c8   :  { %vm8822_vm12 = vmand %vm11901_vm10, %vm11900_vm6  ;;  %vm11904_vm14 = vcmp.eq.f32.partialorder %v7720_v9, 3212836864  ;;  %v1650_v19 = vxor.u32 2147483648, %v1648_v51  ;;  %vm11905_vm0 = vcmp.gt.f32.partialorder %v8280_v5, 1065353216  ;;  %v11907_v53 = vmov 0 }
 0x1c9   :  { %v1553_v37 = vsel %vm11904_vm14, 1065353216, %v1551_v20  ;;  %vm11906_vm13 = vmmov %vm11901_vm10  ;;  %4106 = vpow2.f32 %v2141_v61  ;;  %v2245_v43 = vmul.f32 %v4095_v21, %v4227_v0  ;;  %vm11909_vm6 = vcmp.lt.s32.totalorder %v7722_v8, 0  ;;  %v4101_v20 = vpop.eup %4100 }
 0x1ca   :  { %vm8832_vm8 = vmxor %vm11906_vm13, %vm11905_vm0  ;;  %v1655_v14 = vsel %vm1654_vm2, 2139095040, %v10838_v23  ;;  %vm11912_vm14 = vcmp.lt.f32.partialorder %v7744_v25, 0  ;;  %4108 = vlog2.f32 %v8790_v54  ;;  %vm11915_vm4 = vcmp.eq.f32.partialorder %v7912_v31, 2139095040 }
 0x1cb   :  { %v11908_v53 = vsel %vm8832_vm8, 4294967295, %v11907_v53  ;;  %vm8841_vm10 = vmand %vm11909_vm6, %vm11645_vm1  ;;  %v8855_v61 = vsel %vm11912_vm14, %v4669_v16, %v4503_v2  ;;  %v1455_v57 = vsel %vm11915_vm4, %v8452_v59, %v1450_v22  ;;  %vm11916_vm7 = vcmp.eq.f32.partialorder %v4227_v0, 0 }
 0x1cc   :  { %vm11913_vm13 = vmmov %vm11893_vm11  ;;  %vm11917_vm2 = vcmp.eq.f32.partialorder %v7720_v9, 1065353216  ;;  %v11918_v35 = vmov 0  ;;  %vm11920_vm14 = vcmp.ne.f32.partialorder %v7722_v8, %v7722_v8  ;;  %v1933_v27 = vmul.f32 %v4097_v29, %v4227_v0 }
 0x1cd   :  { %v8862_v4 = vsel %vm11913_vm13, %v7686_v30, %v1253_v40  ;;  %vm8871_vm6 = vmor %vm11917_vm2, %vm11916_vm7  ;;  %v11921_v30 = vmov 0  ;;  %vm11923_vm13 = vcmp.lt.f32.partialorder %v7731_v18, 0  ;;  %vm11928_vm2 = vcmp.lt.f32.partialorder %v7746_v33, 0 }
 0x1ce   :  { %11914 = vst [vmem:[#allocation30_spill] sm:$0xff] %v8862_v4  ;;  %v11919_v35 = vsel %vm8871_vm6, 4294967295, %v11918_v35  ;;  %vm8880_vm11 = vmor %vm11920_vm14, %vm11655_vm9  ;;  %vm11926_vm9 = vnez %v11862_v62  ;;  %v8910_v21 = vsel %vm11928_vm2, %v4669_v16, %v4503_v2  ;;  %v1651_v62 = vsel %vm8841_vm10, %v1650_v19, %v1648_v51  ;;  %v11937_v51 = vld [vmem:[#allocation31_spill] sm:$0xff] }
 0x1cf   :  { %v11922_v30 = vsel %vm8880_vm11, 4294967295, %v11921_v30  ;;  %vm8888_vm4 = vmand %vm11923_vm13, %vm11805_vm3  ;;  %v1357_v59 = vsel %vm11926_vm9, 1065353216, %v1355_v46  ;;  %vm11927_vm11 = vcmp.eq.f32.partialorder %v4427_v32, 2139095040  ;;  %11929 = vst [vmem:[#allocation34_spill] sm:$0xff] %v8910_v21  ;;  %vm11930_vm9 = vcmp.eq.f32.partialorder %v7722_v8, 3212836864  ;;  %v8989_v31 = vpop.eup %4102 }
 0x1d0   :  { %v1554_v34 = vsel %vm11927_vm11, %v1553_v37, %v1547_v15  ;;  %v1657_v40 = vsel %vm11930_vm9, 1065353216, %v1655_v14  ;;  %vm11931_vm11 = vcmp.lt.s32.totalorder %v7731_v18, 0  ;;  %v11932_v46 = vmov 0 }
 0x1d1   :  { %vm8920_vm7 = vmand %vm11931_vm11, %vm11645_vm1  ;;  %vm11934_vm2 = vcmp.lt.f32.partialorder %v7744_v25, 0  ;;  %v11935_v22 = vmov 0  ;;  %4110 = vpow2.f32 %v2245_v43  ;;  %v8934_v15 = vand.u32 2147483647, %v11937_v51 }
 0x1d2   :  { %v11933_v46 = vsel %vm8920_vm7, 4294967295, %v11932_v46  ;;  %vm8929_vm14 = vmand %vm11934_vm2, %vm11805_vm3  ;;  %vm11938_vm10 = vnez %v11873_v44  ;;  %vm11939_vm9 = vcmp.eq.f32.partialorder %v4227_v0, 0  ;;  %vm11940_vm11 = vcmp.eq.f32.partialorder %v7722_v8, 1065353216 }
 0x1d3   :  { %v11936_v22 = vsel %vm8929_vm14, 4294967295, %v11935_v22  ;;  %v1459_v29 = vsel %vm11938_vm10, 2143289344, %v1455_v57  ;;  %vm8942_vm13 = vmor %vm11940_vm11, %vm11939_vm9  ;;  %v11941_v37 = vmov 0  ;;  %v1750_v19 = vsel %vm8888_vm4, 2143289344, %v4099_v55 }
 0x1d4   :  { %v11942_v37 = vsel %vm8942_vm13, 4294967295, %v11941_v37  ;;  %vm11943_vm2 = vcmp.eq.f32.partialorder %v7744_v25, 0  ;;  %vm11944_vm0 = vcmp.lt.f32.partialorder %v4227_v0, 0  ;;  %v11945_v43 = vmov 0 }
 0x1d5   :  { %vm8952_vm7 = vmand %vm11944_vm0, %vm11943_vm2  ;;  %vm11947_vm9 = vcmp.eq.f32.partialorder %v4227_v0, 1065353216  ;;  %vm11949_vm11 = vcmp.gt.f32.partialorder %v8374_v56, 1065353216  ;;  %v11951_v12 = vmov 0  ;;  %vm11953_vm14 = vcmp.eq.f32.partialorder %v7960_v58, 2139095040 }
 0x1d6   :  { %v11946_v43 = vsel %vm8952_vm7, 4294967295, %v11945_v43  ;;  %v8961_v44 = vsel %vm11947_vm9, %v7712_v10, %v1357_v59  ;;  %vm11950_vm4 = vmmov %vm11944_vm0  ;;  %v1559_v14 = vsel %vm11953_vm14, %v8556_v7, %v1554_v34  ;;  %vm11954_vm9 = vcmp.eq.f32.partialorder %v4427_v32, 2139095040  ;;  %v4105_v34 = vpop.eup %4104 }
 0x1d7   :  { %11948 = vst [vmem:[#allocation24_spill] sm:$0xff] %v8961_v44  ;;  %vm8967_vm13 = vmxor %vm11950_vm4, %vm11949_vm11  ;;  %v1658_v10 = vsel %vm11954_vm9, %v1657_v40, %v1651_v62  ;;  %4112 = vpow2.f32 %v1933_v27  ;;  %vm11955_vm11 = vcmp.eq.f32.partialorder %v7746_v33, 0  ;;  %v2349_v57 = vmul.f32 %v4101_v20, %v4227_v0  ;;  %v4107_v62 = vpop.eup %4106 }
 0x1d8   :  { %v11952_v12 = vsel %vm8967_vm13, 4294967295, %v11951_v12  ;;  %vm11956_vm4 = vmmov %vm11944_vm0  ;;  %v1461_v58 = vsel %vm8775_vm15, 1065353216, %v1459_v29  ;;  %vm11959_vm14 = vcmp.eq.f32.partialorder %v7731_v18, 0  ;;  %vm11960_vm6 = vcmp.gt.f32.partialorder %v8572_v1, 1065353216 }
 0x1d9   :  { %vm8984_vm8 = vmand %vm11956_vm4, %vm11955_vm11  ;;  %v1752_v7 = vsel %vm11959_vm14, %v4529_v11, %v1750_v19  ;;  %v11962_v59 = vmov 0  ;;  %vm11964_vm2 = vcmp.lt.f32.partialorder %v7761_v38, 0  ;;  %4114 = vlog2.f32 %v8934_v15 }
 0x1da   :  { %vm11961_vm11 = vmmov %vm11944_vm0  ;;  %v9009_v13 = vsel %vm11964_vm2, %v4669_v16, %v4503_v2  ;;  %vm11965_vm15 = vcmp.lt.f32.partialorder %v7746_v33, 0  ;;  %v11966_v27 = vmov 0  ;;  %v1563_v40 = vsel %vm8813_vm5, 2143289344, %v1559_v14 }
 0x1db   :  { %vm9001_vm4 = vmxor %vm11961_vm11, %vm11960_vm6  ;;  %vm11971_vm10 = vcmp.eq.f32.partialorder %v8077_v42, 2139095040  ;;  %v4109_v42 = vpop.eup %4108  ;;  %v1754_v14 = vxor.u32 2147483648, %v1752_v7  ;;  %vm11982_vm5 = vcmp.lt.f32.partialorder %v4227_v0, 0  ;;  %4116 = vpow2.f32 %v2349_v57 }
 0x1dc   :  { %v11963_v59 = vsel %vm9001_vm4, 4294967295, %v11962_v59  ;;  %vm9016_vm14 = vmand %vm11965_vm15, %vm11805_vm3  ;;  %v1663_v29 = vsel %vm11971_vm10, %v8622_v45, %v1658_v10  ;;  %vm11976_vm10 = vcmp.eq.f32.partialorder %v4227_v0, 1065353216  ;;  %v11979_v10 = vmov 0 }
 0x1dd   :  { %v11967_v27 = vsel %vm9016_vm14, 4294967295, %v11966_v27  ;;  %vm11968_vm6 = vmmov %vm11964_vm2  ;;  %vm11972_vm2 = vcmp.lt.f32.partialorder %v7763_v26, 0  ;;  %v9057_v45 = vsel %vm11976_vm10, %v7714_v50, %v1461_v58  ;;  %vm11981_vm15 = vcmp.eq.f32.partialorder %v7761_v38, 0  ;;  %v11985_v58 = vld [vmem:[#allocation32_spill] sm:$0xff] }
 0x1de   :  { %vm9024_vm11 = vmand %vm11968_vm6, %vm11805_vm3  ;;  %11977 = vst [vmem:[#allocation6_spill] sm:$0xff] %v9057_v45  ;;  %vm11978_vm6 = vcmp.lt.s32.totalorder %v7761_v38, 0  ;;  %v9083_v4 = vand.u32 2147483647, %v11985_v58  ;;  %vm11998_vm13 = vcmp.lt.s32.totalorder %v7744_v25, 0  ;;  %v11999_v20 = vmov 0 }
 0x1df   :  { %vm9043_vm14 = vmand %vm11972_vm2, %vm11805_vm3  ;;  %v2062_v21 = vsel %vm9024_vm11, 2143289344, %v4105_v34  ;;  %vm11994_vm11 = vnez %v10794_v48  ;;  %v11996_v34 = vmov 0  ;;  %v2453_v45 = vmul.f32 %v4109_v42, %v4227_v0  ;;  %v12363_v48 = vld [vmem:[#allocation11_spill] sm:$0xff] }
 0x1e0   :  { %vm11975_vm0 = vmmov %vm11972_vm2  ;;  %vm11989_vm2 = vcmp.lt.f32.partialorder %v4227_v0, 0  ;;  %4118 = vlog2.f32 %v9083_v4  ;;  %v12045_v50 = vmov 0 }
 0x1e1   :  { %v9051_v41 = vsel %vm11975_vm0, %v4669_v16, %v4503_v2  ;;  %vm9067_vm0 = vmand %vm11978_vm6, %vm11645_vm1  ;;  %vm11986_vm6 = vnez %v11908_v53  ;;  %4120 = vpow2.f32 %v2453_v45 }
 0x1e2   :  { %v11980_v10 = vsel %vm9067_vm0, 4294967295, %v11979_v10  ;;  %vm9075_vm10 = vmand %vm11982_vm5, %vm11981_vm15  ;;  %vm11988_vm5 = vcmp.gt.f32.partialorder %v8408_v36, 1065353216 }
 0x1e3   :  { %vm11987_vm0 = vmor %vm8822_vm12, %vm11986_vm6  ;;  %vm11993_vm6 = vnez %v11922_v30 }
 0x1e4   :  { %v1759_v60 = vsel %vm11987_vm0, 2139095040, %v10838_v23  ;;  %vm9098_vm9 = vmxor %vm11989_vm2, %vm11988_vm5  ;;  %vm11992_vm0 = vnez %v11919_v35  ;;  %v1667_v53 = vsel %vm11993_vm6, 2143289344, %v1663_v29  ;;  %vm11995_vm2 = vcmp.ne.f32.partialorder %v7731_v18, %v7731_v18  ;;  %v4111_v29 = vpop.eup %4110 }
 0x1e5   :  { %v1565_v39 = vsel %vm11992_vm0, 1065353216, %v1563_v40  ;;  %vm9114_vm5 = vmor %vm11995_vm2, %vm11994_vm11  ;;  %v2166_v35 = vsel %vm9043_vm14, 2143289344, %v4107_v62  ;;  %vm12001_vm6 = vcmp.eq.f32.partialorder %v7763_v26, 0  ;;  %vm12002_vm2 = vcmp.lt.f32.partialorder %v4227_v0, 0 }
 0x1e6   :  { %v11997_v34 = vsel %vm9114_vm5, 4294967295, %v11996_v34  ;;  %vm9122_vm15 = vmand %vm11998_vm13, %vm11645_vm1  ;;  %vm12005_vm13 = vcmp.lt.f32.partialorder %v7777_v49, 0  ;;  %vm12006_vm14 = vnez %v11936_v22  ;;  %vm12007_vm0 = vcmp.gt.f32.partialorder %v8430_v3, 1065353216 }
 0x1e7   :  { %v12000_v20 = vsel %vm9122_vm15, 4294967295, %v11999_v20  ;;  %vm9133_vm12 = vmand %vm12002_vm2, %vm12001_vm6  ;;  %v9142_v40 = vsel %vm12005_vm13, %v4669_v16, %v4503_v2  ;;  %v1854_v62 = vsel %vm12006_vm14, 2143289344, %v8989_v31  ;;  %vm12011_vm13 = vnez %v11933_v46 }
 0x1e8   :  { %vm12008_vm6 = vmmov %vm12002_vm2  ;;  %v1755_v44 = vsel %vm12011_vm13, %v1754_v14, %v1752_v7  ;;  %vm12012_vm14 = vcmp.eq.f32.partialorder %v7731_v18, 3212836864  ;;  %vm12014_vm13 = vcmp.eq.f32.partialorder %v4227_v0, 1065353216  ;;  %vm12018_vm5 = vcmp.lt.f32.partialorder %v7777_v49, 0 }
 0x1e9   :  { %vm9151_vm2 = vmxor %vm12008_vm6, %vm12007_vm0  ;;  %v1761_v22 = vsel %vm12012_vm14, 1065353216, %v1759_v60  ;;  %vm12013_vm6 = vcmp.eq.f32.partialorder %v7761_v38, 0  ;;  %v9177_v60 = vsel %vm12014_vm13, %v7720_v9, %v1565_v39  ;;  %vm12016_vm14 = vnez %v11942_v37  ;;  %v4113_v9 = vpop.eup %4112 }
 0x1ea   :  { %v2064_v31 = vsel %vm12013_vm6, %v4529_v11, %v2062_v21  ;;  %12015 = vst [vmem:[#allocation25_spill] sm:$0xff] %v9177_v60  ;;  %v1669_v46 = vsel %vm12016_vm14, 1065353216, %v1667_v53  ;;  %vm12017_vm0 = vcmp.eq.f32.partialorder %v7763_v26, 0  ;;  %vm9192_vm7 = vmand %vm12018_vm5, %vm11805_vm3  ;;  %vm12021_vm6 = vcmp.eq.f32.partialorder %v7744_v25, 0  ;;  %v4115_v39 = vpop.eup %4114 }
 0x1eb   :  { %v2168_v21 = vsel %vm12017_vm0, %v4529_v11, %v2166_v35  ;;  %v1856_v37 = vsel %vm12021_vm6, %v4529_v11, %v1854_v62  ;;  %v2270_v42 = vsel %vm9192_vm7, 2143289344, %v4111_v29  ;;  %vm12022_vm6 = vcmp.lt.f32.partialorder %v7779_v17, 0  ;;  %v4117_v60 = vpop.eup %4116 }
 0x1ec   :  { %v9215_v14 = vsel %vm12022_vm6, %v4669_v16, %v4503_v2  ;;  %vm12024_vm15 = vcmp.eq.f32.partialorder %v4427_v32, 2139095040  ;;  %vm12025_vm0 = vcmp.eq.f32.partialorder %v4227_v0, 0  ;;  %vm12026_vm5 = vcmp.eq.f32.partialorder %v7731_v18, 1065353216 }
 0x1ed   :  { %12023 = vst [vmem:[#allocation20_spill] sm:$0xff] %v9215_v14  ;;  %v1762_v53 = vsel %vm12024_vm15, %v1761_v22, %v1755_v44  ;;  %vm9223_vm4 = vmor %vm12026_vm5, %vm12025_vm0  ;;  %v12027_v35 = vmov 0  ;;  %v2066_v29 = vxor.u32 2147483648, %v2064_v31  ;;  %vm12029_vm13 = vcmp.eq.f32.partialorder %v7777_v49, 0  ;;  %v12124_v22 = vld [vmem:[#allocation17_spill] sm:$0xff] }
 0x1ee   :  { %v12028_v35 = vsel %vm9223_vm4, 4294967295, %v12027_v35  ;;  %vm12030_vm6 = vcmp.lt.f32.partialorder %v4227_v0, 0  ;;  %vm12033_vm0 = vcmp.eq.f32.partialorder %v4227_v0, 1065353216  ;;  %vm12035_vm7 = vcmp.lt.s32.totalorder %v7746_v33, 0 }
 0x1ef   :  { %vm9232_vm14 = vmand %vm12030_vm6, %vm12029_vm13  ;;  %v9241_v44 = vsel %vm12033_vm0, %v7722_v8, %v1669_v46  ;;  %v2170_v45 = vxor.u32 2147483648, %v2168_v21  ;;  %vm12039_vm5 = vcmp.gt.f32.partialorder %v8507_v6, 1065353216  ;;  %v1858_v7 = vxor.u32 2147483648, %v1856_v37 }
 0x1f0   :  { %12034 = vst [vmem:[#allocation14_spill] sm:$0xff] %v9241_v44  ;;  %vm9248_vm4 = vmand %vm12035_vm7, %vm11645_vm1  ;;  %v2557_v19 = vmul.f32 %v4115_v39, %v4227_v0  ;;  %v12060_v39 = vmov 0  ;;  %v12082_v62 = vmov 0 }
 0x1f1   :  { %vm12038_vm0 = vmor %vm9075_vm10, %vm9098_vm9  ;;  %vm12044_vm9 = vcmp.ne.f32.partialorder %v7761_v38, %v7761_v38 }
 0x1f2   :  { %v2071_v8 = vsel %vm12038_vm0, 2139095040, %v10838_v23  ;;  %vm12040_vm7 = vmmov %vm12030_vm6  ;;  %vm12043_vm6 = vnez %v11967_v27  ;;  %4122 = vpow2.f32 %v2557_v19 }
 0x1f3   :  { %vm9265_vm15 = vmxor %vm12040_vm7, %vm12039_vm5  ;;  %v1958_v44 = vsel %vm12043_vm6, 2143289344, %v4113_v9  ;;  %vm12047_vm5 = vcmp.lt.s32.totalorder %v7763_v26, 0 }
 0x1f4   :  { %vm9277_vm10 = vmor %vm12044_vm9, %vm11994_vm11  ;;  %vm12055_vm9 = vnez %v11952_v12 }
 0x1f5   :  { %v12046_v50 = vsel %vm9277_vm10, 4294967295, %v12045_v50  ;;  %vm9285_vm0 = vmand %vm12047_vm5, %vm11645_vm1  ;;  %vm12052_vm5 = vcmp.eq.f32.partialorder %v8280_v5, 2139095040  ;;  %vm12058_vm10 = vcmp.eq.f32.partialorder %v7761_v38, 3212836864 }
 0x1f6   :  { %vm12050_vm6 = vmor %vm9133_vm12, %vm9151_vm2  ;;  %v1767_v14 = vsel %vm12052_vm5, %v8720_v47, %v1762_v53  ;;  %vm12057_vm2 = vnez %v11980_v10  ;;  %v2171_v53 = vsel %vm9285_vm0, %v2170_v45, %v2168_v21  ;;  %vm12070_vm5 = vnez %v11997_v34 }
 0x1f7   :  { %v2175_v27 = vsel %vm12050_vm6, 2139095040, %v10838_v23  ;;  %vm12051_vm7 = vmmov %vm12029_vm13  ;;  %vm12053_vm6 = vcmp.lt.f32.partialorder %v11892_v28, 0  ;;  %vm12054_vm13 = vnez %v11946_v43  ;;  %v2067_v47 = vsel %vm12057_vm2, %v2066_v29, %v2064_v31  ;;  %v12062_v43 = vld [vmem:[#allocation15_spill] sm:$0xff] }
 0x1f8   :  { %v2272_v9 = vsel %vm12051_vm7, %v4529_v11, %v2270_v42  ;;  %v9313_v30 = vsel %vm12053_vm6, %v4669_v16, %v4503_v2  ;;  %vm12056_vm12 = vmor %vm12054_vm13, %vm12055_vm9  ;;  %v2073_v42 = vsel %vm12058_vm10, 1065353216, %v2071_v8  ;;  %vm12059_vm6 = vcmp.ne.f32.partialorder %v7763_v26, %v7763_v26 }
 0x1f9   :  { %v1863_v5 = vsel %vm12056_vm12, 2139095040, %v10838_v23  ;;  %vm9333_vm7 = vmor %vm12059_vm6, %vm11994_vm11  ;;  %v9340_v12 = vand.u32 2147483647, %v12062_v43  ;;  %vm12063_vm9 = vcmp.eq.f32.partialorder %v7746_v33, 0  ;;  %vm12064_vm10 = vcmp.eq.f32.partialorder %v4227_v0, 0 }
 0x1fa   :  { %v12061_v39 = vsel %vm9333_vm7, 4294967295, %v12060_v39  ;;  %v1960_v10 = vsel %vm12063_vm9, %v4529_v11, %v1958_v44  ;;  %vm12065_vm12 = vcmp.eq.f32.partialorder %v7761_v38, 1065353216  ;;  %v12066_v31 = vmov 0 }
 0x1fb   :  { %vm9349_vm2 = vmor %vm12065_vm12, %vm12064_vm10  ;;  %vm12068_vm6 = vcmp.eq.f32.partialorder %v7763_v26, 3212836864  ;;  %v2274_v8 = vxor.u32 2147483648, %v2272_v9  ;;  %vm12069_vm13 = vcmp.lt.f32.partialorder %v7779_v17, 0  ;;  %v1771_v44 = vsel %vm12070_vm5, 2143289344, %v1767_v14 }
 0x1fc   :  { %v12067_v31 = vsel %vm9349_vm2, 4294967295, %v12066_v31  ;;  %v2177_v29 = vsel %vm12068_vm6, 1065353216, %v2175_v27  ;;  %vm2373_vm9 = vmand %vm12069_vm13, %vm11805_vm3  ;;  %vm12071_vm10 = vnez %v12000_v20  ;;  %vm12072_vm12 = vcmp.eq.f32.partialorder %v4227_v0, 0 }
 0x1fd   :  { %v1859_v43 = vsel %vm12071_vm10, %v1858_v7, %v1856_v37  ;;  %vm12073_vm2 = vcmp.eq.f32.partialorder %v7763_v26, 1065353216  ;;  %vm12076_vm6 = vcmp.lt.s32.totalorder %v7777_v49, 0  ;;  %vm12079_vm5 = vmor %vm9232_vm14, %vm9265_vm15  ;;  %v2374_v20 = vsel %vm2373_vm9, 2143289344, %v4117_v60  ;;  %v4119_v37 = vpop.eup %4118  ;;  %v12089_v7 = vld [vmem:[#allocation16_spill] sm:$0xff] }
 0x1fe   :  { %vm9369_vm0 = vmor %vm12073_vm2, %vm12072_vm12  ;;  %v2279_v34 = vsel %vm12079_vm5, 2139095040, %v10838_v23  ;;  %vm12080_vm10 = vcmp.eq.f32.partialorder %v4427_v32, 2139095040  ;;  %vm12081_vm12 = vcmp.ne.f32.partialorder %v7777_v49, %v7777_v49  ;;  %vm12084_vm14 = vcmp.eq.f32.partialorder %v7779_v17, 0 }
 0x1ff   :  { %vm9377_vm7 = vmand %vm12076_vm6, %vm11645_vm1  ;;  %v2074_v14 = vsel %vm12080_vm10, %v2073_v42, %v2067_v47  ;;  %v2376_v60 = vsel %vm12084_vm14, %v4529_v11, %v2374_v20  ;;  %vm12086_vm9 = vcmp.lt.f32.partialorder %v4227_v0, 0  ;;  %v9415_v57 = vand.u32 2147483647, %v12089_v7  ;;  %v4121_v7 = vpop.eup %4120 }
 0x200   :  { %vm9397_vm6 = vmor %vm12081_vm12, %vm11994_vm11  ;;  %vm12090_vm12 = vcmp.eq.f32.partialorder %v7744_v25, 3212836864  ;;  %v12092_v47 = vmov 0  ;;  %v1962_v42 = vxor.u32 2147483648, %v1960_v10  ;;  %v2178_v19 = vsel %vm12080_vm10, %v2177_v29, %v2171_v53 }
 0x201   :  { %v12083_v62 = vsel %vm9397_vm6, 4294967295, %v12082_v62  ;;  %vm12085_vm15 = vmmov %vm12084_vm14  ;;  %v1865_v27 = vsel %vm12090_vm12, 1065353216, %v1863_v5  ;;  %vm12091_vm14 = vcmp.ne.f32.partialorder %v7744_v25, %v7744_v25  ;;  %vm12094_vm13 = vcmp.gt.f32.partialorder %v8661_v24, 1065353216 }
 0x202   :  { %vm9408_vm5 = vmand %vm12086_vm9, %vm12085_vm15  ;;  %4124 = vlog2.f32 %v9340_v12  ;;  %v2275_v20 = vsel %vm9377_vm7, %v2274_v8, %v2272_v9  ;;  %vm12098_vm10 = vcmp.eq.f32.partialorder %v7777_v49, 3212836864  ;;  %v2378_v29 = vxor.u32 2147483648, %v2376_v60 }
 0x203   :  { %vm9424_vm15 = vmor %vm12091_vm14, %vm11994_vm11  ;;  %vm12096_vm14 = vnez %v11963_v59  ;;  %v2281_v53 = vsel %vm12098_vm10, 1065353216, %v2279_v34  ;;  %vm12104_vm7 = vcmp.lt.s32.totalorder %v7779_v17, 0  ;;  %vm12107_vm10 = vcmp.lt.f32.partialorder %v11937_v51, 0 }
 0x204   :  { %v12093_v47 = vsel %vm9424_vm15, 4294967295, %v12092_v47  ;;  %vm12095_vm12 = vmmov %vm12086_vm9  ;;  %4126 = vlog2.f32 %v9415_v57 }
 0x205   :  { %vm2381_vm6 = vmxor %vm12095_vm12, %vm12094_vm13  ;;  %vm12099_vm12 = vcmp.eq.f32.partialorder %v8408_v36, 2139095040  ;;  %v9475_v36 = vsel %vm12107_vm10, %v4669_v16, %v4503_v2 }
 0x206   :  { %vm12097_vm15 = vmor %vm8984_vm8, %vm12096_vm14  ;;  %v2079_v55 = vsel %vm12099_vm12, %v9009_v13, %v2074_v14  ;;  %vm12100_vm8 = vcmp.eq.f32.partialorder %v4227_v0, 0  ;;  %v2661_v13 = vmul.f32 %v4119_v37, %v4227_v0  ;;  %vm12108_vm12 = vnez %v12028_v35 }
 0x207   :  { %v1967_v5 = vsel %vm12097_vm15, 2139095040, %v10838_v23  ;;  %vm2382_vm2 = vmor %vm9408_vm5, %vm2381_vm6  ;;  %vm12101_vm15 = vcmp.eq.f32.partialorder %v7777_v49, 1065353216  ;;  %v1773_v45 = vsel %vm12108_vm12, 1065353216, %v1771_v44  ;;  %vm12114_vm12 = vcmp.eq.f32.partialorder %v4227_v0, 0 }
 0x208   :  { %vm9457_vm14 = vmor %vm12101_vm15, %vm12100_vm8  ;;  %v2383_v8 = vsel %vm2382_vm2, 2139095040, %v10838_v23  ;;  %vm12109_vm8 = vcmp.eq.f32.partialorder %v4427_v32, 2139095040  ;;  %vm12110_vm15 = vcmp.eq.f32.partialorder %v8430_v3, 2139095040  ;;  %vm12111_vm2 = vcmp.ne.f32.partialorder %v7779_v17, %v7779_v17 }
 0x209   :  { %vm9465_vm6 = vmand %vm12104_vm7, %vm11645_vm1  ;;  %v1866_v34 = vsel %vm12109_vm8, %v1865_v27, %v1859_v43  ;;  %v2183_v14 = vsel %vm12110_vm15, %v9051_v41, %v2178_v19  ;;  %vm12115_vm8 = vcmp.eq.f32.partialorder %v7744_v25, 1065353216  ;;  %v12116_v3 = vmov 0 }
 0x20a   :  { %vm9490_vm7 = vmor %vm12111_vm2, %vm11994_vm11  ;;  %v1963_v41 = vsel %vm9248_vm4, %v1962_v42, %v1960_v10  ;;  %vm12118_vm15 = vcmp.eq.f32.partialorder %v7746_v33, 3212836864  ;;  %vm12119_vm2 = vcmp.ne.f32.partialorder %v7746_v33, %v7746_v33  ;;  %v12120_v43 = vmov 0 }
 0x20b   :  { %vm9500_vm5 = vmor %vm12115_vm8, %vm12114_vm12  ;;  %v1969_v35 = vsel %vm12118_vm15, 1065353216, %v1967_v5  ;;  %vm12122_vm12 = vcmp.eq.f32.partialorder %v4427_v32, 2139095040  ;;  %vm12123_vm4 = vcmp.lt.f32.partialorder %v11892_v28, 0  ;;  %v9525_v10 = vand.u32 2147483647, %v12124_v22 }
 0x20c   :  { %v12117_v3 = vsel %vm9500_vm5, 4294967295, %v12116_v3  ;;  %vm9513_vm10 = vmor %vm12119_vm2, %vm11994_vm11  ;;  %v2282_v44 = vsel %vm12122_vm12, %v2281_v53, %v2275_v20  ;;  %vm12125_vm15 = vnez %v12046_v50  ;;  %v2379_v27 = vsel %vm9465_vm6, %v2378_v29, %v2376_v60 }
 0x20d   :  { %v12121_v43 = vsel %vm9513_vm10, 4294967295, %v12120_v43  ;;  %vm2477_vm13 = vmand %vm12123_vm4, %vm11805_vm3  ;;  %v2083_v37 = vsel %vm12125_vm15, 2143289344, %v2079_v55  ;;  %vm12126_vm2 = vcmp.eq.f32.partialorder %v7779_v17, 3212836864  ;;  %vm12127_vm12 = vcmp.lt.s32.totalorder %v11892_v28, 0 }
 0x20e   :  { %v2385_v42 = vsel %vm12126_vm2, 1065353216, %v2383_v8  ;;  %v2478_v19 = vsel %vm2477_vm13, 2143289344, %v4121_v7  ;;  %vm9537_vm8 = vmand %vm12127_vm12, %vm11645_vm1  ;;  %vm12130_vm15 = vcmp.eq.f32.partialorder %v4227_v0, 1065353216  ;;  %vm12131_vm6 = vnez %v12061_v39 }
 0x20f   :  { %v9546_v50 = vsel %vm12130_vm15, %v7731_v18, %v1773_v45  ;;  %v2187_v60 = vsel %vm12131_vm6, 2143289344, %v2183_v14  ;;  %vm12132_vm13 = vcmp.eq.f32.partialorder %v4227_v0, 0  ;;  %vm12133_vm2 = vcmp.eq.f32.partialorder %v7779_v17, 1065353216  ;;  %v12152_v45 = vld [vmem:[#allocation23_spill] sm:$0xff] }
 0x210   :  { %vm9554_vm9 = vmor %vm12133_vm2, %vm12132_vm13  ;;  %v12134_v7 = vmov 0  ;;  %vm12136_vm12 = vcmp.eq.f32.partialorder %v11892_v28, 0  ;;  %vm12138_vm15 = vcmp.lt.f32.partialorder %v4227_v0, 0  ;;  %4128 = vpow2.f32 %v2661_v13  ;;  %v12151_v13 = vld [vmem:[#allocation22_spill] sm:$0xff] }
 0x211   :  { %v12135_v7 = vsel %vm9554_vm9, 4294967295, %v12134_v7  ;;  %v2480_v20 = vsel %vm12136_vm12, %v4529_v11, %v2478_v19  ;;  %vm12137_vm4 = vmmov %vm12136_vm12  ;;  %vm12141_vm13 = vcmp.eq.f32.partialorder %v8374_v56, 2139095040  ;;  %vm12142_vm2 = vcmp.eq.f32.partialorder %v8507_v6, 2139095040  ;;  %v4123_v6 = vpop.eup %4122  ;;  %v12166_v19 = vld [vmem:[#allocation34_spill] sm:$0xff] }
 0x212   :  { %vm9565_vm10 = vmand %vm12138_vm15, %vm12137_vm4  ;;  %v1871_v39 = vsel %vm12141_vm13, %v8855_v61, %v1866_v34  ;;  %v2287_v53 = vsel %vm12142_vm2, %v9142_v40, %v2282_v44  ;;  %v2482_v29 = vxor.u32 2147483648, %v2480_v20  ;;  %vm12143_vm12 = vcmp.gt.f32.partialorder %v8790_v54, 1065353216  ;;  %v4125_v34 = vpop.eup %4124 }
 0x213   :  { %vm12144_vm4 = vmmov %vm12138_vm15  ;;  %vm10752_vm9 = vcmp.lt.f32.partialorder %v11985_v58, 0  ;;  %vm12145_vm6 = vcmp.eq.f32.partialorder %v4427_v32, 2139095040  ;;  %vm12146_vm5 = vnez %v12067_v31  ;;  %4130 = vlog2.f32 %v9525_v10 }
 0x214   :  { %vm2485_vm15 = vmxor %vm12144_vm4, %vm12143_vm12  ;;  %v1970_v55 = vsel %vm12145_vm6, %v1969_v35, %v1963_v41  ;;  %v2085_v9 = vsel %vm12146_vm5, 1065353216, %v2083_v37  ;;  %v2189_v61 = vsel %vm9369_vm0, 1065353216, %v2187_v60  ;;  %v2483_v40 = vsel %vm9537_vm8, %v2482_v29, %v2480_v20  ;;  %v12163_v37 = vld [vmem:[#allocation24_spill] sm:$0xff]  ;;  %v4127_v29 = vpop.eup %4126 }
 0x215   :  { %vm12147_vm13 = vmmov %vm12145_vm6  ;;  %vm12148_vm5 = vcmp.ne.f32.partialorder %v11892_v28, %v11892_v28  ;;  %v189_v21 = vadd.f32 %v12152_v45, %v12151_v13  ;;  %vm12153_vm0 = vcmp.eq.f32.partialorder %v4227_v0, 0  ;;  %vm12154_vm8 = vcmp.eq.f32.partialorder %v7746_v33, 1065353216  ;;  %v12168_v60 = vld [vmem:[#allocation20_spill] sm:$0xff]  ;;  %v12188_v13 = vld [vmem:[#allocation25_spill] sm:$0xff] }
 0x216   :  { %v2386_v56 = vsel %vm12147_vm13, %v2385_v42, %v2379_v27  ;;  %vm2486_vm2 = vmor %vm9565_vm10, %vm2485_vm15  ;;  %vm12157_vm4 = vnez %v12083_v62  ;;  %vm12158_vm15 = vcmp.eq.f32.partialorder %v11892_v28, 3212836864  ;;  %v12164_v27 = vld [vmem:[#allocation6_spill] sm:$0xff]  ;;  %v9649_v18 = vsel %vm10752_vm9, %v4669_v16, %v4503_v2 }
 0x217   :  { %v2487_v31 = vsel %vm2486_vm2, 2139095040, %v10838_v23  ;;  %vm9603_vm10 = vmor %vm12148_vm5, %vm11994_vm11  ;;  %v2291_v41 = vsel %vm12157_vm4, 2143289344, %v2287_v53  ;;  %vm12160_vm2 = vcmp.eq.f32.partialorder %v11892_v28, 1065353216  ;;  %v216_v42 = vadd.f32 %v12164_v27, %v12163_v37 }
 0x218   :  { %vm9614_vm12 = vmor %vm12154_vm8, %vm12153_vm0  ;;  %v2489_v35 = vsel %vm12158_vm15, 1065353216, %v2487_v31  ;;  %vm12167_vm8 = vcmp.eq.f32.partialorder %v8572_v1, 2139095040  ;;  %vm12169_vm4 = vcmp.eq.f32.partialorder %v8661_v24, 2139095040  ;;  %vm12170_vm15 = vcmp.lt.f32.partialorder %v11937_v51, 0 }
 0x219   :  { %vm12159_vm13 = vmmov %vm12153_vm0  ;;  %vm12165_vm0 = vnez %v12093_v47  ;;  %v1975_v5 = vsel %vm12167_vm8, %v12166_v19, %v1970_v55  ;;  %v2391_v20 = vsel %vm12169_vm4, %v12168_v60, %v2386_v56  ;;  %vm12174_vm4 = vcmp.lt.s32.totalorder %v11937_v51, 0  ;;  %v12184_v56 = vld [vmem:[#allocation26_spill] sm:$0xff] }
 0x21a   :  { %vm9626_vm5 = vmor %vm12160_vm2, %vm12159_vm13  ;;  %v1875_v62 = vsel %vm12165_vm0, 2143289344, %v1871_v39  ;;  %vm12171_vm2 = vcmp.eq.f32.partialorder %v4227_v0, 1065353216  ;;  %v2765_v31 = vmul.f32 %v4125_v34, %v4227_v0  ;;  %v217_v45 = vadd.f32 %v12188_v13, %v216_v42  ;;  %v4129_v37 = vpop.eup %4128 }
 0x21b   :  { %vm2581_vm13 = vmand %vm12170_vm15, %vm11805_vm3  ;;  %v2086_v1 = vsel %vm12171_vm2, %v7761_v38, %v2085_v9  ;;  %v12183_v9 = vld [vmem:[#allocation18_spill] sm:$0xff] }
 0x21c   :  { %vm12172_vm0 = vmmov %vm12171_vm2  ;;  %v2582_v39 = vsel %vm2581_vm13, 2143289344, %v4123_v6  ;;  %vm12178_vm2 = vcmp.eq.f32.partialorder %v11937_v51, 0  ;;  %vm12180_vm13 = vcmp.lt.f32.partialorder %v4227_v0, 0  ;;  %v9684_v59 = vand.u32 2147483647, %v12183_v9 }
 0x21d   :  { %v2190_v24 = vsel %vm12172_vm0, %v7763_v26, %v2189_v61  ;;  %vm12173_vm8 = vmmov %vm12145_vm6  ;;  %v2584_v26 = vsel %vm12178_vm2, %v4529_v11, %v2582_v39  ;;  %v190_v6 = vadd.f32 %v12184_v56, %v189_v21  ;;  %v12210_v39 = vld [vmem:[#allocation19_spill] sm:$0xff] }
 0x21e   :  { %v2490_v47 = vsel %vm12173_vm8, %v2489_v35, %v2483_v40  ;;  %vm9663_vm15 = vmand %vm12174_vm4, %vm11645_vm1  ;;  %v2586_v40 = vxor.u32 2147483648, %v2584_v26  ;;  %vm12190_vm4 = vnez %v12121_v43  ;;  %v242_v35 = vadd.f32 %v2190_v24, %v2086_v1 }
 0x21f   :  { %vm12177_vm6 = vmmov %vm9457_vm14  ;;  %vm12189_vm14 = vnez %v12117_v3  ;;  %v1979_v21 = vsel %vm12190_vm4, 2143289344, %v1975_v5  ;;  %4132 = vlog2.f32 %v9684_v59  ;;  %v4131_v5 = vpop.eup %4130  ;;  %v9757_v53 = vand.u32 2147483647, %v12210_v39 }
 0x220   :  { %v2293_v38 = vsel %vm12177_vm6, 1065353216, %v2291_v41  ;;  %vm12179_vm0 = vmmov %vm12178_vm2  ;;  %vm12186_vm2 = vcmp.gt.f32.partialorder %v8934_v15, 1065353216  ;;  %v1877_v41 = vsel %vm12189_vm14, 1065353216, %v1875_v62  ;;  %v2587_v3 = vsel %vm9663_vm15, %v2586_v40, %v2584_v26  ;;  %v12202_v62 = vld [vmem:[#allocation28_spill] sm:$0xff] }
 0x221   :  { %vm9676_vm8 = vmand %vm12180_vm13, %vm12179_vm0  ;;  %vm12193_vm14 = vcmp.ne.f32.partialorder %v11937_v51, %v11937_v51  ;;  %vm12198_vm15 = vcmp.eq.f32.partialorder %v4227_v0, 0  ;;  %v191_v19 = vadd.f32 %v12202_v62, %v190_v6  ;;  %4134 = vpow2.f32 %v2765_v31 }
 0x222   :  { %vm12185_vm6 = vmmov %vm9490_vm7  ;;  %vm2681_vm7 = vcmp.eq.f32.partialorder %v11985_v58, 1065353216  ;;  %v1981_v26 = vsel %vm9614_vm12, 1065353216, %v1979_v21  ;;  %v2973_v14 = vmul.f32 %v4131_v5, %v4227_v0 }
 0x223   :  { %v2395_v61 = vsel %vm12185_vm6, 2143289344, %v2391_v20  ;;  %vm12187_vm0 = vmmov %vm12180_vm13  ;;  %vm12191_vm6 = vcmp.eq.f32.partialorder %v8790_v54, 2139095040  ;;  %v12205_v20 = vld [vmem:[#allocation14_spill] sm:$0xff] }
 0x224   :  { %vm2589_vm13 = vmxor %vm12187_vm0, %vm12186_vm2  ;;  %v2495_v46 = vsel %vm12191_vm6, %v9313_v30, %v2490_v47  ;;  %vm12192_vm0 = vcmp.eq.f32.partialorder %v4227_v0, 1065353216  ;;  %v2869_v30 = vmul.f32 %v4127_v29, %v4227_v0  ;;  %v218_v1 = vadd.f32 %v12205_v20, %v217_v45 }
 0x225   :  { %vm2590_vm9 = vmor %vm9676_vm8, %vm2589_vm13  ;;  %v2294_v34 = vsel %vm12192_vm0, %v7777_v49, %v2293_v38  ;;  %vm12196_vm8 = vnez %v12135_v7  ;;  %vm12197_vm13 = vcmp.eq.f32.partialorder %v11937_v51, 3212836864  ;;  %v2499_v7 = vsel %vm9603_vm10, 2143289344, %v2495_v46 }
 0x226   :  { %v2591_v43 = vsel %vm2590_vm9, 2139095040, %v10838_v23  ;;  %vm9717_vm4 = vmor %vm12193_vm14, %vm11994_vm11  ;;  %v2397_v27 = vsel %vm12196_vm8, 1065353216, %v2395_v61  ;;  %vm12199_vm9 = vcmp.eq.f32.partialorder %v11937_v51, 1065353216  ;;  %vm12203_vm0 = vcmp.eq.f32.partialorder %v4427_v32, 2139095040 }
 0x227   :  { %v2593_v49 = vsel %vm12197_vm13, 1065353216, %v2591_v43  ;;  %vm9730_vm6 = vmor %vm12199_vm9, %vm12198_vm15  ;;  %vm12204_vm14 = vcmp.lt.f32.partialorder %v11985_v58, 0  ;;  %vm12206_vm13 = vcmp.eq.f32.partialorder %v8934_v15, 2139095040  ;;  %vm12207_vm10 = vcmp.lt.s32.totalorder %v11985_v58, 0 }
 0x228   :  { %v2594_v60 = vsel %vm12203_vm0, %v2593_v49, %v2587_v3  ;;  %vm2685_vm8 = vmand %vm12204_vm14, %vm11805_vm3  ;;  %v243_v29 = vadd.f32 %v2294_v34, %v242_v35  ;;  %vm12211_vm9 = vcmp.eq.f32.partialorder %v4227_v0, 1065353216  ;;  %vm12212_vm0 = vcmp.eq.f32.partialorder %v11985_v58, 0  ;;  %v12228_v35 = vld [vmem:[#allocation27_spill] sm:$0xff]  ;;  %v12230_v3 = vld [vmem:[#allocation30_spill] sm:$0xff] }
 0x229   :  { %v2599_v24 = vsel %vm12206_vm13, %v9475_v36, %v2594_v60  ;;  %v2686_v47 = vsel %vm2685_vm8, 2143289344, %v4129_v37  ;;  %vm9752_vm15 = vmand %vm12207_vm10, %vm11645_vm1  ;;  %v2398_v38 = vsel %vm12211_vm9, %v7779_v17, %v2397_v27  ;;  %vm12214_vm8 = vcmp.lt.f32.partialorder %v4227_v0, 0  ;;  %v12215_v36 = vld [vmem:[#allocation15_spill] sm:$0xff]  ;;  %v12232_v49 = vld [vmem:[#allocation21_spill] sm:$0xff] }
 0x22a   :  { %v2688_v15 = vsel %vm12212_vm0, %v4529_v11, %v2686_v47  ;;  %vm12213_vm14 = vmmov %vm12212_vm0  ;;  %vm2783_vm10 = vcmp.lt.f32.partialorder %v12215_v36, 0  ;;  %4136 = vpow2.f32 %v2869_v30  ;;  %v2501_v55 = vsel %vm9626_vm5, 1065353216, %v2499_v7  ;;  %v12218_v17 = vld [vmem:[#allocation7_spill] sm:$0xff]  ;;  %v4133_v30 = vpop.eup %4132 }
 0x22b   :  { %vm2692_vm13 = vmand %vm12214_vm8, %vm12213_vm14  ;;  %v2690_v56 = vxor.u32 2147483648, %v2688_v15  ;;  %vm12216_vm9 = vcmp.gt.f32.partialorder %v9083_v4, 1065353216  ;;  %v192_v6 = vadd.f32 %v12218_v17, %v191_v19  ;;  %vm12219_vm14 = vcmp.eq.f32.partialorder %v4227_v0, 1065353216  ;;  %v4135_v5 = vpop.eup %4134 }
 0x22c   :  { %vm12217_vm2 = vmmov %vm12214_vm8  ;;  %v1878_v61 = vsel %vm12219_vm14, %v7744_v25, %v1877_v41  ;;  %v2603_v40 = vsel %vm9717_vm4, 2143289344, %v2599_v24  ;;  %v219_v44 = vadd.f32 %v9546_v50, %v218_v1  ;;  %4138 = vlog2.f32 %v9757_v53  ;;  %v12241_v1 = vld [vmem:[#allocation16_spill] sm:$0xff] }
 0x22d   :  { %vm2693_vm0 = vmxor %vm12217_vm2, %vm12216_vm9  ;;  %v2691_v31 = vsel %vm9752_vm15, %v2690_v56, %v2688_v15  ;;  %v244_v45 = vadd.f32 %v2398_v38, %v243_v29  ;;  %vm12222_vm2 = vcmp.eq.f32.partialorder %v11985_v58, 3212836864  ;;  %vm12223_vm4 = vcmp.ne.f32.partialorder %v11985_v58, %v11985_v58 }
 0x22e   :  { %vm2694_vm8 = vmor %vm2692_vm13, %vm2693_vm0  ;;  %vm2784_vm13 = vcmp.eq.f32.partialorder %v12215_v36, 0  ;;  %vm12226_vm9 = vcmp.eq.f32.partialorder %v4427_v32, 2139095040  ;;  %vm12227_vm0 = vcmp.eq.f32.partialorder %v4227_v0, 0  ;;  %v193_v37 = vadd.f32 %v12228_v35, %v192_v6 }
 0x22f   :  { %v2695_v13 = vsel %vm2694_vm8, 2139095040, %v10838_v23  ;;  %vm12220_vm12 = vmmov %vm12219_vm14  ;;  %vm2787_vm8 = vcmp.gt.f32.partialorder %v9340_v12, 1065353216  ;;  %4140 = vpow2.f32 %v2973_v14  ;;  %v220_v54 = vadd.f32 %v1878_v61, %v219_v44 }
 0x230   :  { %v1982_v25 = vsel %vm12220_vm12, %v7746_v33, %v1981_v26  ;;  %vm12221_vm5 = vmmov %vm12220_vm12  ;;  %v2697_v21 = vsel %vm12222_vm2, 1065353216, %v2695_v13  ;;  %v74_v33 = vld [vmem:[%s10629_s1 + $0x1b0] sm:$0x1]  ;;  %vm12229_vm12 = vcmp.eq.f32.partialorder %v9083_v4, 2139095040  ;;  %v9829_v42 = vand.u32 2147483647, %v12232_v49 }
 0x231   :  { %v2502_v41 = vsel %vm12221_vm5, %v11892_v28, %v2501_v55  ;;  %vm9803_vm15 = vmor %vm12223_vm4, %vm11994_vm11  ;;  %v2605_v28 = vsel %vm9730_vm6, 1065353216, %v2603_v40  ;;  %v2698_v46 = vsel %vm12226_vm9, %v2697_v21, %v2691_v31  ;;  %vm12231_vm5 = vcmask 1040384  }
 0x232   :  { %vm2708_vm14 = vmor %vm2681_vm7, %vm12227_vm0  ;;  %v2703_v34 = vsel %vm12229_vm12, %v9649_v18, %v2698_v46  ;;  %v195_v43 = vsel %vm12231_vm5, %v12230_v3, 0.0  ;;  %v245_v19 = vadd.f32 %v2502_v41, %v244_v45  ;;  %v9832_v7 = vmax.f32 %v74_v33, 1e-06 }
 0x233   :  { %v2707_v27 = vsel %vm9803_vm15, 2143289344, %v2703_v34  ;;  %vm12233_vm7 = vmmov %vm12231_vm5  ;;  %vm12234_vm6 = vcmp.eq.f32.partialorder %v4227_v0, 1065353216  ;;  %vm2786_vm15 = vcmp.lt.s32.totalorder %v12215_v36, 0  ;;  %vm12238_vm9 = vcmp.lt.f32.partialorder %v4227_v0, 0 }
 0x234   :  { %v221_v62 = vsel %vm12233_vm7, %v1982_v25, 0.0  ;;  %v2606_v4 = vsel %vm12234_vm6, %v11937_v51, %v2605_v28  ;;  %v2709_v18 = vsel %vm2708_vm14, 1065353216, %v2707_v27  ;;  %vm9841_vm2 = vmand %vm2783_vm10, %vm11805_vm3  ;;  %vm2887_vm14 = vcmp.lt.f32.partialorder %v12241_v1, 0  ;;  %v4137_v47 = vpop.eup %4136 }
 0x235   :  { %vm12237_vm4 = vmmov %vm12234_vm6  ;;  %v196_v24 = vadd.f32 %v195_v43, %v193_v37  ;;  %v9871_v8 = vsel %vm2783_vm10, %v4669_v16, %v4503_v2  ;;  %v3077_v29 = vmul.f32 %v4133_v30, %v4227_v0  ;;  %v222_v38 = vadd.f32 %v221_v62, %v220_v54 }
 0x236   :  { %v2710_v20 = vsel %vm12237_vm4, %v11985_v58, %v2709_v18  ;;  %vm9853_vm0 = vmand %vm12238_vm9, %vm2784_vm13  ;;  %v2790_v15 = vsel %vm9841_vm2, 2143289344, %v4135_v5  ;;  %vm2888_vm6 = vcmp.eq.f32.partialorder %v12241_v1, 0  ;;  %4142 = vlog2.f32 %v9829_v42  ;;  %v4139_v17 = vpop.eup %4138 }
 0x237   :  { %vm12242_vm12 = vmmov %vm12238_vm9  ;;  %v246_v26 = vadd.f32 %v2606_v4, %v245_v19  ;;  %vm2891_vm9 = vcmp.gt.f32.partialorder %v9415_v57, 1065353216  ;;  %v9887_v55 = vand.u32 2147483647, %v9832_v7  ;;  %v197_v61 = vrot.slane %v196_v24, 4 }
 0x238   :  { %vm9862_vm5 = vmxor %vm12242_vm12, %vm2787_vm8  ;;  %v2792_v40 = vsel %vm2784_vm13, %v4529_v11, %v2790_v15  ;;  %4144 = vpow2.f32 %v3077_v29  ;;  %v223_v44 = vrot.slane %v222_v38, 4  ;;  %v9923_v45 = vsel %vm2887_vm14, %v4669_v16, %v4503_v2 }
 0x239   :  { %vm2893_vm10 = vmand %vm2887_vm14, %vm11805_vm3  ;;  %v4141_v41 = vpop.eup %4140  ;;  %v3181_v21 = vmul.f32 %v4139_v17, %v4227_v0  ;;  %4146 = vlog2.f32 %v9887_v55  ;;  %v2794_v33 = vxor.u32 2147483648, %v2792_v40  ;;  %v198_v28 = vadd.f32 %v197_v61, %v196_v24 }
 0x23a   :  { %vm12245_vm2 = vmmov %vm12233_vm7  ;;  %vm2890_vm7 = vcmp.lt.s32.totalorder %v12241_v1, 0  ;;  %v2894_v6 = vsel %vm2893_vm10, 2143289344, %v4137_v47  ;;  %v224_v34 = vadd.f32 %v223_v44, %v222_v38  ;;  %v12261_v27 = vmov 0 }
 0x23b   :  { %v247_v56 = vsel %vm12245_vm2, %v2710_v20, 0.0  ;;  %vm12246_vm2 = vmmov %vm12242_vm12  ;;  %v2896_v31 = vsel %vm2888_vm6, %v4529_v11, %v2894_v6  ;;  %vm12257_vm12 = vcmp.ne.f32.partialorder %v12215_v36, %v12215_v36  ;;  %4148 = vpow2.f32 %v3181_v21 }
 0x23c   :  { %vm9903_vm4 = vmand %vm12246_vm2, %vm2888_vm6  ;;  %v248_v25 = vadd.f32 %v247_v56, %v246_v26  ;;  %v2898_v37 = vxor.u32 2147483648, %v2896_v31  ;;  %vm2995_vm6 = vcmp.gt.f32.partialorder %v9525_v10, 1065353216  ;;  %v199_v51 = vrot.slane %v198_v28, 2 }
 0x23d   :  { %vm12249_vm13 = vmmov %vm12246_vm2  ;;  %v225_v29 = vrot.slane %v224_v34, 2  ;;  %v12285_v14 = vmov 0 }
 0x23e   :  { %vm9915_vm10 = vmxor %vm12249_vm13, %vm2891_vm9  ;;  %vm2991_vm13 = vcmp.lt.f32.partialorder %v12124_v22, 0  ;;  %v249_v30 = vrot.slane %v248_v25, 4 }
 0x23f   :  { %vm2902_vm9 = vmor %vm9903_vm4, %vm9915_vm10  ;;  %v9986_v54 = vsel %vm2991_vm13, %v4669_v16, %v4503_v2  ;;  %vm12263_vm4 = vcmp.lt.s32.totalorder %v12124_v22, 0  ;;  %v226_v21 = vadd.f32 %v225_v29, %v224_v34 }
 0x240   :  { %vm9940_vm14 = vmand %vm2786_vm15, %vm11645_vm1  ;;  %v2903_v43 = vsel %vm2902_vm9, 2139095040, %v10838_v23  ;;  %v4143_v5 = vpop.eup %4142  ;;  %v250_v15 = vadd.f32 %v249_v30, %v248_v25 }
 0x241   :  { %vm12254_vm8 = vmor %vm9853_vm0, %vm9862_vm5  ;;  %v2795_v4 = vsel %vm9940_vm14, %v2794_v33, %v2792_v40  ;;  %vm12269_vm5 = vcmp.lt.f32.partialorder %v4227_v0, 0  ;;  %vm12272_vm14 = vcmp.eq.f32.partialorder %v12241_v1, 3212836864  ;;  %v3285_v61 = vmul.f32 %v4143_v5, %v4227_v0 }
 0x242   :  { %v2799_v46 = vsel %vm12254_vm8, 2139095040, %v10838_v23  ;;  %vm9957_vm15 = vmand %vm2890_vm7, %vm11645_vm1  ;;  %vm12260_vm7 = vcmp.ne.f32.partialorder %v12241_v1, %v12241_v1  ;;  %v2905_v47 = vsel %vm12272_vm14, 1065353216, %v2903_v43  ;;  %v4145_v26 = vpop.eup %4144  ;;  %v12293_v33 = vmov 0 }
 0x243   :  { %vm9967_vm2 = vmor %vm12257_vm12, %vm11994_vm11  ;;  %v2899_v24 = vsel %vm9957_vm15, %v2898_v37, %v2896_v31  ;;  %v4147_v31 = vpop.eup %4146  ;;  %4150 = vpow2.f32 %v3285_v61  ;;  %v227_v19 = vrot.slane %v226_v21, 1 }
 0x244   :  { %vm2997_vm0 = vmand %vm2991_vm13, %vm11805_vm3  ;;  %vm12266_vm13 = vcmp.eq.f32.partialorder %v12215_v36, 3212836864 }
 0x245   :  { %vm9993_vm8 = vmor %vm12260_vm7, %vm11994_vm11  ;;  %v2998_v62 = vsel %vm2997_vm0, 2143289344, %v4141_v41  ;;  %v2801_v18 = vsel %vm12266_vm13, 1065353216, %v2799_v46  ;;  %vm12267_vm7 = vcmp.eq.f32.partialorder %v12124_v22, 0  ;;  %vm12274_vm0 = vcmp.eq.f32.partialorder %v4227_v0, 0  ;;  %v4149_v43 = vpop.eup %4148 }
 0x246   :  { %v12262_v27 = vsel %vm9993_vm8, 4294967295, %v12261_v27  ;;  %vm10001_vm12 = vmand %vm12263_vm4, %vm11645_vm1  ;;  %v3000_v60 = vsel %vm12267_vm7, %v4529_v11, %v2998_v62  ;;  %vm3098_vm8 = vcmp.lt.s32.totalorder %v12183_v9, 0  ;;  %v200_v41 = vadd.f32 %v199_v51, %v198_v28 }
 0x247   :  { %vm12268_vm4 = vmmov %vm12267_vm7  ;;  %v3002_v58 = vxor.u32 2147483648, %v3000_v60 }
 0x248   :  { %vm10020_vm10 = vmand %vm12269_vm5, %vm12268_vm4  ;;  %v201_v62 = vrot.slane %v200_v41, 1 }
 0x249   :  { %vm12273_vm13 = vmmov %vm12269_vm5  ;;  %vm12275_vm5 = vcmp.eq.f32.partialorder %v12215_v36, 1065353216  ;;  %v3003_v13 = vsel %vm10001_vm12, %v3002_v58, %v3000_v60 }
 0x24a   :  { %vm3005_vm7 = vmxor %vm12273_vm13, %vm2995_vm6  ;;  %vm12278_vm6 = vcmp.eq.f32.partialorder %v4427_v32, 2139095040  ;;  %v202_v29 = vadd.f32 %v201_v62, %v200_v41 }
 0x24b   :  { %vm10036_vm4 = vmor %vm12275_vm5, %vm12274_vm0  ;;  %v2802_v56 = vsel %vm12278_vm6, %v2801_v18, %v2795_v4 }
 0x24c   :  { %vm3006_vm15 = vmor %vm10020_vm10, %vm3005_vm7  ;;  %vm12292_vm10 = vcmp.eq.f32.partialorder %v12124_v22, 1065353216 }
 0x24d   :  { %vm12279_vm13 = vmmov %vm12274_vm0  ;;  %vm12280_vm0 = vcmp.eq.f32.partialorder %v12241_v1, 1065353216  ;;  %v3007_v6 = vsel %vm3006_vm15, 2139095040, %v10838_v23 }
 0x24e   :  { %vm10051_vm5 = vmor %vm12280_vm0, %vm12279_vm13  ;;  %vm12287_vm0 = vcmp.lt.f32.partialorder %v12183_v9, 0 }
 0x24f   :  { %vm12283_vm7 = vmmov %vm12278_vm6  ;;  %vm12284_vm6 = vcmp.ne.f32.partialorder %v12124_v22, %v12124_v22  ;;  %v3118_v44 = vsel %vm12287_vm0, %v4669_v16, %v4503_v2 }
 0x250   :  { %v2906_v40 = vsel %vm12283_vm7, %v2905_v47, %v2899_v24  ;;  %vm10065_vm9 = vmor %vm12284_vm6, %vm11994_vm11  ;;  %vm12288_vm6 = vcmp.eq.f32.partialorder %v12124_v22, 3212836864  ;;  %vm12291_vm7 = vcmp.eq.f32.partialorder %v4227_v0, 0 }
 0x251   :  { %v12286_v14 = vsel %vm10065_vm9, 4294967295, %v12285_v14  ;;  %v3009_v25 = vsel %vm12288_vm6, 1065353216, %v3007_v6  ;;  %vm12289_vm13 = vmmov %vm12287_vm0  ;;  %vm12290_vm0 = vcmp.eq.f32.partialorder %v9340_v12, 2139095040  ;;  %v251_v12 = vrot.slane %v250_v15, 2 }
 0x252   :  { %vm3101_vm15 = vmand %vm12289_vm13, %vm11805_vm3  ;;  %v2807_v50 = vsel %vm12290_vm0, %v9871_v8, %v2802_v56  ;;  %vm12297_vm6 = vcmp.eq.f32.partialorder %v9415_v57, 2139095040  ;;  %vm12303_vm13 = vcmp.eq.f32.partialorder %v4427_v32, 2139095040  ;;  %vm12316_vm9 = vcmp.eq.f32.partialorder %v4427_v32, 2139095040 }
 0x253   :  { %vm10092_vm14 = vmor %vm12292_vm10, %vm12291_vm7  ;;  %v3102_v46 = vsel %vm3101_vm15, 2143289344, %v4145_v26  ;;  %v2911_v8 = vsel %vm12297_vm6, %v9923_v45, %v2906_v40  ;;  %vm12298_vm10 = vcmp.eq.f32.partialorder %v12183_v9, 0  ;;  %vm12300_vm7 = vcmp.lt.f32.partialorder %v4227_v0, 0 }
 0x254   :  { %v12294_v33 = vsel %vm10092_vm14, 4294967295, %v12293_v33  ;;  %vm10100_vm12 = vmand %vm3098_vm8, %vm11645_vm1  ;;  %v3104_v35 = vsel %vm12298_vm10, %v4529_v11, %v3102_v46  ;;  %v3010_v34 = vsel %vm12303_vm13, %v3009_v25, %v3003_v13  ;;  %vm12304_vm6 = vcmp.gt.f32.partialorder %v9684_v59, 1065353216 }
 0x255   :  { %vm12299_vm15 = vmmov %vm12298_vm10  ;;  %v3106_v57 = vxor.u32 2147483648, %v3104_v35  ;;  %v3389_v45 = vmul.f32 %v4147_v31, %v4227_v0  ;;  %v2811_v30 = vsel %vm9967_vm2, 2143289344, %v2807_v50  ;;  %vm12306_vm13 = vnez %v12262_v27 }
 0x256   :  { %vm10115_vm0 = vmand %vm12300_vm7, %vm12299_vm15  ;;  %v2915_v5 = vsel %vm12306_vm13, 2143289344, %v2911_v8  ;;  %vm12307_vm2 = vcmp.ne.f32.partialorder %v12183_v9, %v12183_v9  ;;  %v252_v60 = vadd.f32 %v251_v12, %v250_v15  ;;  %vm3203_vm13 = vcmp.gt.f32.partialorder %v9757_v53, 1065353216 }
 0x257   :  { %vm12305_vm14 = vmmov %vm12300_vm7  ;;  %vm3202_vm7 = vcmp.lt.s32.totalorder %v12210_v39, 0  ;;  %v3107_v4 = vsel %vm10100_vm12, %v3106_v57, %v3104_v35  ;;  %vm12312_vm12 = vcmp.eq.f32.partialorder %v4227_v0, 0  ;;  %4152 = vpow2.f32 %v3389_v45 }
 0x258   :  { %vm3109_vm10 = vmxor %vm12305_vm14, %vm12304_vm6  ;;  %vm12311_vm6 = vcmp.eq.f32.partialorder %v12183_v9, 3212836864  ;;  %v228_v56 = vadd.f32 %v227_v19, %v226_v21  ;;  %v253_v17 = vrot.slane %v252_v60, 1  ;;  %v10231_v25 = vmul.f32 0.020408163, %v202_v29 }
 0x259   :  { %vm3110_vm15 = vmor %vm10115_vm0, %vm3109_vm10  ;;  %vm12310_vm0 = vcmp.eq.f32.partialorder %v9525_v10, 2139095040  ;;  %vm12313_vm10 = vcmp.eq.f32.partialorder %v12183_v9, 1065353216  ;;  %v2813_v10 = vsel %vm10036_vm4, 1065353216, %v2811_v30 }
 0x25a   :  { %v3111_v18 = vsel %vm3110_vm15, 2139095040, %v10838_v23  ;;  %vm10143_vm14 = vmor %vm12307_vm2, %vm11994_vm11  ;;  %v3015_v27 = vsel %vm12310_vm0, %v9986_v54, %v3010_v34  ;;  %vm12317_vm0 = vcmp.lt.f32.partialorder %v12210_v39, 0  ;;  %v2917_v54 = vsel %vm10051_vm5, 1065353216, %v2915_v5 }
 0x25b   :  { %v3113_v20 = vsel %vm12311_vm6, 1065353216, %v3111_v18  ;;  %vm10156_vm15 = vmor %vm12313_vm10, %vm12312_vm12  ;;  %vm3224_vm12 = vcmp.ne.f32.partialorder %v12210_v39, %v12210_v39  ;;  %vm12320_vm10 = vnez %v12286_v14  ;;  %vm12323_vm5 = vcmp.lt.f32.partialorder %v4227_v0, 0 }
 0x25c   :  { %v3114_v24 = vsel %vm12316_vm9, %v3113_v20, %v3107_v4  ;;  %vm3205_vm6 = vmand %vm12317_vm0, %vm11805_vm3  ;;  %v3019_v15 = vsel %vm12320_vm10, 2143289344, %v3015_v27  ;;  %vm12321_vm0 = vcmp.eq.f32.partialorder %v12210_v39, 0  ;;  %v10245_v46 = vmul.f32 0.020408163, %v228_v56 }
 0x25d   :  { %v3206_v47 = vsel %vm3205_vm6, 2143289344, %v4149_v43  ;;  %vm10179_vm9 = vmand %vm3202_vm7, %vm11645_vm1  ;;  %vm12326_vm7 = vcmp.eq.f32.partialorder %v9684_v59, 2139095040  ;;  %v10285_v45 = vand.u32 2147483647, %v10231_v25 }
 0x25e   :  { %v3208_v38 = vsel %vm12321_vm0, %v4529_v11, %v3206_v47  ;;  %vm12322_vm4 = vmmov %vm12321_vm0  ;;  %v3119_v6 = vsel %vm12326_vm7, %v3118_v44, %v3114_v24  ;;  %vm12328_vm0 = vcmp.lt.f32.partialorder %v12210_v39, 0  ;;  %v4151_v44 = vpop.eup %4150  ;;  %v10296_v5 = vand.u32 2147483647, %v10245_v46 }
 0x25f   :  { %vm10192_vm6 = vmand %vm12323_vm5, %vm12322_vm4  ;;  %v3210_v61 = vxor.u32 2147483648, %v3208_v38  ;;  %v3222_v40 = vsel %vm12328_vm0, %v4669_v16, %v4503_v2  ;;  %vm3303_vm4 = vcmp.lt.f32.partialorder %v12232_v49, 0  ;;  %vm12331_vm0 = vnez %v12294_v33 }
 0x260   :  { %vm12327_vm10 = vmmov %vm12323_vm5  ;;  %vm12329_vm5 = vcmp.eq.f32.partialorder %v4227_v0, 1065353216  ;;  %v3021_v31 = vsel %vm12331_vm0, 1065353216, %v3019_v15  ;;  %v3123_v41 = vsel %vm10143_vm14, 2143289344, %v3119_v6  ;;  %v254_v33 = vadd.f32 %v253_v17, %v252_v60 }
 0x261   :  { %vm3213_vm2 = vmxor %vm12327_vm10, %vm3203_vm13  ;;  %v2814_v14 = vsel %vm12329_vm5, %v12215_v36, %v2813_v10  ;;  %vm3304_vm13 = vcmp.eq.f32.partialorder %v12232_v49, 0  ;;  %vm3306_vm10 = vcmp.lt.s32.totalorder %v12232_v49, 0  ;;  %v3211_v13 = vsel %vm10179_vm9, %v3210_v61, %v3208_v38  ;;  %v4153_v43 = vpop.eup %4152 }
 0x262   :  { %vm12330_vm7 = vmmov %vm12329_vm5  ;;  %vm12335_vm9 = vcmp.eq.f32.partialorder %v4227_v0, 0  ;;  %vm3307_vm14 = vcmp.gt.f32.partialorder %v9829_v42, 1065353216  ;;  %v3125_v57 = vsel %vm10156_vm15, 1065353216, %v3123_v41  ;;  %v10293_v19 = vmul.f32 0.020408163, %v254_v33 }
 0x263   :  { %v2918_v59 = vsel %vm12330_vm7, %v12241_v1, %v2917_v54  ;;  %vm3214_vm8 = vmor %vm10192_vm6, %vm3213_vm2  ;;  %vm12334_vm2 = vcmp.eq.f32.partialorder %v12210_v39, 3212836864  ;;  %vm3305_vm7 = vcmp.eq.f32.partialorder %v12232_v49, 1065353216  ;;  %v3326_v4 = vsel %vm3303_vm4, %v4669_v16, %v4503_v2 }
 0x264   :  { %v3215_v36 = vsel %vm3214_vm8, 2139095040, %v10838_v23  ;;  %vm10227_vm5 = vmor %vm3224_vm12, %vm11994_vm11  ;;  %vm12336_vm8 = vcmp.eq.f32.partialorder %v12210_v39, 1065353216  ;;  %vm12339_vm12 = vcmp.eq.f32.partialorder %v4427_v32, 2139095040  ;;  %v268_v12 = vadd.f32 %v2918_v59, %v2814_v14 }
 0x265   :  { %v3217_v21 = vsel %vm12334_vm2, 1065353216, %v3215_v36  ;;  %vm10241_vm6 = vmor %vm12336_vm8, %vm12335_vm9  ;;  %vm12340_vm2 = vcmp.eq.f32.partialorder %v4227_v0, 1065353216  ;;  %vm12341_vm9 = vcmp.eq.f32.partialorder %v9757_v53, 2139095040  ;;  %4154 = vlog2.f32 %v10285_v45 }
 0x266   :  { %v3218_v28 = vsel %vm12339_vm12, %v3217_v21, %v3211_v13  ;;  %vm3309_vm0 = vmand %vm3303_vm4, %vm11805_vm3  ;;  %v3022_v8 = vsel %vm12340_vm2, %v12124_v22, %v3021_v31  ;;  %vm3320_vm12 = vcmp.eq.f32.partialorder %v12232_v49, 3212836864  ;;  %vm3410_vm4 = vcmp.lt.s32.totalorder %v9832_v7, 0 }
 0x267   :  { %v3223_v35 = vsel %vm12341_vm9, %v3222_v40, %v3218_v28  ;;  %v3310_v37 = vsel %vm3309_vm0, 2143289344, %v4151_v44  ;;  %vm10264_vm8 = vmand %vm3306_vm10, %vm11645_vm1  ;;  %vm12344_vm0 = vcmp.lt.f32.partialorder %v4227_v0, 0  ;;  %vm3328_vm10 = vcmp.ne.f32.partialorder %v12232_v49, %v12232_v49 }
 0x268   :  { %v3312_v22 = vsel %vm3304_vm13, %v4529_v11, %v3310_v37  ;;  %vm10278_vm2 = vmand %vm12344_vm0, %vm3304_vm13  ;;  %v3227_v30 = vsel %vm10227_vm5, 2143289344, %v3223_v35  ;;  %vm3308_vm13 = vcmp.eq.f32.partialorder %v9829_v42, 2139095040  ;;  %vm3407_vm5 = vcmp.lt.f32.partialorder %v9832_v7, 0 }
 0x269   :  { %v3314_v62 = vxor.u32 2147483648, %v3312_v22  ;;  %vm12347_vm15 = vmmov %vm12344_vm0  ;;  %v269_v18 = vadd.f32 %v3022_v8, %v268_v12  ;;  %v3229_v51 = vsel %vm10241_vm6, 1065353216, %v3227_v30  ;;  %vm3411_vm6 = vcmp.gt.f32.partialorder %v9887_v55, 1065353216  ;;  %v12364_v12 = vld [vmem:[#allocation12_spill] sm:$0xff] }
 0x26a   :  { %vm3317_vm9 = vmxor %vm12347_vm15, %vm3307_vm14  ;;  %vm12348_vm14 = vcmp.eq.f32.partialorder %v4227_v0, 1065353216  ;;  %4156 = vlog2.f32 %v10296_v5  ;;  %v10345_v54 = vand.u32 2147483647, %v10293_v19 }
 0x26b   :  { %vm3318_vm0 = vmor %vm10278_vm2, %vm3317_vm9  ;;  %v3126_v3 = vsel %vm12348_vm14, %v12183_v9, %v3125_v57  ;;  %v3315_v60 = vsel %vm10264_vm8, %v3314_v62, %v3312_v22  ;;  %vm12351_vm8 = vcmp.eq.f32.partialorder %v4227_v0, 0  ;;  %vm12354_vm9 = vcmp.eq.f32.partialorder %v4427_v32, 2139095040 }
 0x26c   :  { %v3319_v27 = vsel %vm3318_vm0, 2139095040, %v10838_v23  ;;  %vm10317_vm2 = vmor %vm3328_vm10, %vm11994_vm11  ;;  %vm3408_vm10 = vcmp.eq.f32.partialorder %v9832_v7, 0  ;;  %v270_v29 = vadd.f32 %v3126_v3, %v269_v18  ;;  %4158 = vlog2.f32 %v10345_v54 }
 0x26d   :  { %v3321_v9 = vsel %vm3320_vm12, 1065353216, %v3319_v27  ;;  %vm10330_vm15 = vmor %vm3305_vm7, %vm12351_vm8  ;;  %vm3432_vm8 = vcmp.ne.f32.partialorder %v9832_v7, %v9832_v7 }
 0x26e   :  { %v3322_v10 = vsel %vm12354_vm9, %v3321_v9, %v3315_v60  ;;  %vm3413_vm12 = vmand %vm3407_vm5, %vm11805_vm3  ;;  %vm12356_vm3 = vcmp.lt.f32.partialorder %v4227_v0, 0  ;;  %vm3409_vm9 = vcmp.eq.f32.partialorder %v9832_v7, 1065353216 }
 0x26f   :  { %v3327_v47 = vsel %vm3308_vm13, %v3326_v4, %v3322_v10  ;;  %v3414_v58 = vsel %vm3413_vm12, 2143289344, %v4153_v43  ;;  %vm3417_vm7 = vmand %vm3410_vm4, %vm11645_vm1  ;;  %vm3424_vm4 = vcmp.eq.f32.partialorder %v9832_v7, 3212836864  ;;  %v4155_v40 = vpop.eup %4154 }
 0x270   :  { %vm12355_vm0 = vmmov %vm12348_vm14  ;;  %v3331_v15 = vsel %vm10317_vm2, 2143289344, %v3327_v47  ;;  %v3416_v38 = vsel %vm3408_vm10, %v4529_v11, %v3414_v58  ;;  %vm3412_vm2 = vcmp.eq.f32.partialorder %v9887_v55, 2139095040  ;;  %v3495_v31 = vmul.f32 %v4155_v40, %v12363_v48 }
 0x271   :  { %v3230_v63 = vsel %vm12355_vm0, %v12210_v39, %v3229_v51  ;;  %vm3420_vm14 = vmand %vm12356_vm3, %vm3408_vm10  ;;  %v3333_v42 = vsel %vm10330_vm15, 1065353216, %v3331_v15  ;;  %v3418_v26 = vxor.u32 2147483648, %v3416_v38  ;;  %v3430_v39 = vsel %vm3407_vm5, %v4669_v16, %v4503_v2 }
 0x272   :  { %vm12357_vm13 = vmmov %vm12356_vm3  ;;  %v271_v56 = vadd.f32 %v3230_v63, %v270_v29  ;;  %vm12362_vm3 = vcmask 1040384   ;;  %4160 = vpow2.f32 %v3495_v31 }
 0x273   :  { %vm3421_vm1 = vmxor %vm12357_vm13, %vm3411_vm6  ;;  %v3419_v11 = vsel %vm3417_vm7, %v3418_v26, %v3416_v38  ;;  %vm12359_vm6 = vcmp.eq.f32.partialorder %v4427_v32, 2139095040  ;;  %vm12360_vm7 = vcmp.eq.f32.partialorder %v4227_v0, 0  ;;  %vm12365_vm13 = vnez %v12364_v12 }
 0x274   :  { %vm3422_vm12 = vmor %vm3420_vm14, %vm3421_vm1  ;;  %v4157_v2 = vpop.eup %4156  ;;  %vm3514_vm14 = vcmp.eq.f32.partialorder %v10231_v25, 0 }
 0x275   :  { %v3423_v52 = vsel %vm3422_vm12, 2139095040, %v10838_v23  ;;  %vm12358_vm15 = vmmov %vm12355_vm0  ;;  %v3599_v32 = vmul.f32 %v4157_v2, %v12363_v48  ;;  %vm3618_vm12 = vcmp.eq.f32.partialorder %v10245_v46, 0 }
 0x276   :  { %v3334_v17 = vsel %vm12358_vm15, %v12232_v49, %v3333_v42  ;;  %v3425_v6 = vsel %vm3424_vm4, 1065353216, %v3423_v52  ;;  %vm3434_vm10 = vmor %vm3432_vm8, %vm11994_vm11  ;;  %v4159_v36 = vpop.eup %4158  ;;  %vm3513_vm11 = vcmp.lt.f32.partialorder %v10231_v25, 0  ;;  %vm3617_vm4 = vcmp.lt.f32.partialorder %v10245_v46, 0 }
 0x277   :  { %v3426_v55 = vsel %vm12359_vm6, %v3425_v6, %v3419_v11  ;;  %vm3436_vm0 = vmor %vm3409_vm9, %vm12360_vm7  ;;  %v272_v59 = vadd.f32 %v3334_v17, %v271_v56  ;;  %4162 = vpow2.f32 %v3599_v32  ;;  %v3703_v21 = vmul.f32 %v4159_v36, %v12363_v48 }
 0x278   :  { %v3431_v61 = vsel %vm3412_vm2, %v3430_v39, %v3426_v55  ;;  %vm12361_vm5 = vmmov %vm12358_vm15  ;;  %vm3517_vm8 = vcmp.gt.f32.partialorder %v10285_v45, 1065353216  ;;  %vm12368_vm9 = vcmp.lt.f32.partialorder %v12363_v48, 0 }
 0x279   :  { %v3435_v14 = vsel %vm3434_vm10, 2143289344, %v3431_v61  ;;  %4164 = vpow2.f32 %v3703_v21  ;;  %vm10396_vm1 = vmand %vm3513_vm11, %vm12365_vm13 }
 0x27a   :  { %v3437_v16 = vsel %vm3436_vm0, 1065353216, %v3435_v14  ;;  %vm10408_vm2 = vmand %vm12368_vm9, %vm3514_vm14 }
 0x27b   :  { %v3438_v49 = vsel %vm12361_vm5, %v9832_v7, %v3437_v16 }
 0x27c   :  { %v273_v44 = vsel %vm12362_vm3, %v3438_v49, 0.0  ;;  %v4161_v7 = vpop.eup %4160 }
 0x27d   :  { %v274_v13 = vadd.f32 %v273_v44, %v272_v59 }
 0x27f   :  { %v275_v1 = vrot.slane %v274_v13, 4 }
 0x281   :  { %v276_v41 = vadd.f32 %v275_v1, %v274_v13  ;;  %v4163_v35 = vpop.eup %4162 }
 0x283   :  { %v277_v50 = vrot.slane %v276_v41, 2 }
 0x285   :  { %v278_v33 = vadd.f32 %v277_v50, %v276_v41 }
 0x287   :  { %v279_v28 = vrot.slane %v278_v33, 1 }
 0x289   :  { %v280_v0 = vadd.f32 %v279_v28, %v278_v33 }
 0x28b   :  { %v10401_v37 = vmul.f32 0.020408163, %v280_v0 }
 0x28c   :  { %10 = vsyncpa [#allocation4], 0  ;;  %vm3621_vm15 = vcmp.gt.f32.partialorder %v10296_v5, 1065353216  ;;  %v3520_v22 = vsel %vm10396_vm1, 2143289344, %v4161_v7  ;;  %vm10753_vm0 = vcmp.lt.f32.partialorder %v10293_v19, 0  ;;  %v4165_v30 = vpop.eup %4164  ;;  %v12380_v18 = vld [vmem:[#allocation29_spill] sm:$0xff] }
 0x28d   :  { %vm3623_vm10 = vmand %vm3617_vm4, %vm12365_vm13  ;;  %v10419_v57 = vand.u32 2147483647, %v10401_v37  ;;  %v3522_v3 = vsel %vm3514_vm14, %v12380_v18, %v3520_v22  ;;  %v12386_v47 = vld [vmem:[#allocation13_spill] sm:$0xff]  ;;  %v12388_v39 = vld [vmem:[#allocation8_spill] sm:$0xff] }
 0x28e   :  { %vm12371_vm6 = vmmov %vm12368_vm9  ;;  %v3624_v43 = vsel %vm3623_vm10, 2143289344, %v4163_v35  ;;  %v3524_v20 = vxor.u32 2147483648, %v3522_v3  ;;  %v12391_v61 = vld [vmem:[#allocation33_spill] sm:$0xff]  ;;  %v12392_v40 = vld [vmem:[#allocation10_spill] sm:$0xff] }
 0x28f   :  { %vm10425_vm7 = vmxor %vm12371_vm6, %vm3517_vm8  ;;  %4166 = vlog2.f32 %v10419_v57  ;;  %v3626_v60 = vsel %vm3618_vm12, %v12380_v18, %v3624_v43  ;;  %vm3722_vm8 = vcmp.eq.f32.partialorder %v10293_v19, 0  ;;  %v3536_v14 = vsel %vm3513_vm11, %v12392_v40, %v12391_v61  ;;  %v12393_v16 = vld [vmem:[#allocation9_spill] sm:$0xff] }
 0x290   :  { %vm12374_vm5 = vmmov %vm12371_vm6  ;;  %vm3725_vm6 = vcmp.gt.f32.partialorder %v10345_v54, 1065353216  ;;  %v3628_v51 = vxor.u32 2147483648, %v3626_v60  ;;  %v3640_v59 = vsel %vm3617_vm4, %v12392_v40, %v12391_v61  ;;  %vm3826_vm11 = vcmp.eq.f32.partialorder %v10401_v37, 0 }
 0x291   :  { %vm10432_vm3 = vmand %vm12374_vm5, %vm3618_vm12  ;;  %vm3620_vm12 = vcmp.lt.s32.totalorder %v10245_v46, 0  ;;  %vm12397_vm4 = vcmp.eq.f32.partialorder %v12363_v48, 0 }
 0x292   :  { %vm12377_vm1 = vmmov %vm12374_vm5  ;;  %vm3516_vm5 = vcmp.lt.s32.totalorder %v10231_v25, 0 }
 0x293   :  { %vm10439_vm9 = vmxor %vm12377_vm1, %vm3621_vm15 }
 0x294   :  { %vm3727_vm10 = vmand %vm10753_vm0, %vm12365_vm13 }
 0x295   :  { %vm3528_vm15 = vmor %vm10408_vm2, %vm10425_vm7  ;;  %v3728_v27 = vsel %vm3727_vm10, 2143289344, %v4165_v30  ;;  %vm3530_vm10 = vcmp.eq.f32.partialorder %v10231_v25, 3212836864 }
 0x296   :  { %vm3632_vm14 = vmor %vm10432_vm3, %vm10439_vm9  ;;  %v3730_v24 = vsel %vm3722_vm8, %v12380_v18, %v3728_v27  ;;  %vm12387_vm3 = vnez %v12386_v47  ;;  %v3529_v58 = vsel %vm3528_vm15, 2139095040, %v10838_v23  ;;  %vm3518_vm15 = vcmp.eq.f32.partialorder %v10285_v45, 2139095040 }
 0x297   :  { %vm10465_vm0 = vmand %vm12377_vm1, %vm3722_vm8  ;;  %v3633_v29 = vsel %vm3632_vm14, 2139095040, %v10838_v23  ;;  %vm3634_vm8 = vcmp.eq.f32.partialorder %v10245_v46, 3212836864  ;;  %v3732_v38 = vxor.u32 2147483648, %v3730_v24  ;;  %v3531_v26 = vsel %vm3530_vm10, 1065353216, %v3529_v58 }
 0x298   :  { %vm12383_vm2 = vmmov %vm12377_vm1  ;;  %vm3622_vm14 = vcmp.eq.f32.partialorder %v10296_v5, 2139095040  ;;  %v3635_v11 = vsel %vm3634_vm8, 1065353216, %v3633_v29  ;;  %vm3515_vm10 = vcmp.eq.f32.partialorder %v10231_v25, 1065353216  ;;  %vm12394_vm8 = vnez %v12393_v16 }
 0x299   :  { %vm10472_vm7 = vmxor %vm12383_vm2, %vm3725_vm6  ;;  %vm3724_vm6 = vcmp.lt.s32.totalorder %v10293_v19, 0  ;;  %v4167_v42 = vpop.eup %4166  ;;  %vm12389_vm2 = vcmp.eq.f32.partialorder %v12388_v39, 2139095040 }
 0x29a   :  { %vm3523_vm9 = vmand %vm3516_vm5, %vm12387_vm3  ;;  %v3807_v52 = vmul.f32 %v4167_v42, %v12363_v48 }
 0x29b   :  { %vm3627_vm1 = vmand %vm3620_vm12, %vm12387_vm3  ;;  %v3525_v63 = vsel %vm3523_vm9, %v3524_v20, %v3522_v3  ;;  %vm3538_vm12 = vcmp.ne.f32.partialorder %v10231_v25, %v10231_v25  ;;  %v381_v3 = vlaneseq  ;;  %v379_v20 = vld [vmem:[%s10631_s3] sm:$0x3]  ;;  %s4198_s3 = smov [#allocation3]  }
 0x29c   :  { %v3629_v15 = vsel %vm3627_vm1, %v3628_v51, %v3626_v60  ;;  %vm3736_vm5 = vmor %vm10465_vm0, %vm10472_vm7  ;;  %v3532_v56 = vsel %vm12389_vm2, %v3531_v26, %v3525_v63  ;;  %vm3738_vm7 = vcmp.eq.f32.partialorder %v10293_v19, 3212836864  ;;  %4168 = vpow2.f32 %v3807_v52  ;;  %s507_s12 = sshll.u32 %s4198_s3, 4  ;;  %s508_s12 = int_to_ptr.vmem [resolvable:$true] %s507_s12 }
 0x29d   :  { %vm12390_vm9 = vmmov %vm12389_vm2  ;;  %v3737_v6 = vsel %vm3736_vm5, 2139095040, %v10838_v23  ;;  %vm3642_vm1 = vcmp.ne.f32.partialorder %v10245_v46, %v10245_v46  ;;  %v3537_v2 = vsel %vm3518_vm15, %v3536_v14, %v3532_v56  ;;  %vm3726_vm15 = vcmp.eq.f32.partialorder %v10345_v54, 2139095040  ;;  %s4172_s13 = scalar_lea.vmem %s508_s12, 128  ;;  %p4177_p1 = scmp.lt.s32.totalorder %s508_s12, %s508_s12 }
 0x29e   :  { %v3636_v17 = vsel %vm12390_vm9, %v3635_v11, %v3629_v15  ;;  %vm3731_vm0 = vmand %vm3724_vm6, %vm12387_vm3  ;;  %v3739_v31 = vsel %vm3738_vm7, 1065353216, %v3737_v6  ;;  %vm3829_vm9 = vcmp.gt.f32.partialorder %v10419_v57, 1065353216  ;;  %vm3746_vm7 = vcmp.ne.f32.partialorder %v10293_v19, %v10293_v19  ;;  %p4173_p0 = scmp.ne.s32.totalorder %s508_s12, %s4172_s13  ;;  %p4178_p2 = scmp.lt.s32.totalorder %s4172_s13, %s4172_s13 }
 0x29f   :  { %v3733_v55 = vsel %vm3731_vm0, %v3732_v38, %v3730_v24  ;;  %vm10520_vm6 = vmor %vm3538_vm12, %vm12394_vm8  ;;  %v3641_v44 = vsel %vm3622_vm14, %v3640_v59, %v3636_v17  ;;  %vm3619_vm12 = vcmp.eq.f32.partialorder %v10245_v46, 1065353216  ;;  %vm12398_vm14 = vcmp.lt.f32.partialorder %v10293_v19, 0 }
 0x2a0   :  { %vm3542_vm5 = vmor %vm3515_vm10, %vm12397_vm4  ;;  %v3740_v45 = vsel %vm12389_vm2, %v3739_v31, %v3733_v55  ;;  %v3541_v5 = vsel %vm10520_vm6, 2143289344, %v3537_v2  ;;  %v3744_v32 = vsel %vm12398_vm14, %v12392_v40, %v12391_v61  ;;  %vm12399_vm10 = vcmp.lt.f32.partialorder %v12363_v48, 0  ;;  %p4179_p3 = por %p4178_p2, %p4177_p1 }
 0x2a1   :  { %vm3644_vm0 = vmor %vm3642_vm1, %vm12394_vm8  ;;  %v3745_v36 = vsel %vm3726_vm15, %v3744_v32, %v3740_v45  ;;  %vm12405_vm2 = vcmp.eq.f32.partialorder %v12363_v48, 0  ;;  %vm3825_vm14 = vcmp.lt.f32.partialorder %v10401_v37, 0  ;;  %v3543_v41 = vsel %vm3542_vm5, 1065353216, %v3541_v5 }
 0x2a2   :  { %v3645_v13 = vsel %vm3644_vm0, 2143289344, %v3641_v44  ;;  %vm10548_vm4 = vmand %vm12399_vm10, %vm3826_vm11  ;;  %vm3723_vm3 = vcmp.eq.f32.partialorder %v10293_v19, 1065353216  ;;  %vm12406_vm5 = vcmp.eq.f32.partialorder %v12363_v48, 1065353216  ;;  %v382_v60 = vshrl.u32 %v381_v3, 7  ;;  %p4180_p4 = pnand %p4179_p3, %p4173_p0 }
 0x2a3   :  { %vm12402_vm1 = vmmov %vm12399_vm10  ;;  %v3544_v28 = vsel %vm12406_vm5, %v10231_v25, %v3543_v41 }
 0x2a4   :  { %vm10554_vm6 = vmxor %vm12402_vm1, %vm3829_vm9  ;;  %v383_v27 = vsub.s32 0, %v382_v60  ;;  %v387_v51 = vsub.s32 1, %v382_v60 }
 0x2a5   :  { %vm3646_vm0 = vmor %vm3619_vm12, %vm12405_vm2 }
 0x2a6   :  { %v3647_v21 = vsel %vm3646_vm0, 1065353216, %v3645_v13  ;;  %vm3748_vm10 = vmor %vm3746_vm7, %vm12394_vm8  ;;  %v4169_v33 = vpop.eup %4168  ;;  %v384_v9 = vrot.slane %v379_v20, %v383_v27  ;;  %v388_v24 = vrot.slane %v379_v20, %v387_v51 }
 0x2a7   :  { %v3749_v50 = vsel %vm3748_vm10, 2143289344, %v3745_v36  ;;  %vm3840_vm15 = vmor %vm10548_vm4, %vm10554_vm6  ;;  %vm3830_vm4 = vcmp.eq.f32.partialorder %v10419_v57, 2139095040  ;;  %vm12409_vm6 = vnez %v12386_v47  ;;  %vm12410_vm10 = vcmask 1041409  }
 0x2a8   :  { %vm3831_vm9 = vmand %vm3825_vm14, %vm12365_vm13  ;;  %v3841_v35 = vsel %vm3840_vm15, 2139095040, %v10838_v23  ;;  %vm3842_vm13 = vcmp.eq.f32.partialorder %v10401_v37, 3212836864  ;;  %vm12412_vm15 = vcmp.eq.f32.partialorder %v12388_v39, 2139095040  ;;  %v3848_v57 = vsel %vm3825_vm14, %v12392_v40, %v12391_v61 }
 0x2a9   :  { %vm12407_vm12 = vmmov %vm12406_vm5  ;;  %v3832_v7 = vsel %vm3831_vm9, 2143289344, %v4169_v33  ;;  %v3843_v22 = vsel %vm3842_vm13, 1065353216, %v3841_v35  ;;  %vm12416_vm13 = vcmask 1043459   ;;  %vm485_vm14 = vcmask 519168  }
 0x2aa   :  { %v3648_v0 = vsel %vm12407_vm12, %v10245_v46, %v3647_v21  ;;  %vm12408_vm7 = vmmov %vm12405_vm2  ;;  %vm3828_vm2 = vcmp.lt.s32.totalorder %v10401_v37, 0  ;;  %v3834_v12 = vsel %vm3826_vm11, %v12380_v18, %v3832_v7  ;;  %vm3827_vm11 = vcmp.eq.f32.partialorder %v10401_v37, 1065353216 }
 0x2ab   :  { %vm3750_vm1 = vmor %vm3723_vm3, %vm12408_vm7  ;;  %v3836_v25 = vxor.u32 2147483648, %v3834_v12  ;;  %vm3850_vm3 = vcmp.ne.f32.partialorder %v10401_v37, %v10401_v37  ;;  %v400_v46 = vsel %vm12410_vm10, %v3648_v0, %v3544_v28 }
 0x2ac   :  { %v3751_v8 = vsel %vm3750_vm1, 1065353216, %v3749_v50  ;;  %vm3835_vm0 = vmand %vm3828_vm2, %vm12409_vm6  ;;  %vm12414_vm1 = vcmask 1042434  }
 0x2ad   :  { %vm12411_vm9 = vmmov %vm12406_vm5  ;;  %v3837_v23 = vsel %vm3835_vm0, %v3836_v25, %v3834_v12 }
 0x2ae   :  { %v3752_v34 = vsel %vm12411_vm9, %v10293_v19, %v3751_v8  ;;  %v3844_v53 = vsel %vm12412_vm15, %v3843_v22, %v3837_v23  ;;  %vm3852_vm5 = vmor %vm3850_vm3, %vm12394_vm8  ;;  %vm483_vm8 = vcmask 1043456  }
 0x2af   :  { %v3849_v43 = vsel %vm3830_vm4, %v3848_v57, %v3844_v53  ;;  %vm12413_vm12 = vmmov %vm12408_vm7  ;;  %v402_v19 = vsel %vm12414_vm1, %v3752_v34, %v400_v46  ;;  %vm498_vm4 = vcmask 523268  }
 0x2b0   :  { %v3853_v30 = vsel %vm3852_vm5, 2143289344, %v3849_v43  ;;  %vm3854_vm7 = vmor %vm3827_vm11, %vm12413_vm12 }
 0x2b1   :  { %v3855_v62 = vsel %vm3854_vm7, 1065353216, %v3853_v30  ;;  %vm12415_vm2 = vmmov %vm12411_vm9 }
 0x2b2   :  { %v3856_v4 = vsel %vm12415_vm2, %v10401_v37, %v3855_v62  ;;  %vm499_vm6 = vmor %vm498_vm4, %vm483_vm8 }
 0x2b3   :  { %v404_v18 = vsel %vm12416_vm13, %v3856_v4, %v402_v19 }
 0x2b4   :  { %475 = vmatmul.mubr.f32.vlgmr.msra.gmra.mrb[0].mxu0 %v404_v18 }
 0x387   :  { %v476_v10 = vpop.f32.mrb[0].mxu0 }
 0x388   :  { %v477_v47 = vadd.f32 %v476_v10, %v384_v9  ;;  %v478_v58 = vpop.f32.mrb[1].mxu0 }
 0x389   :  { %v479_v29 = vadd.f32 %v478_v58, %v388_v24 }
 0x38a   :  { %v481_v48 = vmul.f32 %v477_v47, %v477_v47 }
 0x38b   :  { %v482_v37 = vmul.f32 %v479_v29, %v479_v29 }
 0x38c   :  { %v484_v63 = vsel %vm483_vm8, %v481_v48, 0.0 }
 0x38d   :  { %v486_v15 = vsel %vm485_vm14, %v482_v37, 0.0 }
 0x38e   :  { %v487_v38 = vadd.f32 %v486_v15, %v484_v63 }
 0x390   :  { %488 = vadd.xlane.f32.xlu0 %v487_v38 }
 0x41d   :  { %v489_v42 = vpop.xlane.xlu0 %488 }
 0x41e   :  { %v490_v26 = vmax.f32 %v489_v42, 1e-24 }
 0x420   :  { %4170 = vrsqrt.f32 %v490_v26 }
 0x42a   :  { %v4171_v11 = vpop.eup %4170 }
 0x42b   :  { %v492_v52 = vmul.f32 %v4171_v11, %v477_v47  ;;  %v493_v39 = vmul.f32 %v4171_v11, %v479_v29 }
 0x42d   :  { %v496_v56 = vcombine.low %v492_v52, %v493_v39 }
 0x42f   :  { %500 = vst.msk [vmem:[#allocation3] sm:$0xff] %vm499_vm6, %v496_v56 }
 0x430   :  { %4183 = shalt.err (!%p4180_p4)
}
 0x431   :  { %s4184_s16 = scalar_lea.hbm %s10632_s4, 128 }
 0x432   :  { %p4185_p5 = scmp.ne.s32.totalorder %s10632_s4, %s4184_s16  ;;  %p4188_p6 = scmp.lt.u32.totalorder %s4184_s16, %s10632_s4 }
 0x434   :  { %p4190_p7 = pnand %p4188_p6, %p4185_p5 }
 0x436   :  { %4193 = shalt.err (!%p4190_p7)
}
 0x437   :  { %510 = dma.vmem_to_hbm [thread:$0]  %s508_s12, 128, %s10632_s4, [#allocation4]  }
 0x438   :  { %4194 = dma.done.wait [#allocation4], 128  }
 0x439   :  { %4195 = vsyncadd [#allocation4], 4294967168 }
 0x43a   :  { %514 = vsyncpa [#allocation4], 1 }

</bundles_post_ra>
